<compile_context>
chip_gen: v7x
topology: tpu7x:2x2x1
jax: 0.10.0
libtpu: 0.0.40
codegen_flags: <defaults>
</compile_context>

<pallas_src>
import functools

import jax
import jax.numpy as jnp
from jax.experimental import pallas as pl
from jax.experimental.pallas import tpu as pltpu


# ----------------------------------------------------------------------------
# Generation-aware budgets
# ----------------------------------------------------------------------------
@functools.lru_cache(maxsize=None)
def _vmem_limit_bytes():
    """~3/4 of per-core VMEM: ~96 MiB on v5e/v6e (128 MiB), ~48 MiB on v7x (64 MiB)."""
    try:
        cap = int(pltpu.get_tpu_info().vmem_capacity_bytes)
    except Exception:
        cap = 64 * 1024 * 1024
    return min((cap * 3) // 4, 96 * 1024 * 1024)


def _pick_tn(Cp):
    # v6e/v7x MXU is 2x256x256: use 256-wide output tiles when the channel pad
    # allows; tn=256 is merely unnecessary (not harmful) on v5e's 128-wide MXU.
    return 256 if Cp % 256 == 0 else 128


def _pick_tq(HW):
    for t in (512, 256, 128, 64):
        if HW % t == 0:
            return t
    return HW


# ----------------------------------------------------------------------------
# Pallas kernels
# ----------------------------------------------------------------------------
def conv3x3_bn_kernel(xph_ref, w_ref, scale_ref, shift_ref, o_ref, tap_ref, *,
                      stride, Ho, Wo, relu):
    """Fused 3x3 conv (9 shifted taps) + folded BatchNorm + optional ReLU.

    xph_ref:  (1, s*s, Hq, Wq, Cin_p) bf16  phase-split, spatially padded NHWC input
    w_ref:    (9, Cin_p, tn)          bf16  per-tap weight matrices
    scale/shift: (1, tn)              f32   folded BN
    o_ref:    (1, Ho*Wo, tn)
    tap_ref:  (9, Ho*Wo, Cin_p)       bf16  persistent scratch: taps packed once/image
    """
    s = stride
    tn = o_ref.shape[-1]
    cin = xph_ref.shape[-1]

    # Pack the 9 shifted taps into MXU-ready (HW, Cin) matrices once per image;
    # all Cout tiles (grid axis 1, "arbitrary") reuse the scratch — the slice /
    # relayout / cast cost is no longer paid per output tile.
    @pl.when(pl.program_id(1) == 0)
    def _pack_taps():
        for t in range(9):
            di, dj = divmod(t, 3)
            phase = (di % s) * s + (dj % s)
            x_tap = xph_ref[0, phase, pl.ds(di // s, Ho), pl.ds(dj // s, Wo), :]
            tap_ref[t] = x_tap.reshape(Ho * Wo, cin).astype(jnp.bfloat16)

    acc = jnp.zeros((Ho * Wo, tn), jnp.float32)
    for t in range(9):                       # unrolled: LLO sees all 9 MXU pushes
        acc = acc + jnp.dot(tap_ref[t], w_ref[t],
                            preferred_element_type=jnp.float32)
    y = acc * scale_ref[...] + shift_ref[...]
    if relu:
        y = jnp.maximum(y, 0.0)
    o_ref[0] = y.astype(o_ref.dtype)


def tail_kernel(y_ref, xs_ref, wsc_ref, scs_ref, shs_ref, w1_ref, w2_ref,
                wq_ref, bq_ref, wk_ref, bk_ref, wv_ref, bv_ref, gamma_ref,
                o_ref, se_sc, k_sc, v_sc, *, tq, identity_shortcut):
    """Per (batch, query-tile): SE -> spatial self-attention -> + shortcut -> ReLU.

    y_ref:  (1, HW, Cp) bf16   conv2+bn2 output (resident across query tiles)
    xs_ref: (1, tq, Cxs)       shortcut input tile (f32 identity / bf16 projection)
    o_ref:  (1, tq, Cp) f32
    scratch: se (1,Cp) f32, k (HW,Cqp) bf16, v (HW,Cp) bf16 — computed once/image.
    """
    i = pl.program_id(1)

    @pl.when(i == 0)
    def _precompute():
        y = y_ref[0].astype(jnp.float32)                                     # (HW, Cp)
        # SE: squeeze (spatial mean) + 2 tiny linears (padded channels stay 0).
        mean = jnp.mean(y, axis=0, keepdims=True)                            # (1, Cp)
        h = jnp.maximum(jnp.dot(mean, w1_ref[...],
                                preferred_element_type=jnp.float32), 0.0)    # (1, Crp)
        se = jax.nn.sigmoid(jnp.dot(h, w2_ref[...],
                                    preferred_element_type=jnp.float32))     # (1, Cp)
        se_sc[...] = se
        xb = (y * se).astype(jnp.bfloat16)                                   # (HW, Cp)
        k = jnp.dot(xb, wk_ref[...], preferred_element_type=jnp.float32) + bk_ref[...]
        v = jnp.dot(xb, wv_ref[...], preferred_element_type=jnp.float32) + bv_ref[...]
        k_sc[...] = k.astype(jnp.bfloat16)
        v_sc[...] = v.astype(jnp.bfloat16)

    # --- this query tile ---
    row0 = pl.multiple_of(i * tq, tq)
    x_t = y_ref[0, pl.ds(row0, tq), :].astype(jnp.float32) * se_sc[...]      # (tq, Cp)
    xb_t = x_t.astype(jnp.bfloat16)
    q_t = jnp.dot(xb_t, wq_ref[...], preferred_element_type=jnp.float32) + bq_ref[...]
    # Contraction on the last dim of both operands (same pattern as the flash
    # reference kernel) — no separate k transpose is materialized.
    s = jax.lax.dot_general(q_t.astype(jnp.bfloat16), k_sc[...],
                            (((1,), (1,)), ((), ())),
                            preferred_element_type=jnp.float32)              # (tq, HW)
    # softmax (no 1/sqrt(d) scale — matches the PyTorch module); EUP reciprocal.
    s = jnp.exp(s - jnp.max(s, axis=-1, keepdims=True))
    att = s * pl.reciprocal(jnp.sum(s, axis=-1, keepdims=True), approx=True)
    out = jnp.dot(att.astype(jnp.bfloat16), v_sc[...],
                  preferred_element_type=jnp.float32)                        # (tq, Cp)
    res = gamma_ref[0, 0] * out + x_t

    # --- shortcut branch ---
    if identity_shortcut:
        sc = xs_ref[0].astype(jnp.float32)          # exact f32 skip, no matmul
    else:
        sc = jnp.dot(xs_ref[0], wsc_ref[...], preferred_element_type=jnp.float32)
        sc = sc * scs_ref[...] + shs_ref[...]       # fused 1x1 conv + folded BN

    # TODO(synk): Dropout2d(0.2) is identity in eval mode; training-mode
    # stochastic channel dropout is not implemented here.
    o_ref[0] = jnp.maximum(res + sc, 0.0).astype(o_ref.dtype)


# ----------------------------------------------------------------------------
# Kernel wrappers
# ----------------------------------------------------------------------------
def conv3x3_bn(xph, w, scale, shift, *, stride, Ho, Wo, relu,
               out_dtype=jnp.bfloat16):
    """Fused 3x3 conv + BN (+ReLU). Grid (B, Cout_tiles); taps packed once per image.

    TODO(synk): for very large feature maps, add a spatial (halo) grid axis
    instead of keeping the whole per-batch image + tap scratch resident in VMEM.
    """
    B = xph.shape[0]
    s2, Hq, Wq, Cin_p = xph.shape[1:]
    Cp = w.shape[-1]
    tn = _pick_tn(Cp)
    assert Cp % tn == 0
    kern = functools.partial(conv3x3_bn_kernel, stride=stride, Ho=Ho, Wo=Wo,
                             relu=relu)
    return pl.pallas_call(
        kern,
        out_shape=jax.ShapeDtypeStruct((B, Ho * Wo, Cp), out_dtype),
        grid=(B, Cp // tn),
        in_specs=[
            pl.BlockSpec((1, s2, Hq, Wq, Cin_p), lambda b, n: (b, 0, 0, 0, 0)),
            pl.BlockSpec((9, Cin_p, tn), lambda b, n: (0, 0, n)),
            pl.BlockSpec((1, tn), lambda b, n: (0, n)),
            pl.BlockSpec((1, tn), lambda b, n: (0, n)),
        ],
        out_specs=pl.BlockSpec((1, Ho * Wo, tn), lambda b, n: (b, 0, n)),
        scratch_shapes=[pltpu.VMEM((9, Ho * Wo, Cin_p), jnp.bfloat16)],
        compiler_params=pltpu.CompilerParams(
            # Cout-tile axis is "arbitrary" so each core sweeps it in order and
            # the tap scratch packed at n==0 stays valid for all its tiles.
            dimension_semantics=("parallel", "arbitrary"),
            vmem_limit_bytes=_vmem_limit_bytes()),
    )(xph, w, scale, shift)


def tail(y2, xs, p, *, identity_shortcut):
    """SE + query-tiled attention + fused shortcut + residual add + ReLU."""
    B, HW, Cp = y2.shape
    Cxs = xs.shape[-1]
    Cqp = p["wqT"].shape[-1]
    tq = _pick_tq(HW)
    nq = HW // tq

    def full(a):
        nd = a.ndim
        return pl.BlockSpec(a.shape, lambda b, i, _nd=nd: (0,) * _nd)

    kern = functools.partial(tail_kernel, tq=tq,
                             identity_shortcut=identity_shortcut)
    return pl.pallas_call(
        kern,
        out_shape=jax.ShapeDtypeStruct((B, HW, Cp), jnp.float32),
        grid=(B, nq),
        in_specs=[
            pl.BlockSpec((1, HW, Cp), lambda b, i: (b, 0, 0)),    # resident across i
            pl.BlockSpec((1, tq, Cxs), lambda b, i: (b, i, 0)),
            full(p["wsc"]), full(p["bns_scale"]), full(p["bns_shift"]),
            full(p["se_w1T"]), full(p["se_w2T"]),
            full(p["wqT"]), full(p["bq"]), full(p["wkT"]), full(p["bk"]),
            full(p["wvT"]), full(p["bv"]),
            pl.BlockSpec(memory_space=pltpu.MemorySpace.SMEM),    # scalar gamma
        ],
        out_specs=pl.BlockSpec((1, tq, Cp), lambda b, i: (b, i, 0)),
        scratch_shapes=[
            pltpu.VMEM((1, Cp), jnp.float32),       # SE scale
            pltpu.VMEM((HW, Cqp), jnp.bfloat16),    # K
            pltpu.VMEM((HW, Cp), jnp.bfloat16),     # V
        ],
        compiler_params=pltpu.CompilerParams(
            dimension_semantics=("parallel", "arbitrary"),
            vmem_limit_bytes=_vmem_limit_bytes()),
    )(y2, xs, p["wsc"], p["bns_scale"], p["bns_shift"],
      p["se_w1T"], p["se_w2T"], p["wqT"], p["bq"], p["wkT"], p["bk"],
      p["wvT"], p["bv"], p["gamma"])


# ----------------------------------------------------------------------------
# Plain-JAX glue: spatial pad + stride "phase split" (1x bytes, no 9x im2col)
# ----------------------------------------------------------------------------
def phase_split(xp, s):
    """(B, Hp, Wp, C) -> (B, s*s, ceil(Hp/s), ceil(Wp/s), C) with
    out[b, p*s+q, i, j] = xp[b, i*s+p, j*s+q]."""
    B, Hp, Wp, C = xp.shape
    if s == 1:
        return xp.reshape(B, 1, Hp, Wp, C)
    Hq = -(-Hp // s)
    Wq = -(-Wp // s)
    xp = jnp.pad(xp, ((0, 0), (0, Hq * s - Hp), (0, Wq * s - Wp), (0, 0)))
    xph = xp.reshape(B, Hq, s, Wq, s, C).transpose(0, 2, 4, 1, 3, 5)
    return xph.reshape(B, s * s, Hq, Wq, C)


# ----------------------------------------------------------------------------
# Full ResidualBlock forward (public interface stays NCHW, like PyTorch)
# ----------------------------------------------------------------------------
def residual_block_forward(x, params):
    B, Cin, H, W = x.shape
    stride = params["stride"]
    Cout, Cp, Cin_p = params["Cout"], params["Cp"], params["Cin_p"]
    identity = params["identity_shortcut"]
    Ho = (H + 2 - 3) // stride + 1
    Wo = (W + 2 - 3) // stride + 1

    # NCHW -> NHWC once; zero-pad channels to a lane-dense multiple of 128.
    xh = jnp.transpose(x, (0, 2, 3, 1))
    xh = jnp.pad(xh, ((0, 0), (0, 0), (0, 0), (0, Cin_p - Cin)))       # f32 NHWC

    # conv1 + bn1 + relu (3x3, stride, pad=1) — bf16 activations on the conv path.
    xp1 = jnp.pad(xh.astype(jnp.bfloat16), ((0, 0), (1, 1), (1, 1), (0, 0)))
    y1 = conv3x3_bn(phase_split(xp1, stride), params["w1"],
                    params["bn1_scale"], params["bn1_shift"],
                    stride=stride, Ho=Ho, Wo=Wo, relu=True)            # (B,HoWo,Cp) bf16

    # conv2 + bn2 (3x3, stride 1, pad=1): halo pad done on the bf16 tensor.
    # TODO(synk): fold the 1-px halo into the conv kernel (masked edge taps) to
    # remove this XLA-side pad copy entirely.
    xp2 = jnp.pad(y1.reshape(B, Ho, Wo, Cp), ((0, 0), (1, 1), (1, 1), (0, 0)))
    y2 = conv3x3_bn(phase_split(xp2, 1), params["w2"],
                    params["bn2_scale"], params["bn2_shift"],
                    stride=1, Ho=Ho, Wo=Wo, relu=False)                # (B,HoWo,Cp) bf16

    # Shortcut input: identity shortcut stays exact f32 (no matmul); the
    # projection shortcut's 1x1 conv + BN is fused into the tail kernel.
    if identity:
        xs = xh.reshape(B, Ho * Wo, Cin_p)                             # f32 exact skip
    else:
        xs = xh[:, ::stride, ::stride, :].reshape(B, Ho * Wo, Cin_p)
        xs = xs.astype(jnp.bfloat16)

    out = tail(y2, xs, params, identity_shortcut=identity)             # (B,HoWo,Cp) f32
    out = out[:, :, :Cout].reshape(B, Ho, Wo, Cout)
    return jnp.transpose(out, (0, 3, 1, 2))                            # back to NCHW


# ----------------------------------------------------------------------------
# Deterministic parameter construction (BN folded for inference, channels padded)
# ----------------------------------------------------------------------------
def make_params(key, Cin, Cout, stride):
    f32, bf16 = jnp.float32, jnp.bfloat16

    def rup(n, m=128):
        return ((n + m - 1) // m) * m

    Cp, Cin_p = rup(Cout), rup(Cin)
    Cr, Cq = max(Cout // 16, 1), max(Cout // 8, 1)
    Crp, Cqp = rup(Cr), rup(Cq)

    ks = jax.random.split(key, 16)

    def pad2(a, r, c):
        return jnp.pad(a, ((0, r - a.shape[0]), (0, c - a.shape[1])))

    def padvec(a, n):
        return jnp.pad(a, (0, n - a.shape[0])).reshape(1, n)

    def bn_fold(k, C):
        k1, k2, k3, k4 = jax.random.split(k, 4)
        gamma = 1.0 + 0.1 * jax.random.normal(k1, (C,), f32)
        beta = 0.1 * jax.random.normal(k2, (C,), f32)
        mean = 0.1 * jax.random.normal(k3, (C,), f32)
        var = 1.0 + 0.1 * jnp.abs(jax.random.normal(k4, (C,), f32))
        scale = gamma / jnp.sqrt(var + 1e-5)
        shift = beta - mean * scale
        # padded channels get scale = shift = 0 so they stay exactly zero.
        return padvec(scale, Cp), padvec(shift, Cp)

    def conv3x3_taps(w, cin_p):
        # torch layout (Cout, Cin, 3, 3) -> (9, cin_p, Cp); taps major (kh*3+kw).
        Co, Ci = w.shape[0], w.shape[1]
        wk = jnp.transpose(w, (2, 3, 1, 0)).reshape(9, Ci, Co)
        return jnp.pad(wk, ((0, 0), (0, cin_p - Ci), (0, Cp - Co))).astype(bf16)

    w1 = 0.1 * jax.random.normal(ks[0], (Cout, Cin, 3, 3), f32)
    w2 = 0.1 * jax.random.normal(ks[1], (Cout, Cout, 3, 3), f32)
    bn1_s, bn1_b = bn_fold(ks[2], Cout)
    bn2_s, bn2_b = bn_fold(ks[3], Cout)

    identity_shortcut = (stride == 1 and Cin == Cout)
    if not identity_shortcut:
        wsc = 0.1 * jax.random.normal(ks[4], (Cout, Cin), f32)         # 1x1 conv
        wsc_m = pad2(wsc.T, Cin_p, Cp).astype(bf16)
        bns_s, bns_b = bn_fold(ks[5], Cout)
    else:
        # Identity shortcut: the tail kernel adds xs directly (f32); these
        # placeholders are never read (static flag), kept tiny to avoid DMA.
        wsc_m = jnp.zeros((8, 128), bf16)
        bns_s = jnp.zeros((1, 128), f32)
        bns_b = jnp.zeros((1, 128), f32)

    se_w1 = 0.1 * jax.random.normal(ks[6], (Cr, Cout), f32)   # Linear(C -> C/16), no bias
    se_w2 = 0.1 * jax.random.normal(ks[7], (Cout, Cr), f32)   # Linear(C/16 -> C), no bias

    wq = 0.1 * jax.random.normal(ks[8], (Cq, Cout), f32)
    bq = 0.1 * jax.random.normal(ks[9], (Cq,), f32)
    wk_ = 0.1 * jax.random.normal(ks[10], (Cq, Cout), f32)
    bk = 0.1 * jax.random.normal(ks[11], (Cq,), f32)
    wv = 0.1 * jax.random.normal(ks[12], (Cout, Cout), f32)
    bv = 0.1 * jax.random.normal(ks[13], (Cout,), f32)

    return {
        "stride": stride, "Cout": Cout, "Cp": Cp, "Cin_p": Cin_p,
        "identity_shortcut": identity_shortcut,
        "w1": conv3x3_taps(w1, Cin_p),
        "w2": conv3x3_taps(w2, Cp),
        "bn1_scale": bn1_s, "bn1_shift": bn1_b,
        "bn2_scale": bn2_s, "bn2_shift": bn2_b,
        "wsc": wsc_m, "bns_scale": bns_s, "bns_shift": bns_b,
        "se_w1T": pad2(se_w1.T, Cp, Crp),                 # f32 (tiny)
        "se_w2T": pad2(se_w2.T, Crp, Cp),
        "wqT": pad2(wq.T, Cp, Cqp).astype(bf16), "bq": padvec(bq, Cqp),
        "wkT": pad2(wk_.T, Cp, Cqp).astype(bf16), "bk": padvec(bk, Cqp),
        "wvT": pad2(wv.T, Cp, Cp).astype(bf16), "bv": padvec(bv, Cp),
        # nn.Parameter(torch.zeros(1)) in the module; use a nonzero deterministic
        # value so the attention path contributes. Lives in SMEM as a (1,1) scalar.
        "gamma": jnp.full((1, 1), 0.5, f32),
    }


if __name__ == "__main__":
    B, Cin, H, W = 2, 16, 32, 32
    Cout, stride = 64, 2    # exercises the projection (conv+bn) shortcut path

    key = jax.random.PRNGKey(0)
    kx, kp = jax.random.split(key)
    x = jax.random.normal(kx, (B, Cin, H, W), jnp.float32)
    params = make_params(kp, Cin, Cout, stride)

    out = residual_block_forward(x, params)
    out = jax.block_until_ready(out)
    assert out.shape == (B, Cout, H // stride, W // stride), out.shape
    assert bool(jnp.all(jnp.isfinite(out)))
    assert bool(jnp.all(out >= 0.0))   # final ReLU
    print("KERNEL_OK")
</pallas_src>

<mosaic_0001>
module attributes {stable_mosaic.version = 11 : i64} {
  func.func @conv3x3_bn_kernel(%arg0: i32, %arg1: i32, %arg2: memref<1x4x17x17x128xbf16, #tpu.memory_space<vmem>>, %arg3: memref<9x128x128xbf16, #tpu.memory_space<vmem>>, %arg4: memref<1x128xf32, #tpu.memory_space<vmem>>, %arg5: memref<1x128xf32, #tpu.memory_space<vmem>>, %arg6: memref<1x256x128xbf16, #tpu.memory_space<vmem>>, %arg7: memref<9x256x128xbf16, #tpu.memory_space<vmem>>) attributes {dimension_semantics = [#tpu.dimension_semantics<parallel>, #tpu.dimension_semantics<arbitrary>], iteration_bounds = array<i64: 2, 1>, scalar_prefetch = 0 : i64, scratch_operands = 1 : i64, tpu.core_type = #tpu.core_type<tc>, window_params = [{transform_indices = @transform_0, window_bounds = array<i64: 1, 4, 17, 17, 128>}, {transform_indices = @transform_1, window_bounds = array<i64: 9, 128, 128>}, {transform_indices = @transform_2, window_bounds = array<i64: 1, 128>}, {transform_indices = @transform_3, window_bounds = array<i64: 1, 128>}, {transform_indices = @transform_4, window_bounds = array<i64: 1, 256, 128>}]} {
    %c0_i32 = arith.constant 0 : i32
    %0 = arith.cmpi eq, %arg1, %c0_i32 : i32
    %1 = arith.extui %0 : i1 to i32
    %c0_i32_0 = arith.constant 0 : i32
    %2 = arith.cmpi ne, %1, %c0_i32_0 : i32
    scf.if %2 {
      %c0_63 = arith.constant 0 : index
      %c0_64 = arith.constant 0 : index
      %c0_65 = arith.constant 0 : index
      %c0_66 = arith.constant 0 : index
      %c0_67 = arith.constant 0 : index
      %70 = vector.load %arg2[%c0_63, %c0_64, %c0_65, %c0_66, %c0_67] : memref<1x4x17x17x128xbf16, #tpu.memory_space<vmem>>, vector<1x1x16x16x128xbf16>
      %71 = vector.shape_cast %70 : vector<1x1x16x16x128xbf16> to vector<16x16x128xbf16>
      %72 = vector.shape_cast %71 : vector<16x16x128xbf16> to vector<256x128xbf16>
      %c0_68 = arith.constant 0 : index
      %c0_69 = arith.constant 0 : index
      %c0_70 = arith.constant 0 : index
      %73 = vector.load %arg7[%c0_68, %c0_69, %c0_70] : memref<9x256x128xbf16, #tpu.memory_space<vmem>>, vector<1x256x128xbf16>
      %74 = vector.shape_cast %73 : vector<1x256x128xbf16> to vector<256x128xbf16>
      %75 = vector.shape_cast %72 : vector<256x128xbf16> to vector<1x256x128xbf16>
      tpu.vector_store %arg7[%c0_68, %c0_69, %c0_70], %75 {strides = array<i32>} : memref<9x256x128xbf16, #tpu.memory_space<vmem>>, vector<1x256x128xbf16>,
      %c0_71 = arith.constant 0 : index
      %c1_72 = arith.constant 1 : index
      %c0_73 = arith.constant 0 : index
      %c0_74 = arith.constant 0 : index
      %c0_75 = arith.constant 0 : index
      %76 = vector.load %arg2[%c0_71, %c1_72, %c0_73, %c0_74, %c0_75] : memref<1x4x17x17x128xbf16, #tpu.memory_space<vmem>>, vector<1x1x16x16x128xbf16>
      %77 = vector.shape_cast %76 : vector<1x1x16x16x128xbf16> to vector<16x16x128xbf16>
      %78 = vector.shape_cast %77 : vector<16x16x128xbf16> to vector<256x128xbf16>
      %c1_76 = arith.constant 1 : index
      %c0_77 = arith.constant 0 : index
      %c0_78 = arith.constant 0 : index
      %79 = vector.load %arg7[%c1_76, %c0_77, %c0_78] : memref<9x256x128xbf16, #tpu.memory_space<vmem>>, vector<1x256x128xbf16>
      %80 = vector.shape_cast %79 : vector<1x256x128xbf16> to vector<256x128xbf16>
      %81 = vector.shape_cast %78 : vector<256x128xbf16> to vector<1x256x128xbf16>
      tpu.vector_store %arg7[%c1_76, %c0_77, %c0_78], %81 {strides = array<i32>} : memref<9x256x128xbf16, #tpu.memory_space<vmem>>, vector<1x256x128xbf16>,
      %c0_79 = arith.constant 0 : index
      %c0_80 = arith.constant 0 : index
      %c0_81 = arith.constant 0 : index
      %c1_82 = arith.constant 1 : index
      %c0_83 = arith.constant 0 : index
      %82 = vector.load %arg2[%c0_79, %c0_80, %c0_81, %c1_82, %c0_83] : memref<1x4x17x17x128xbf16, #tpu.memory_space<vmem>>, vector<1x1x16x16x128xbf16>
      %83 = vector.shape_cast %82 : vector<1x1x16x16x128xbf16> to vector<16x16x128xbf16>
      %84 = vector.shape_cast %83 : vector<16x16x128xbf16> to vector<256x128xbf16>
      %c2_84 = arith.constant 2 : index
      %c0_85 = arith.constant 0 : index
      %c0_86 = arith.constant 0 : index
      %85 = vector.load %arg7[%c2_84, %c0_85, %c0_86] : memref<9x256x128xbf16, #tpu.memory_space<vmem>>, vector<1x256x128xbf16>
      %86 = vector.shape_cast %85 : vector<1x256x128xbf16> to vector<256x128xbf16>
      %87 = vector.shape_cast %84 : vector<256x128xbf16> to vector<1x256x128xbf16>
      tpu.vector_store %arg7[%c2_84, %c0_85, %c0_86], %87 {strides = array<i32>} : memref<9x256x128xbf16, #tpu.memory_space<vmem>>, vector<1x256x128xbf16>,
      %c0_87 = arith.constant 0 : index
      %c2_88 = arith.constant 2 : index
      %c0_89 = arith.constant 0 : index
      %c0_90 = arith.constant 0 : index
      %c0_91 = arith.constant 0 : index
      %88 = vector.load %arg2[%c0_87, %c2_88, %c0_89, %c0_90, %c0_91] : memref<1x4x17x17x128xbf16, #tpu.memory_space<vmem>>, vector<1x1x16x16x128xbf16>
      %89 = vector.shape_cast %88 : vector<1x1x16x16x128xbf16> to vector<16x16x128xbf16>
      %90 = vector.shape_cast %89 : vector<16x16x128xbf16> to vector<256x128xbf16>
      %c3_92 = arith.constant 3 : index
      %c0_93 = arith.constant 0 : index
      %c0_94 = arith.constant 0 : index
      %91 = vector.load %arg7[%c3_92, %c0_93, %c0_94] : memref<9x256x128xbf16, #tpu.memory_space<vmem>>, vector<1x256x128xbf16>
      %92 = vector.shape_cast %91 : vector<1x256x128xbf16> to vector<256x128xbf16>
      %93 = vector.shape_cast %90 : vector<256x128xbf16> to vector<1x256x128xbf16>
      tpu.vector_store %arg7[%c3_92, %c0_93, %c0_94], %93 {strides = array<i32>} : memref<9x256x128xbf16, #tpu.memory_space<vmem>>, vector<1x256x128xbf16>,
      %c0_95 = arith.constant 0 : index
      %c3_96 = arith.constant 3 : index
      %c0_97 = arith.constant 0 : index
      %c0_98 = arith.constant 0 : index
      %c0_99 = arith.constant 0 : index
      %94 = vector.load %arg2[%c0_95, %c3_96, %c0_97, %c0_98, %c0_99] : memref<1x4x17x17x128xbf16, #tpu.memory_space<vmem>>, vector<1x1x16x16x128xbf16>
      %95 = vector.shape_cast %94 : vector<1x1x16x16x128xbf16> to vector<16x16x128xbf16>
      %96 = vector.shape_cast %95 : vector<16x16x128xbf16> to vector<256x128xbf16>
      %c4_100 = arith.constant 4 : index
      %c0_101 = arith.constant 0 : index
      %c0_102 = arith.constant 0 : index
      %97 = vector.load %arg7[%c4_100, %c0_101, %c0_102] : memref<9x256x128xbf16, #tpu.memory_space<vmem>>, vector<1x256x128xbf16>
      %98 = vector.shape_cast %97 : vector<1x256x128xbf16> to vector<256x128xbf16>
      %99 = vector.shape_cast %96 : vector<256x128xbf16> to vector<1x256x128xbf16>
      tpu.vector_store %arg7[%c4_100, %c0_101, %c0_102], %99 {strides = array<i32>} : memref<9x256x128xbf16, #tpu.memory_space<vmem>>, vector<1x256x128xbf16>,
      %c0_103 = arith.constant 0 : index
      %c2_104 = arith.constant 2 : index
      %c0_105 = arith.constant 0 : index
      %c1_106 = arith.constant 1 : index
      %c0_107 = arith.constant 0 : index
      %100 = vector.load %arg2[%c0_103, %c2_104, %c0_105, %c1_106, %c0_107] : memref<1x4x17x17x128xbf16, #tpu.memory_space<vmem>>, vector<1x1x16x16x128xbf16>
      %101 = vector.shape_cast %100 : vector<1x1x16x16x128xbf16> to vector<16x16x128xbf16>
      %102 = vector.shape_cast %101 : vector<16x16x128xbf16> to vector<256x128xbf16>
      %c5_108 = arith.constant 5 : index
      %c0_109 = arith.constant 0 : index
      %c0_110 = arith.constant 0 : index
      %103 = vector.load %arg7[%c5_108, %c0_109, %c0_110] : memref<9x256x128xbf16, #tpu.memory_space<vmem>>, vector<1x256x128xbf16>
      %104 = vector.shape_cast %103 : vector<1x256x128xbf16> to vector<256x128xbf16>
      %105 = vector.shape_cast %102 : vector<256x128xbf16> to vector<1x256x128xbf16>
      tpu.vector_store %arg7[%c5_108, %c0_109, %c0_110], %105 {strides = array<i32>} : memref<9x256x128xbf16, #tpu.memory_space<vmem>>, vector<1x256x128xbf16>,
      %c0_111 = arith.constant 0 : index
      %c0_112 = arith.constant 0 : index
      %c1_113 = arith.constant 1 : index
      %c0_114 = arith.constant 0 : index
      %c0_115 = arith.constant 0 : index
      %106 = vector.load %arg2[%c0_111, %c0_112, %c1_113, %c0_114, %c0_115] : memref<1x4x17x17x128xbf16, #tpu.memory_space<vmem>>, vector<1x1x16x16x128xbf16>
      %107 = vector.shape_cast %106 : vector<1x1x16x16x128xbf16> to vector<16x16x128xbf16>
      %108 = vector.shape_cast %107 : vector<16x16x128xbf16> to vector<256x128xbf16>
      %c6_116 = arith.constant 6 : index
      %c0_117 = arith.constant 0 : index
      %c0_118 = arith.constant 0 : index
      %109 = vector.load %arg7[%c6_116, %c0_117, %c0_118] : memref<9x256x128xbf16, #tpu.memory_space<vmem>>, vector<1x256x128xbf16>
      %110 = vector.shape_cast %109 : vector<1x256x128xbf16> to vector<256x128xbf16>
      %111 = vector.shape_cast %108 : vector<256x128xbf16> to vector<1x256x128xbf16>
      tpu.vector_store %arg7[%c6_116, %c0_117, %c0_118], %111 {strides = array<i32>} : memref<9x256x128xbf16, #tpu.memory_space<vmem>>, vector<1x256x128xbf16>,
      %c0_119 = arith.constant 0 : index
      %c1_120 = arith.constant 1 : index
      %c1_121 = arith.constant 1 : index
      %c0_122 = arith.constant 0 : index
      %c0_123 = arith.constant 0 : index
      %112 = vector.load %arg2[%c0_119, %c1_120, %c1_121, %c0_122, %c0_123] : memref<1x4x17x17x128xbf16, #tpu.memory_space<vmem>>, vector<1x1x16x16x128xbf16>
      %113 = vector.shape_cast %112 : vector<1x1x16x16x128xbf16> to vector<16x16x128xbf16>
      %114 = vector.shape_cast %113 : vector<16x16x128xbf16> to vector<256x128xbf16>
      %c7_124 = arith.constant 7 : index
      %c0_125 = arith.constant 0 : index
      %c0_126 = arith.constant 0 : index
      %115 = vector.load %arg7[%c7_124, %c0_125, %c0_126] : memref<9x256x128xbf16, #tpu.memory_space<vmem>>, vector<1x256x128xbf16>
      %116 = vector.shape_cast %115 : vector<1x256x128xbf16> to vector<256x128xbf16>
      %117 = vector.shape_cast %114 : vector<256x128xbf16> to vector<1x256x128xbf16>
      tpu.vector_store %arg7[%c7_124, %c0_125, %c0_126], %117 {strides = array<i32>} : memref<9x256x128xbf16, #tpu.memory_space<vmem>>, vector<1x256x128xbf16>,
      %c0_127 = arith.constant 0 : index
      %c0_128 = arith.constant 0 : index
      %c1_129 = arith.constant 1 : index
      %c1_130 = arith.constant 1 : index
      %c0_131 = arith.constant 0 : index
      %118 = vector.load %arg2[%c0_127, %c0_128, %c1_129, %c1_130, %c0_131] : memref<1x4x17x17x128xbf16, #tpu.memory_space<vmem>>, vector<1x1x16x16x128xbf16>
      %119 = vector.shape_cast %118 : vector<1x1x16x16x128xbf16> to vector<16x16x128xbf16>
      %120 = vector.shape_cast %119 : vector<16x16x128xbf16> to vector<256x128xbf16>
      %c8_132 = arith.constant 8 : index
      %c0_133 = arith.constant 0 : index
      %c0_134 = arith.constant 0 : index
      %121 = vector.load %arg7[%c8_132, %c0_133, %c0_134] : memref<9x256x128xbf16, #tpu.memory_space<vmem>>, vector<1x256x128xbf16>
      %122 = vector.shape_cast %121 : vector<1x256x128xbf16> to vector<256x128xbf16>
      %123 = vector.shape_cast %120 : vector<256x128xbf16> to vector<1x256x128xbf16>
      tpu.vector_store %arg7[%c8_132, %c0_133, %c0_134], %123 {strides = array<i32>} : memref<9x256x128xbf16, #tpu.memory_space<vmem>>, vector<1x256x128xbf16>,
    } else {
    }
    %cst = arith.constant 0.000000e+00 : f32
    %3 = vector.broadcast %cst : f32 to vector<256x128xf32>
    %c0 = arith.constant 0 : index
    %c0_1 = arith.constant 0 : index
    %c0_2 = arith.constant 0 : index
    %4 = vector.load %arg7[%c0, %c0_1, %c0_2] : memref<9x256x128xbf16, #tpu.memory_space<vmem>>, vector<1x256x128xbf16>
    %5 = vector.shape_cast %4 : vector<1x256x128xbf16> to vector<256x128xbf16>
    %c0_3 = arith.constant 0 : index
    %c0_4 = arith.constant 0 : index
    %c0_5 = arith.constant 0 : index
    %6 = vector.load %arg3[%c0_3, %c0_4, %c0_5] : memref<9x128x128xbf16, #tpu.memory_space<vmem>>, vector<1x128x128xbf16>
    %7 = vector.shape_cast %6 : vector<1x128x128xbf16> to vector<128x128xbf16>
    %cst_6 = arith.constant dense<0.000000e+00> : vector<256x128xf32>
    %8 = tpu.matmul %5, %7, %cst_6 {dimension_numbers = #tpu.dot_dimension_numbers<[1], [0], [0], [1], [0, 0, 1, 1], [], []>} : vector<256x128xbf16>, vector<128x128xbf16>, vector<256x128xf32> -> vector<256x128xf32>
    %9 = arith.addf %3, %8 : vector<256x128xf32>
    %c1 = arith.constant 1 : index
    %c0_7 = arith.constant 0 : index
    %c0_8 = arith.constant 0 : index
    %10 = vector.load %arg7[%c1, %c0_7, %c0_8] : memref<9x256x128xbf16, #tpu.memory_space<vmem>>, vector<1x256x128xbf16>
    %11 = vector.shape_cast %10 : vector<1x256x128xbf16> to vector<256x128xbf16>
    %c1_9 = arith.constant 1 : index
    %c0_10 = arith.constant 0 : index
    %c0_11 = arith.constant 0 : index
    %12 = vector.load %arg3[%c1_9, %c0_10, %c0_11] : memref<9x128x128xbf16, #tpu.memory_space<vmem>>, vector<1x128x128xbf16>
    %13 = vector.shape_cast %12 : vector<1x128x128xbf16> to vector<128x128xbf16>
    %cst_12 = arith.constant dense<0.000000e+00> : vector<256x128xf32>
    %14 = tpu.matmul %11, %13, %cst_12 {dimension_numbers = #tpu.dot_dimension_numbers<[1], [0], [0], [1], [0, 0, 1, 1], [], []>} : vector<256x128xbf16>, vector<128x128xbf16>, vector<256x128xf32> -> vector<256x128xf32>
    %15 = arith.addf %9, %14 : vector<256x128xf32>
    %c2 = arith.constant 2 : index
    %c0_13 = arith.constant 0 : index
    %c0_14 = arith.constant 0 : index
    %16 = vector.load %arg7[%c2, %c0_13, %c0_14] : memref<9x256x128xbf16, #tpu.memory_space<vmem>>, vector<1x256x128xbf16>
    %17 = vector.shape_cast %16 : vector<1x256x128xbf16> to vector<256x128xbf16>
    %c2_15 = arith.constant 2 : index
    %c0_16 = arith.constant 0 : index
    %c0_17 = arith.constant 0 : index
    %18 = vector.load %arg3[%c2_15, %c0_16, %c0_17] : memref<9x128x128xbf16, #tpu.memory_space<vmem>>, vector<1x128x128xbf16>
    %19 = vector.shape_cast %18 : vector<1x128x128xbf16> to vector<128x128xbf16>
    %cst_18 = arith.constant dense<0.000000e+00> : vector<256x128xf32>
    %20 = tpu.matmul %17, %19, %cst_18 {dimension_numbers = #tpu.dot_dimension_numbers<[1], [0], [0], [1], [0, 0, 1, 1], [], []>} : vector<256x128xbf16>, vector<128x128xbf16>, vector<256x128xf32> -> vector<256x128xf32>
    %21 = arith.addf %15, %20 : vector<256x128xf32>
    %c3 = arith.constant 3 : index
    %c0_19 = arith.constant 0 : index
    %c0_20 = arith.constant 0 : index
    %22 = vector.load %arg7[%c3, %c0_19, %c0_20] : memref<9x256x128xbf16, #tpu.memory_space<vmem>>, vector<1x256x128xbf16>
    %23 = vector.shape_cast %22 : vector<1x256x128xbf16> to vector<256x128xbf16>
    %c3_21 = arith.constant 3 : index
    %c0_22 = arith.constant 0 : index
    %c0_23 = arith.constant 0 : index
    %24 = vector.load %arg3[%c3_21, %c0_22, %c0_23] : memref<9x128x128xbf16, #tpu.memory_space<vmem>>, vector<1x128x128xbf16>
    %25 = vector.shape_cast %24 : vector<1x128x128xbf16> to vector<128x128xbf16>
    %cst_24 = arith.constant dense<0.000000e+00> : vector<256x128xf32>
    %26 = tpu.matmul %23, %25, %cst_24 {dimension_numbers = #tpu.dot_dimension_numbers<[1], [0], [0], [1], [0, 0, 1, 1], [], []>} : vector<256x128xbf16>, vector<128x128xbf16>, vector<256x128xf32> -> vector<256x128xf32>
    %27 = arith.addf %21, %26 : vector<256x128xf32>
    %c4 = arith.constant 4 : index
    %c0_25 = arith.constant 0 : index
    %c0_26 = arith.constant 0 : index
    %28 = vector.load %arg7[%c4, %c0_25, %c0_26] : memref<9x256x128xbf16, #tpu.memory_space<vmem>>, vector<1x256x128xbf16>
    %29 = vector.shape_cast %28 : vector<1x256x128xbf16> to vector<256x128xbf16>
    %c4_27 = arith.constant 4 : index
    %c0_28 = arith.constant 0 : index
    %c0_29 = arith.constant 0 : index
    %30 = vector.load %arg3[%c4_27, %c0_28, %c0_29] : memref<9x128x128xbf16, #tpu.memory_space<vmem>>, vector<1x128x128xbf16>
    %31 = vector.shape_cast %30 : vector<1x128x128xbf16> to vector<128x128xbf16>
    %cst_30 = arith.constant dense<0.000000e+00> : vector<256x128xf32>
    %32 = tpu.matmul %29, %31, %cst_30 {dimension_numbers = #tpu.dot_dimension_numbers<[1], [0], [0], [1], [0, 0, 1, 1], [], []>} : vector<256x128xbf16>, vector<128x128xbf16>, vector<256x128xf32> -> vector<256x128xf32>
    %33 = arith.addf %27, %32 : vector<256x128xf32>
    %c5 = arith.constant 5 : index
    %c0_31 = arith.constant 0 : index
    %c0_32 = arith.constant 0 : index
    %34 = vector.load %arg7[%c5, %c0_31, %c0_32] : memref<9x256x128xbf16, #tpu.memory_space<vmem>>, vector<1x256x128xbf16>
    %35 = vector.shape_cast %34 : vector<1x256x128xbf16> to vector<256x128xbf16>
    %c5_33 = arith.constant 5 : index
    %c0_34 = arith.constant 0 : index
    %c0_35 = arith.constant 0 : index
    %36 = vector.load %arg3[%c5_33, %c0_34, %c0_35] : memref<9x128x128xbf16, #tpu.memory_space<vmem>>, vector<1x128x128xbf16>
    %37 = vector.shape_cast %36 : vector<1x128x128xbf16> to vector<128x128xbf16>
    %cst_36 = arith.constant dense<0.000000e+00> : vector<256x128xf32>
    %38 = tpu.matmul %35, %37, %cst_36 {dimension_numbers = #tpu.dot_dimension_numbers<[1], [0], [0], [1], [0, 0, 1, 1], [], []>} : vector<256x128xbf16>, vector<128x128xbf16>, vector<256x128xf32> -> vector<256x128xf32>
    %39 = arith.addf %33, %38 : vector<256x128xf32>
    %c6 = arith.constant 6 : index
    %c0_37 = arith.constant 0 : index
    %c0_38 = arith.constant 0 : index
    %40 = vector.load %arg7[%c6, %c0_37, %c0_38] : memref<9x256x128xbf16, #tpu.memory_space<vmem>>, vector<1x256x128xbf16>
    %41 = vector.shape_cast %40 : vector<1x256x128xbf16> to vector<256x128xbf16>
    %c6_39 = arith.constant 6 : index
    %c0_40 = arith.constant 0 : index
    %c0_41 = arith.constant 0 : index
    %42 = vector.load %arg3[%c6_39, %c0_40, %c0_41] : memref<9x128x128xbf16, #tpu.memory_space<vmem>>, vector<1x128x128xbf16>
    %43 = vector.shape_cast %42 : vector<1x128x128xbf16> to vector<128x128xbf16>
    %cst_42 = arith.constant dense<0.000000e+00> : vector<256x128xf32>
    %44 = tpu.matmul %41, %43, %cst_42 {dimension_numbers = #tpu.dot_dimension_numbers<[1], [0], [0], [1], [0, 0, 1, 1], [], []>} : vector<256x128xbf16>, vector<128x128xbf16>, vector<256x128xf32> -> vector<256x128xf32>
    %45 = arith.addf %39, %44 : vector<256x128xf32>
    %c7 = arith.constant 7 : index
    %c0_43 = arith.constant 0 : index
    %c0_44 = arith.constant 0 : index
    %46 = vector.load %arg7[%c7, %c0_43, %c0_44] : memref<9x256x128xbf16, #tpu.memory_space<vmem>>, vector<1x256x128xbf16>
    %47 = vector.shape_cast %46 : vector<1x256x128xbf16> to vector<256x128xbf16>
    %c7_45 = arith.constant 7 : index
    %c0_46 = arith.constant 0 : index
    %c0_47 = arith.constant 0 : index
    %48 = vector.load %arg3[%c7_45, %c0_46, %c0_47] : memref<9x128x128xbf16, #tpu.memory_space<vmem>>, vector<1x128x128xbf16>
    %49 = vector.shape_cast %48 : vector<1x128x128xbf16> to vector<128x128xbf16>
    %cst_48 = arith.constant dense<0.000000e+00> : vector<256x128xf32>
    %50 = tpu.matmul %47, %49, %cst_48 {dimension_numbers = #tpu.dot_dimension_numbers<[1], [0], [0], [1], [0, 0, 1, 1], [], []>} : vector<256x128xbf16>, vector<128x128xbf16>, vector<256x128xf32> -> vector<256x128xf32>
    %51 = arith.addf %45, %50 : vector<256x128xf32>
    %c8 = arith.constant 8 : index
    %c0_49 = arith.constant 0 : index
    %c0_50 = arith.constant 0 : index
    %52 = vector.load %arg7[%c8, %c0_49, %c0_50] : memref<9x256x128xbf16, #tpu.memory_space<vmem>>, vector<1x256x128xbf16>
    %53 = vector.shape_cast %52 : vector<1x256x128xbf16> to vector<256x128xbf16>
    %c8_51 = arith.constant 8 : index
    %c0_52 = arith.constant 0 : index
    %c0_53 = arith.constant 0 : index
    %54 = vector.load %arg3[%c8_51, %c0_52, %c0_53] : memref<9x128x128xbf16, #tpu.memory_space<vmem>>, vector<1x128x128xbf16>
    %55 = vector.shape_cast %54 : vector<1x128x128xbf16> to vector<128x128xbf16>
    %cst_54 = arith.constant dense<0.000000e+00> : vector<256x128xf32>
    %56 = tpu.matmul %53, %55, %cst_54 {dimension_numbers = #tpu.dot_dimension_numbers<[1], [0], [0], [1], [0, 0, 1, 1], [], []>} : vector<256x128xbf16>, vector<128x128xbf16>, vector<256x128xf32> -> vector<256x128xf32>
    %57 = arith.addf %51, %56 : vector<256x128xf32>
    %c0_55 = arith.constant 0 : index
    %c0_56 = arith.constant 0 : index
    %58 = vector.load %arg4[%c0_55, %c0_56] : memref<1x128xf32, #tpu.memory_space<vmem>>, vector<1x128xf32>
    %59 = vector.broadcast %58 : vector<1x128xf32> to vector<256x128xf32>
    %60 = arith.mulf %57, %59 : vector<256x128xf32>
    %c0_57 = arith.constant 0 : index
    %c0_58 = arith.constant 0 : index
    %61 = vector.load %arg5[%c0_57, %c0_58] : memref<1x128xf32, #tpu.memory_space<vmem>>, vector<1x128xf32>
    %62 = vector.broadcast %61 : vector<1x128xf32> to vector<256x128xf32>
    %63 = arith.addf %60, %62 : vector<256x128xf32>
    %cst_59 = arith.constant 0.000000e+00 : f32
    %64 = vector.broadcast %cst_59 : f32 to vector<256x128xf32>
    %65 = arith.maximumf %63, %64 : vector<256x128xf32>
    %66 = arith.truncf %65 : vector<256x128xf32> to vector<256x128xbf16>
    %c0_60 = arith.constant 0 : index
    %c0_61 = arith.constant 0 : index
    %c0_62 = arith.constant 0 : index
    %67 = vector.load %arg6[%c0_60, %c0_61, %c0_62] : memref<1x256x128xbf16, #tpu.memory_space<vmem>>, vector<1x256x128xbf16>
    %68 = vector.shape_cast %67 : vector<1x256x128xbf16> to vector<256x128xbf16>
    %69 = vector.shape_cast %66 : vector<256x128xbf16> to vector<1x256x128xbf16>
    tpu.vector_store %arg6[%c0_60, %c0_61, %c0_62], %69 {strides = array<i32>} : memref<1x256x128xbf16, #tpu.memory_space<vmem>>, vector<1x256x128xbf16>,
    return
  }
  func.func @transform_0(%arg0: i32, %arg1: i32) -> (i32, i32, i32, i32, i32) {
    %c0_i32 = arith.constant 0 : i32
    %c0_i32_0 = arith.constant 0 : i32
    %c0_i32_1 = arith.constant 0 : i32
    %c0_i32_2 = arith.constant 0 : i32
    %c0_i32_3 = arith.constant 0 : i32
    return %arg0, %c0_i32, %c0_i32_0, %c0_i32_1, %c0_i32_2 : i32, i32, i32, i32, i32
  }
  func.func @transform_1(%arg0: i32, %arg1: i32) -> (i32, i32, i32) {
    %c0_i32 = arith.constant 0 : i32
    %c0_i32_0 = arith.constant 0 : i32
    %c0_i32_1 = arith.constant 0 : i32
    return %c0_i32, %c0_i32_0, %arg1 : i32, i32, i32
  }
  func.func @transform_2(%arg0: i32, %arg1: i32) -> (i32, i32) {
    %c0_i32 = arith.constant 0 : i32
    %c0_i32_0 = arith.constant 0 : i32
    return %c0_i32, %arg1 : i32, i32
  }
  func.func @transform_3(%arg0: i32, %arg1: i32) -> (i32, i32) {
    %c0_i32 = arith.constant 0 : i32
    %c0_i32_0 = arith.constant 0 : i32
    return %c0_i32, %arg1 : i32, i32
  }
  func.func @transform_4(%arg0: i32, %arg1: i32) -> (i32, i32, i32) {
    %c0_i32 = arith.constant 0 : i32
    %c0_i32_0 = arith.constant 0 : i32
    return %arg0, %c0_i32, %arg1 : i32, i32, i32
  }
}

</mosaic_0001>

<bundles_post_ra>
// kernel: tpu_custom_call.1
= control target key start
LH: loop header
LB: loop body
LE: loop exit
PB: predicated region body
PF: predicated region fallthrough
CT: control target
= control target key end

     0   :  { %9 = vsyncpa [#allocation4], 0  ;;  %s8446_s0 = inlined_call_operand.vmem [shape: bf16[2,4,17,17,128], index: 0, kind: input, shape index: {}]   ;;  %s8447_s1 = inlined_call_operand.vmem [shape: bf16[9,128,128], index: 1, kind: input, shape index: {}]   ;;  %s8448_s2 = inlined_call_operand.vmem [shape: f32[1,128], index: 2, kind: input, shape index: {}]   ;;  %s8449_s3 = inlined_call_operand.vmem [shape: f32[1,128], index: 3, kind: input, shape index: {}]   ;;  %s8450_s4 = inlined_call_operand.hbm [shape: bf16[2,256,128], index: 4, kind: output, shape index: {}]  }
   0x1   :  { %11 = vsyncpa [#allocation4 + $0x1], 0  ;;  %s7520_s15 = smov 0   ;;  %s7522_s16 = smov 0  }
   0x2   :  { %s7524_s17 = smov 0   ;;  %s7526_s18 = smov 0  }
   0x3   :  { %s7528_s19 = smov 0   ;;  %s7530_s20 = smov 0  }
   0x4 LB: > { %s5481_s21 = sadd.s32 4294967295, %s7490_s20   ;;  %s5482_s22 = sadd.s32 4294967294, %s7490_s20   ;;  %s7490_s20 = sphi %s7530_s20, %s17_s20   ;;  %s7486_s19 = sphi %s7528_s19, %s8459_s19   ;;  %s7482_s18 = sphi %s7526_s18, %s8458_s18   ;;  %s7478_s17 = sphi %s7524_s17, %s8457_s17   ;;  %s7474_s16 = sphi %s7522_s16, %s8456_s16   ;;  %s7470_s15 = sphi %s7520_s15, %s8455_s15  }
   0x5   : > { %s29_s23 = sadd.s32 1, %s7486_s19  ;;  %s142_s24 = sadd.s32 1, %s7478_s17 }
   0x6   : > { %p31_p0 = scmp.ge.s32.totalorder %s29_s23, 2  ;;  %p152_p1 = scmp.ne.s32.totalorder %s7478_s17, %s7474_s16 }
   0x7   : > { %p153_p2 = scmp.eq.s32.totalorder %s5481_s21, 1  ;;  %p158_p3 = scmp.ne.s32.totalorder %s7474_s16, %s7470_s15 }
   0x8   : > { %s8461_s23 = smov (%p31_p0, %s29_s23), 0  ;;  %p159_p5 = scmp.eq.s32.totalorder %s5482_s22, 1 }
   0x9   : > { %p7560_p4 = por %p153_p2, %p152_p1  ;;  %s137_s26 = ssub.s32 %s7486_s19, %s8461_s23 }
   0xa   : > { %p5488_p6 = scmp.ge.s32.totalorder %s7490_s20, 1  ;;  %p140_p7 = scmp.eq.s32.totalorder %s137_s26, 0 }
   0xb   : > { %p7567_p8 = por %p159_p5, %p158_p3  ;;  %p204_p9 = scmp.lt.s32.totalorder %s7490_s20, 3 }
   0xc   : > { %s7573_s28 = scalar_select %p140_p7, %s7478_s17, %s142_s24  }
   0xd   : > { %p205_p10 = pnand %p5488_p6, %p204_p9 }
   0xe   : > { %v7236_v0 = vld [vmem:[%s8447_s1 + $0x40] sm:$0xff] (!%p205_p10)   ;;  %p240_p11 = scmp.lt.s32.totalorder (!%p205_p10), %s7482_s18, 1  ;;  %v7238_v2 = vld [vmem:[%s8447_s1 + $0x48] sm:$0xff] (!%p205_p10)   ;;  %v7240_v4 = vld [vmem:[%s8447_s1 + $0x50] sm:$0xff] (!%p205_p10)   ;;  %vm598_vm0 = vsmask.f32 (!%p205_p10), 3328 }
   0xf   : > { %208 = sbr.rel (%p205_p10) target bundleno = 569 (0x239), region = 36  ;;  %v7237_v1 = vld [vmem:[%s8447_s1 + $0x100] sm:$0xff] (!%p205_p10)   ;;  %6474 = vmatprep.subr.bf16.mxu1 (!%p205_p10), %v7236_v0  ;;  %v7239_v3 = vld [vmem:[%s8447_s1 + $0x108] sm:$0xff] (!%p205_p10)   ;;  %v7241_v5 = vld [vmem:[%s8447_s1 + $0x110] sm:$0xff] (!%p205_p10)   ;;  %vm599_vm1 = vsmask.f32 (!%p205_p10), 7440 }
  0x10   : > { %6666 = vmatprep.subr.bf16.mxu0 (!%p205_p10), %v7237_v1  ;;  %6475 = vmatpush3.bf16.msra.mxu1 (!%p205_p10), %v7236_v0  ;;  %v7242_v6 = vld [vmem:[%s8447_s1 + $0x58] sm:$0xff] (!%p205_p10)   ;;  %v7244_v8 = vld [vmem:[%s8447_s1 + $0x60] sm:$0xff] (!%p205_p10)   ;;  %v7246_v10 = vld [vmem:[%s8447_s1 + $0x68] sm:$0xff] (!%p205_p10)   ;;  %s6162_s7 = sshll.u32 (!%p205_p10), %s7482_s18, 11  ;;  %s7492_s14 = smov (!%p205_p10), [#allocation3]  }
  0x11   : > { %6667 = vmatpush3.bf16.msra.mxu0 (!%p205_p10), %v7237_v1  ;;  %6476 = vmatprep.subr.bf16.mxu1 (!%p205_p10), %v7238_v2  ;;  %v7243_v7 = vld [vmem:[%s8447_s1 + $0x118] sm:$0xff] (!%p205_p10)   ;;  %v7245_v9 = vld [vmem:[%s8447_s1 + $0x120] sm:$0xff] (!%p205_p10)   ;;  %v7247_v11 = vld [vmem:[%s8447_s1 + $0x128] sm:$0xff] (!%p205_p10)   ;;  %s8392_s12 = scalar_lea.hbm (!%p205_p10), %s8450_s4, %s6162_s7 }
  0x12   : > { %6668 = vmatprep.subr.bf16.mxu0 (!%p205_p10), %v7239_v3  ;;  %v7248_v14 = vld [vmem:[%s8447_s1 + $0x70] sm:$0xff] (!%p205_p10)   ;;  %v7250_v16 = vld [vmem:[%s8447_s1 + $0x78] sm:$0xff] (!%p205_p10)   ;;  %v7255_v19 = vld [vmem:[%s8447_s1] sm:$0xff] (!%p205_p10)  }
  0x13   : > { %v7249_v15 = vld [vmem:[%s8447_s1 + $0x130] sm:$0xff] (!%p205_p10)   ;;  %v7251_v17 = vld [vmem:[%s8447_s1 + $0x138] sm:$0xff] (!%p205_p10)   ;;  %v7257_v20 = vld [vmem:[%s8447_s1 + $0x140] sm:$0xff] (!%p205_p10)  }
  0x14   : > { %6477 = vmatpush3.bf16.msra.mxu1 (!%p205_p10), %v7238_v2  ;;  %v7258_v22 = vld [vmem:[%s8447_s1 + $0x148] sm:$0xff] (!%p205_p10)   ;;  %v7269_v27 = vld [vmem:[%s8447_s1 + $0x10] sm:$0xff] (!%p205_p10)   ;;  %v7265_v32 = vld [vmem:[%s8447_s1 + $0x158] sm:$0xff] (!%p205_p10)  }
  0x15   : > { %6669 = vmatpush3.bf16.msra.mxu0 (!%p205_p10), %v7239_v3  ;;  %6478 = vmatprep.subr.bf16.mxu1 (!%p205_p10), %v7240_v4  ;;  %v7262_v25 = vld [vmem:[%s8447_s1 + $0x8] sm:$0xff] (!%p205_p10)   ;;  %v7264_v28 = vld [vmem:[%s8447_s1 + $0x150] sm:$0xff] (!%p205_p10)   ;;  %v7276_v33 = vld [vmem:[%s8447_s1 + $0x18] sm:$0xff] (!%p205_p10)  }
  0x16   : > { %s241_s21 = scalar_select %p240_p11, %s7482_s18, 1  ;;  %6670 = vmatprep.subr.bf16.mxu0 %v7241_v5  ;;  %v7271_v35 = vld [vmem:[%s8447_s1 + $0x160] sm:$0xff]   ;;  %v7272_v43 = vld [vmem:[%s8447_s1 + $0x168] sm:$0xff]   ;;  %vm7685_vm2 = vmor %vm598_vm0, %vm599_vm1 }
  0x17   : > { %v7282_v53 = vld [vmem:[%s8447_s1 + $0x20] sm:$0xff]   ;;  %v7278_v0 = vld [vmem:[%s8447_s1 + $0x170] sm:$0xff]  }
  0x18   : > { %s7178_s30 = smul.u32 816, %s241_s21  ;;  %6479 = vmatpush3.bf16.msra.mxu1 %v7240_v4  ;;  %s7416_s21 = sshll.u32 %s7492_s14, 4  ;;  %s7417_s21 = int_to_ptr.vmem [resolvable:$false] %s7416_s21 }
  0x19   : > { %6671 = vmatpush3.bf16.msra.mxu0 %v7241_v5  ;;  %6480 = vmatprep.subr.bf16.mxu1 %v7242_v6  ;;  %s7418_s22 = scalar_lea.vmem %s7417_s21, 4096 }
  0x1a   : > { %6672 = vmatprep.subr.bf16.mxu0 %v7243_v7  ;;  %s7610_s11 = scalar_lea.vmem %s8446_s0, %s7178_s30  ;;  %s237_s30 = sand.u32 1, %s7474_s16  }
  0x1b   : > { %v7252_v12 = vld [vmem:[%s7610_s11 + $0xcc] sm:$0xff]   ;;  %v7253_v13 = vld [vmem:[%s7610_s11 + $0x264] sm:$0xff]   ;;  %v7254_v18 = vld [vmem:[%s7610_s11 + $0xd8] sm:$0xff]   ;;  %s5489_s5 = sshll.u32 %s237_s30, 7  ;;  %s8400_s18 = scalar_lea.sflag [#allocation4], %s237_s30 }
  0x1c   : > { %6481 = vmatpush3.bf16.msra.mxu1 %v7242_v6  ;;  %6490 = vmatprep.mubr.bf16.mxu1 %v7252_v12  ;;  %v7256_v21 = vld [vmem:[%s7610_s11 + $0x270] sm:$0xff]   ;;  %v7259_v23 = vld [vmem:[%s7610_s11 + $0xe4] sm:$0xff]   ;;  %v7260_v24 = vld [vmem:[%s7610_s11 + $0x27c] sm:$0xff]   ;;  %s8312_s6 = scalar_lea.vmem [#allocation3], %s5489_s5 }
  0x1d   : > { %6673 = vmatpush3.bf16.msra.mxu0 %v7243_v7  ;;  %6482 = vmatprep.subr.bf16.mxu1 %v7244_v8  ;;  %v7261_v26 = vld [vmem:[%s7610_s11 + $0xf0] sm:$0xff]   ;;  %v7263_v29 = vld [vmem:[%s7610_s11 + $0x288] sm:$0xff]   ;;  %v7266_v30 = vld [vmem:[%s7610_s11 + $0xfc] sm:$0xff]   ;;  %s5370_s8 = sshll.u32 %s8312_s6, 4  ;;  %s8394_s8 = int_to_ptr.vmem [resolvable:$true] %s5370_s8 }
  0x1e   : > { %6674 = vmatprep.subr.bf16.mxu0 %v7245_v9  ;;  %6682 = vmatprep.mubr.bf16.mxu0 %v7253_v13  ;;  %v7267_v31 = vld [vmem:[%s7610_s11 + $0x294] sm:$0xff]   ;;  %v7268_v34 = vld [vmem:[%s7610_s11 + $0x108] sm:$0xff]   ;;  %v7270_v36 = vld [vmem:[%s7610_s11 + $0x2a0] sm:$0xff]   ;;  %s7412_s13 = scalar_lea.vmem %s8394_s8, 2048  ;;  %p7419_p1 = scmp.lt.s32.totalorder %s8394_s8, %s7417_s21 }
  0x1f   : > { %v7273_v37 = vld [vmem:[%s7610_s11 + $0x114] sm:$0xff]   ;;  %v5668_v39 = vld [vmem:[%s7610_s11 + $0x19c] sm:$0xf]  ;;  %v5669_v40 = vld [vmem:[%s7610_s11 + $0x1a0] sm:$0x1]  ;;  %p7413_p12 = scmp.ne.s32.totalorder %s8394_s8, %s7412_s13  ;;  %p7420_p2 = scmp.lt.s32.totalorder %s7418_s22, %s7412_s13 }
  0x20   : > { %6483 = vmatpush3.bf16.msra.mxu1 %v7244_v8  ;;  %v5667_v38 = vld [vmem:[%s7610_s11 + $0x198] sm:$0xf]  ;;  %v7274_v44 = vld [vmem:[%s7610_s11 + $0x2ac] sm:$0xff]   ;;  %v1416_v45 = vshll.u32 %v5668_v39, 16  ;;  %v1420_v46 = vshrl.u32 %v5668_v39, 16  ;;  %v1426_v47 = vshll.u32 %v5669_v40, 16 }
  0x21   : > { %6675 = vmatpush3.bf16.msra.mxu0 %v7245_v9  ;;  %6484 = vmatprep.subr.bf16.mxu1 %v7246_v10  ;;  %v1407_v41 = vshrl.u32 %v5667_v38, 16  ;;  %v1410_v42 = vshll.u32 %v5667_v38, 16  ;;  %v5670_v55 = vld [vmem:[%s7610_s11 + $0x1a4] sm:$0xf]  ;;  %v5671_v56 = vld [vmem:[%s7610_s11 + $0x1a8] sm:$0xf]  ;;  %p7414_p13 = pnand %p7413_p12, %p7560_p4  ;;  %p7421_p3 = por %p7420_p2, %p7419_p1 }
  0x22   : > { %6676 = vmatprep.subr.bf16.mxu0 %v7247_v11  ;;  %v1418_v50 = vrot.slane %v1416_v45, 5  ;;  %v1422_v51 = vrot.slane %v1420_v46, 4  ;;  %v1428_v52 = vrot.slane %v1426_v47, 5  ;;  %v5672_v57 = vld [vmem:[%s7610_s11 + $0x1ac] sm:$0x1]  ;;  %v1431_v60 = vshrl.u32 %v5670_v55, 16 }
  0x23   : > { %v1409_v48 = vrot.slane %v1407_v41, 4  ;;  %v1412_v49 = vrot.slane %v1410_v42, 5  ;;  %v1434_v61 = vshll.u32 %v5670_v55, 16  ;;  %v1440_v62 = vshll.u32 %v5671_v56, 16  ;;  %v7275_v63 = vld [vmem:[%s7610_s11 + $0x120] sm:$0xff]   ;;  %v7277_v4 = vld [vmem:[%s7610_s11 + $0x2b8] sm:$0xff]   ;;  %p7415_p0 = pneg %p7414_p13 }
  0x24   : > { %6485 = vmatpush3.bf16.msra.mxu1 %v7246_v10  ;;  %v1423_v59 = vor.u32 %v1422_v51, %v1418_v50  ;;  %v1444_v2 = vshrl.u32 %v5671_v56, 16  ;;  %v1450_v3 = vshll.u32 %v5672_v57, 16  ;;  %v7280_v5 = vld [vmem:[%s7610_s11 + $0x12c] sm:$0xff]   ;;  %v1433_v7 = vrot.slane %v1431_v60, 4  ;;  %v7281_v38 = vld [vmem:[%s7610_s11 + $0x138] sm:$0xff]   ;;  %v7284_v45 = vld [vmem:[%s7610_s11 + $0x144] sm:$0xff]  }
  0x25   : > { %6677 = vmatpush3.bf16.msra.mxu0 %v7247_v11  ;;  %6486 = vmatprep.subr.bf16.mxu1 %v7248_v14  ;;  %v1413_v54 = vor.u32 %v1412_v49, %v1409_v48  ;;  %v1436_v8 = vrot.slane %v1434_v61, 5  ;;  %v1442_v9 = vrot.slane %v1440_v62, 5  ;;  %v5673_v13 = vld [vmem:[%s7610_s11 + $0x1b0] sm:$0xf]  ;;  %v5677_v41 = vld [vmem:[%s7610_s11 + $0x1c0] sm:$0xf]  ;;  %p7422_p5 = pnand %p7421_p3, %p7415_p0 }
  0x26   : > { %6678 = vmatprep.subr.bf16.mxu0 %v7249_v15  ;;  %v1424_v6 = vrot.slane %v1423_v59, 4  ;;  %v1446_v11 = vrot.slane %v1444_v2, 4  ;;  %v1452_v12 = vrot.slane %v1450_v3, 5  ;;  %v5678_v42 = vld [vmem:[%s7610_s11 + $0x1c4] sm:$0x1]  ;;  %v1488_v47 = vshll.u32 %v5677_v41, 16 }
  0x27   : > { %v1414_v1 = vrot.slane %v1413_v54, 4  ;;  %v1492_v48 = vshrl.u32 %v5677_v41, 16  ;;  %v7287_v57 = vld [vmem:[%s8447_s1 + $0x188] sm:$0xff]   ;;  %v5681_v3 = vld [vmem:[%s7610_s11 + $0x1d0] sm:$0x1]  ;;  %v7294_v41 = vld [vmem:[%s8447_s1 + $0x38] sm:$0xff]  }
  0x28   : > { %6487 = vmatpush3.bf16.msra.mxu1 %v7248_v14  ;;  %v1429_v14 = vsel %vm7685_vm2, %v1424_v6, %v1428_v52  ;;  %v1498_v52 = vshll.u32 %v5678_v42, 16  ;;  %v1490_v55 = vrot.slane %v1488_v47, 5  ;;  %v5679_v62 = vld [vmem:[%s7610_s11 + $0x1c8] sm:$0xf] }
  0x29   : > { %6679 = vmatpush3.bf16.msra.mxu0 %v7249_v15  ;;  %6488 = vmatprep.subr.bf16.mxu1 %v7250_v16  ;;  %v1419_v10 = vsel %vm7685_vm2, %v1414_v1, %v1418_v50  ;;  %v1437_v15 = vor.u32 %v1436_v8, %v1433_v7  ;;  %v1494_v56 = vrot.slane %v1492_v48, 4 }
  0x2a   : > { %6680 = vmatprep.subr.bf16.mxu0 %v7251_v17  ;;  %v1500_v61 = vrot.slane %v1498_v52, 5  ;;  %v7289_v52 = vld [vmem:[%s7610_s11 + $0x168] sm:$0xff]  }
  0x2b   : > { %v1495_v2 = vor.u32 %v1494_v56, %v1490_v55 }
  0x2c   : > { %6489 = vmatpush3.bf16.msra.mxu1 %v7250_v16  ;;  %v5674_v16 = vld [vmem:[%s7610_s11 + $0x1b4] sm:$0xf] }
  0x2d   : > { %6681 = vmatpush3.bf16.msra.mxu0 %v7251_v17  ;;  %6522 = vmatprep.subr.bf16.mxu1 %v7255_v19  ;;  %v5675_v17 = vld [vmem:[%s7610_s11 + $0x1b8] sm:$0x1] }
  0x2e   : > { %6714 = vmatprep.subr.bf16.mxu0 %v7257_v20 }
  0x2f   : > { %6491 = vmatmul.mubr.bf16.vlgmr.msra.gmra.mrb[0].mxu1 %v7254_v18  ;;  %v1455_v18 = vshrl.u32 %v5673_v13, 16 }
  0x30   : > { %6683 = vmatmul.mubr.bf16.vlgmr.msra.gmra.mrb[0].mxu0 %v7256_v21  ;;  %6523 = vmatpush3.bf16.msra.mxu1 %v7255_v19  ;;  %v1458_v19 = vshll.u32 %v5673_v13, 16  ;;  %v1447_v21 = vor.u32 %v1446_v11, %v1442_v9  ;;  %v7285_v13 = vld [vmem:[%s7610_s11 + $0x150] sm:$0xff]  }
  0x31   : > { %6715 = vmatpush3.bf16.msra.mxu0 %v7257_v20  ;;  %6494 = vmatprep.mubr.bf16.mxu1 %v7259_v23  ;;  %v5715_v20 = vcombine.low %v1419_v10, %v1429_v14  ;;  %v1468_v23 = vshrl.u32 %v5674_v16, 16  ;;  %v1496_v10 = vrot.slane %v1495_v2, 4  ;;  %v5688_v2 = vld [vmem:[%s7610_s11 + $0x1ec] sm:$0xf] }
  0x32   : > { %6716 = vmatprep.subr.bf16.mxu0 %v7258_v22  ;;  %6686 = vmatprep.mubr.bf16.mxu0 %v7260_v24  ;;  %v7279_v24 = vld [vmem:[%s8447_s1 + $0x178] sm:$0xff]  }
  0x33   : > { %6524 = vmatprep.subr.bf16.mxu1 %v7262_v25 }
  0x34   : > { %6525 = vmatpush3.bf16.msra.mxu1 %v7262_v25  ;;  %v1438_v25 = vrot.slane %v1437_v15, 4 }
  0x35   : > { %6717 = vmatpush3.bf16.msra.mxu0 %v7258_v22  ;;  %6526 = vmatprep.subr.bf16.mxu1 %v7269_v27  ;;  %v1464_v22 = vshll.u32 %v5674_v16, 16 }
  0x36   : > { %6718 = vmatprep.subr.bf16.mxu0 %v7264_v28 }
  0x37   : > { %6495 = vmatmul.mubr.bf16.gmra.mrb[4].mxu1 %v7261_v26  ;;  %v1457_v26 = vrot.slane %v1455_v18, 4  ;;  %v7291_v18 = vld [vmem:[%s8447_s1 + $0x190] sm:$0xff]  }
  0x38   : > { %6687 = vmatmul.mubr.bf16.gmra.mrb[4].mxu0 %v7263_v29  ;;  %6498 = vmatprep.mubr.bf16.mxu1 %v7266_v30  ;;  %v7286_v29 = vld [vmem:[%s8447_s1 + $0x28] sm:$0xff]   ;;  %v1448_v30 = vrot.slane %v1447_v21, 4 }
  0x39   : > { %6719 = vmatpush3.bf16.msra.mxu0 %v7264_v28  ;;  %6690 = vmatprep.mubr.bf16.mxu0 %v7267_v31  ;;  %v1474_v28 = vshll.u32 %v5675_v17, 16  ;;  %v1466_v31 = vrot.slane %v1464_v22, 5  ;;  %v5682_v22 = vld [vmem:[%s7610_s11 + $0x1d4] sm:$0xf] }
  0x3a   : > { %6720 = vmatprep.subr.bf16.mxu0 %v7265_v32  ;;  %6527 = vmatpush3.bf16.msra.mxu1 %v7269_v27  ;;  %v1460_v27 = vrot.slane %v1458_v19, 5  ;;  %v1453_v39 = vsel %vm7685_vm2, %v1448_v30, %v1452_v12  ;;  %v1501_v19 = vsel %vm7685_vm2, %v1496_v10, %v1500_v61  ;;  %v7295_v61 = vld [vmem:[%s8447_s1 + $0x198] sm:$0xff]  }
  0x3b   : > { %6528 = vmatprep.subr.bf16.mxu1 %v7276_v33 }
  0x3d   : > { %6721 = vmatpush3.bf16.msra.mxu0 %v7265_v32  ;;  %v1470_v32 = vrot.slane %v1468_v23, 4  ;;  %v5683_v23 = vld [vmem:[%s7610_s11 + $0x1d8] sm:$0xf] }
  0x3e   : > { %6722 = vmatprep.subr.bf16.mxu0 %v7271_v35  ;;  %6529 = vmatpush3.bf16.msra.mxu1 %v7276_v33  ;;  %v1443_v33 = vsel %vm7685_vm2, %v1438_v25, %v1442_v9  ;;  %v1522_v9 = vshll.u32 %v5681_v3, 16  ;;  %v1536_v30 = vshll.u32 %v5683_v23, 16  ;;  %v5689_v3 = vld [vmem:[%s7610_s11 + $0x1f0] sm:$0xf] }
  0x3f   : > { %6499 = vmatmul.mubr.bf16.gmra.mrb[8].mxu1 %v7268_v34  ;;  %6530 = vmatprep.subr.bf16.mxu1 %v7282_v53  ;;  %v7283_v34 = vld [vmem:[%s8447_s1 + $0x180] sm:$0xff]   ;;  %v1471_v40 = vor.u32 %v1470_v32, %v1466_v31 }
  0x40   : > { %6691 = vmatmul.mubr.bf16.gmra.mrb[8].mxu0 %v7270_v36  ;;  %6502 = vmatprep.mubr.bf16.mxu1 %v7273_v37  ;;  %v1476_v36 = vrot.slane %v1474_v28, 5  ;;  %v5676_v37 = vld [vmem:[%s7610_s11 + $0x1bc] sm:$0xf]  ;;  %v1524_v17 = vrot.slane %v1522_v9, 5  ;;  %v1530_v28 = vshll.u32 %v5682_v22, 16 }
  0x41   : > { %6723 = vmatpush3.bf16.msra.mxu0 %v7271_v35  ;;  %6694 = vmatprep.mubr.bf16.mxu0 %v7274_v44  ;;  %v1461_v35 = vor.u32 %v1460_v27, %v1457_v26  ;;  %v1482_v44 = vshll.u32 %v5676_v37, 16  ;;  %v1472_v49 = vrot.slane %v1471_v40, 4  ;;  %v1527_v27 = vshrl.u32 %v5682_v22, 16  ;;  %v5685_v40 = vld [vmem:[%s7610_s11 + $0x1e0] sm:$0xf] }
  0x42   : > { %6724 = vmatprep.subr.bf16.mxu0 %v7272_v43  ;;  %6531 = vmatpush3.bf16.msra.mxu1 %v7282_v53  ;;  %v5716_v53 = vcombine.low %v1443_v33, %v1453_v39  ;;  %v1554_v47 = vshll.u32 %v5685_v40, 16 }
  0x43   : > { %v1462_v46 = vrot.slane %v1461_v35, 4  ;;  %6532 = vmatprep.subr.bf16.mxu1 %v7286_v29  ;;  %v1484_v51 = vrot.slane %v1482_v44, 5  ;;  %v1477_v59 = vsel %vm7685_vm2, %v1472_v49, %v1476_v36  ;;  %v1532_v35 = vrot.slane %v1530_v28, 5  ;;  %v5686_v44 = vld [vmem:[%s7610_s11 + $0x1e4] sm:$0xf] }
  0x44   : > { %v7293_v28 = vld [vmem:[%s7610_s11 + $0x180] sm:$0xff]  }
  0x45   : > { %6725 = vmatpush3.bf16.msra.mxu0 %v7272_v43  ;;  %v1479_v43 = vshrl.u32 %v5676_v37, 16  ;;  %v1467_v54 = vsel %vm7685_vm2, %v1462_v46, %v1466_v31  ;;  %v1540_v31 = vshrl.u32 %v5683_v23, 16  ;;  %v1538_v37 = vrot.slane %v1536_v30, 5 }
  0x46   : > { %6726 = vmatprep.subr.bf16.mxu0 %v7278_v0  ;;  %6533 = vmatpush3.bf16.msra.mxu1 %v7286_v29  ;;  %v5717_v1 = vcombine.low %v1467_v54, %v1477_v59  ;;  %v1551_v46 = vshrl.u32 %v5685_v40, 16  ;;  %v7779_v40 = vld [vmem:[%s8447_s1 + $0x80] sm:$0xff]  }
  0x47   : > { %6503 = vmatmul.mubr.bf16.gmra.mrb[12].mxu1 %v7275_v63  ;;  %v1481_v50 = vrot.slane %v1479_v43, 4  ;;  %v5680_v63 = vld [vmem:[%s7610_s11 + $0x1cc] sm:$0xf] }
  0x48   : > { %6695 = vmatmul.mubr.bf16.gmra.mrb[12].mxu0 %v7277_v4  ;;  %6506 = vmatprep.mubr.bf16.mxu1 %v7280_v5  ;;  %v1503_v4 = vshrl.u32 %v5679_v62, 16  ;;  %v1506_v5 = vshll.u32 %v5679_v62, 16  ;;  %v1512_v7 = vshll.u32 %v5680_v63, 16  ;;  %v1516_v8 = vshrl.u32 %v5680_v63, 16  ;;  %v7292_v63 = vld [vmem:[%s7610_s11 + $0x174] sm:$0xff]  }
  0x49   : > { %6727 = vmatpush3.bf16.msra.mxu0 %v7278_v0  ;;  %6730 = vmatprep.mubr.bf16.mxu0 %v5715_v20  ;;  %v1485_v60 = vor.u32 %v1484_v51, %v1481_v50  ;;  %v7290_v0 = vld [vmem:[%s8447_s1 + $0x30] sm:$0xff]   ;;  %v7288_v20 = vld [vmem:[%s7610_s11 + $0x15c] sm:$0xff]   ;;  %v1560_v50 = vshll.u32 %v5686_v44, 16  ;;  %v1564_v51 = vshrl.u32 %v5686_v44, 16  ;;  %v1553_v54 = vrot.slane %v1551_v46, 4 }
  0x4a   : > { %6728 = vmatprep.subr.bf16.mxu0 %v7279_v24  ;;  %6534 = vmatprep.subr.bf16.mxu1 %v7290_v0  ;;  %v1505_v11 = vrot.slane %v1503_v4, 4  ;;  %v1508_v12 = vrot.slane %v1506_v5, 5  ;;  %v1514_v15 = vrot.slane %v1512_v7, 5  ;;  %v1518_v16 = vrot.slane %v1516_v8, 4  ;;  %v5694_v44 = vld [vmem:[%s7610_s11 + $0x204] sm:$0xf] }
  0x4b   : > { %v1486_v6 = vrot.slane %v1485_v60, 4  ;;  %6535 = vmatpush3.bf16.msra.mxu1 %v7290_v0  ;;  %v1562_v59 = vrot.slane %v1560_v50, 5  ;;  %v1566_v60 = vrot.slane %v1564_v51, 4  ;;  %v1575_v7 = vshrl.u32 %v5688_v2, 16 }
  0x4c   : > { %v1509_v21 = vor.u32 %v1508_v12, %v1505_v11  ;;  %v1519_v26 = vor.u32 %v1518_v16, %v1514_v15  ;;  %6536 = vmatprep.subr.bf16.mxu1 %v7294_v41  ;;  %v1578_v8 = vshll.u32 %v5688_v2, 16  ;;  %v1584_v11 = vshll.u32 %v5689_v3, 16 }
  0x4d   : > { %6729 = vmatpush3.bf16.msra.mxu0 %v7279_v24  ;;  %v1491_v14 = vsel %vm7685_vm2, %v1486_v6, %v1490_v55  ;;  %v5684_v24 = vld [vmem:[%s7610_s11 + $0x1dc] sm:$0x1]  ;;  %v1556_v55 = vrot.slane %v1554_v47, 5  ;;  %v1567_v5 = vor.u32 %v1566_v60, %v1562_v59  ;;  %v5690_v6 = vld [vmem:[%s7610_s11 + $0x1f4] sm:$0x1]  ;;  %v1588_v12 = vshrl.u32 %v5689_v3, 16 }
  0x4e   : > { %6762 = vmatprep.subr.bf16.mxu0 %v7283_v34  ;;  %v5718_v25 = vcombine.low %v1491_v14, %v1501_v19  ;;  %v1510_v29 = vrot.slane %v1509_v21, 4  ;;  %v1546_v32 = vshll.u32 %v5684_v24, 16  ;;  %v1520_v33 = vrot.slane %v1519_v26, 4  ;;  %v5692_v24 = vld [vmem:[%s7610_s11 + $0x1fc] sm:$0xf] }
  0x4f   : > { %6507 = vmatmul.mubr.bf16.gmra.mrb[16].mxu1 %v7281_v38  ;;  %v1542_v38 = vrot.slane %v1540_v31, 4  ;;  %v1557_v0 = vor.u32 %v1556_v55, %v1553_v54  ;;  %v1577_v14 = vrot.slane %v1575_v7, 4  ;;  %v1594_v16 = vshll.u32 %v5690_v6, 16  ;;  %v7299_v55 = vld [vmem:[%s8447_s1 + $0x1a0] sm:$0xff]  }
  0x50   : > { %6731 = vmatmul.mubr.bf16.vlgmr.msra.gmra.mrb[0].mxu0 %v5716_v53  ;;  %6510 = vmatprep.mubr.bf16.mxu1 %v7284_v45  ;;  %v1515_v36 = vsel %vm7685_vm2, %v1510_v29, %v1514_v15  ;;  %v1548_v39 = vrot.slane %v1546_v32, 5  ;;  %v1525_v42 = vsel %vm7685_vm2, %v1520_v33, %v1524_v17  ;;  %v5687_v45 = vld [vmem:[%s7610_s11 + $0x1e8] sm:$0x1]  ;;  %v1580_v15 = vrot.slane %v1578_v8, 5  ;;  %v7296_v33 = vld [vmem:[%s7610_s11] sm:$0xff]   ;;  %v7300_v8 = vld [vmem:[%s7610_s11 + $0x18] sm:$0xff]  }
  0x51   : > { %6763 = vmatpush3.bf16.msra.mxu0 %v7283_v34  ;;  %6734 = vmatprep.mubr.bf16.mxu0 %v5717_v1  ;;  %v1529_v34 = vrot.slane %v1527_v27, 4  ;;  %v5719_v48 = vcombine.low %v1515_v36, %v1525_v42  ;;  %v1543_v49 = vor.u32 %v1542_v38, %v1538_v37  ;;  %v1570_v56 = vshll.u32 %v5687_v45, 16  ;;  %v5695_v45 = vld [vmem:[%s7610_s11 + $0x208] sm:$0xf] }
  0x52   : > { %6764 = vmatprep.subr.bf16.mxu0 %v7287_v57  ;;  %6537 = vmatpush3.bf16.msra.mxu1 %v7294_v41  ;;  %v1558_v10 = vrot.slane %v1557_v0, 4  ;;  %v1590_v19 = vrot.slane %v1588_v12, 4  ;;  %v1581_v22 = vor.u32 %v1580_v15, %v1577_v14  ;;  %v1596_v23 = vrot.slane %v1594_v16, 5  ;;  %v7302_v16 = vld [vmem:[%s8447_s1 + $0x88] sm:$0xff]  }
  0x53   : > { %v1533_v43 = vor.u32 %v1532_v35, %v1529_v34  ;;  %v1572_v1 = vrot.slane %v1570_v56, 5  ;;  %v1608_v31 = vshll.u32 %v5692_v24, 16  ;;  %v1612_v35 = vshrl.u32 %v5692_v24, 16  ;;  %6570 = vmatprep.subr.bf16.mxu1 %v7779_v40 }
  0x54   : > { %v1563_v17 = vsel %vm7685_vm2, %v1558_v10, %v1562_v59  ;;  %v1582_v32 = vrot.slane %v1581_v22, 4  ;;  %v1626_v50 = vshll.u32 %v5694_v44, 16  ;;  %v1636_v54 = vshrl.u32 %v5695_v45, 16 }
  0x55   : > { %6765 = vmatpush3.bf16.msra.mxu0 %v7287_v57  ;;  %v1534_v53 = vrot.slane %v1533_v43, 4  ;;  %v1544_v57 = vrot.slane %v1543_v49, 4  ;;  %v1614_v42 = vrot.slane %v1612_v35, 4  ;;  %v1623_v49 = vshrl.u32 %v5694_v44, 16 }
  0x56   : > { %6766 = vmatprep.subr.bf16.mxu0 %v7291_v18  ;;  %v1628_v59 = vrot.slane %v1626_v50, 5 }
  0x57   : > { %6511 = vmatmul.mubr.bf16.gmra.mrb[20].mxu1 %v7285_v13  ;;  %v1539_v62 = vsel %vm7685_vm2, %v1534_v53, %v1538_v37  ;;  %v1549_v4 = vsel %vm7685_vm2, %v1544_v57, %v1548_v39  ;;  %v1568_v13 = vrot.slane %v1567_v5, 4  ;;  %v1610_v39 = vrot.slane %v1608_v31, 5  ;;  %v5698_v5 = vld [vmem:[%s7610_s11 + $0x214] sm:$0xf] }
  0x58   : > { %6735 = vmatmul.mubr.bf16.gmra.mrb[4].mxu0 %v5718_v25  ;;  %6514 = vmatprep.mubr.bf16.mxu1 %v7288_v20  ;;  %v5720_v9 = vcombine.low %v1539_v62, %v1549_v4  ;;  %v5691_v20 = vld [vmem:[%s7610_s11 + $0x1f8] sm:$0xf]  ;;  %v5693_v25 = vld [vmem:[%s7610_s11 + $0x200] sm:$0x1]  ;;  %v1632_v53 = vshll.u32 %v5695_v45, 16  ;;  %v1625_v57 = vrot.slane %v1623_v49, 4 }
  0x59   : > { %6767 = vmatpush3.bf16.msra.mxu0 %v7291_v18  ;;  %6738 = vmatprep.mubr.bf16.mxu0 %v5719_v48  ;;  %v1586_v18 = vrot.slane %v1584_v11, 5  ;;  %v1573_v21 = vsel %vm7685_vm2, %v1568_v13, %v1572_v1  ;;  %v1599_v26 = vshrl.u32 %v5691_v20, 16  ;;  %v1602_v30 = vshll.u32 %v5691_v20, 16  ;;  %v5696_v48 = vld [vmem:[%s7610_s11 + $0x20c] sm:$0x1] }
  0x5a   : > { %6768 = vmatprep.subr.bf16.mxu0 %v7295_v61  ;;  %v5721_v27 = vcombine.low %v1563_v17, %v1573_v21  ;;  %v1618_v36 = vshll.u32 %v5693_v25, 16  ;;  %v1642_v60 = vshll.u32 %v5696_v48, 16  ;;  %v1634_v62 = vrot.slane %v1632_v53, 5  ;;  %v7297_v1 = vld [vmem:[%s7610_s11 + $0xc] sm:$0xff]   ;;  %v5700_v25 = vld [vmem:[%s7610_s11 + $0x21c] sm:$0xf] }
  0x5b   : > { %v1591_v29 = vor.u32 %v1590_v19, %v1586_v18  ;;  %v1601_v34 = vrot.slane %v1599_v26, 4  ;;  %v1604_v38 = vrot.slane %v1602_v30, 5  ;;  %v1587_v41 = vsel %vm7685_vm2, %v1582_v32, %v1586_v18  ;;  %v5697_v4 = vld [vmem:[%s7610_s11 + $0x210] sm:$0xf]  ;;  %v7303_v17 = vld [vmem:[%s8447_s1 + $0x1a8] sm:$0xff]  }
  0x5c   : > { %v1620_v43 = vrot.slane %v1618_v36, 5  ;;  %v1629_v2 = vor.u32 %v1628_v59, %v1625_v57  ;;  %v1644_v3 = vrot.slane %v1642_v60, 5  ;;  %v1647_v10 = vshrl.u32 %v5697_v4, 16  ;;  %v5702_v30 = vld [vmem:[%s7610_s11 + $0x224] sm:$0x1]  ;;  %v7306_v60 = vld [vmem:[%s8447_s1 + $0x90] sm:$0xff]  }
  0x5d   : > { %6769 = vmatpush3.bf16.msra.mxu0 %v7295_v61  ;;  %v1592_v37 = vrot.slane %v1591_v29, 4  ;;  %v1605_v47 = vor.u32 %v1604_v38, %v1601_v34  ;;  %v1650_v11 = vshll.u32 %v5697_v4, 16  ;;  %v1656_v14 = vshll.u32 %v5698_v5, 16  ;;  %v5701_v29 = vld [vmem:[%s7610_s11 + $0x220] sm:$0xf]  ;;  %v7307_v4 = vld [vmem:[%s8447_s1 + $0x1b0] sm:$0xff]  }
  0x5e   : > { %6770 = vmatprep.subr.bf16.mxu0 %v7299_v55  ;;  %v1630_v13 = vrot.slane %v1629_v2, 4  ;;  %v1660_v15 = vshrl.u32 %v5698_v5, 16  ;;  %v1649_v19 = vrot.slane %v1647_v10, 4  ;;  %v1671_v31 = vshrl.u32 %v5700_v25, 16  ;;  %v5704_v48 = vld [vmem:[%s7610_s11 + $0x22c] sm:$0xf] }
  0x5f   : > { %6515 = vmatmul.mubr.bf16.gmra.mrb[24].mxu1 %v7289_v52  ;;  %v1597_v46 = vsel %vm7685_vm2, %v1592_v37, %v1596_v23  ;;  %v1615_v52 = vor.u32 %v1614_v42, %v1610_v39  ;;  %v1606_v56 = vrot.slane %v1605_v47, 4  ;;  %v1652_v20 = vrot.slane %v1650_v11, 5  ;;  %v7301_v42 = vld [vmem:[%s7610_s11 + $0x24] sm:$0xff]  }
  0x60   : > { %6739 = vmatmul.mubr.bf16.gmra.mrb[8].mxu0 %v5720_v9  ;;  %6518 = vmatprep.mubr.bf16.mxu1 %v7292_v63  ;;  %v5722_v51 = vcombine.low %v1587_v41, %v1597_v46  ;;  %v1638_v63 = vrot.slane %v1636_v54, 4  ;;  %v5699_v9 = vld [vmem:[%s7610_s11 + $0x218] sm:$0x1]  ;;  %v1635_v22 = vsel %vm7685_vm2, %v1630_v13, %v1634_v62  ;;  %v1658_v23 = vrot.slane %v1656_v14, 5 }
  0x61   : > { %6742 = vmatprep.mubr.bf16.mxu0 %v5721_v27  ;;  %v1616_v61 = vrot.slane %v1615_v52, 4  ;;  %v1611_v0 = vsel %vm7685_vm2, %v1606_v56, %v1610_v39  ;;  %6771 = vmatpush3.bf16.msra.mxu0 %v7299_v55  ;;  %v1666_v21 = vshll.u32 %v5699_v9, 16  ;;  %v1662_v24 = vrot.slane %v1660_v15, 4  ;;  %v7304_v56 = vld [vmem:[%s7610_s11 + $0x30] sm:$0xff]   ;;  %v5707_v9 = vld [vmem:[%s7610_s11 + $0x238] sm:$0xf] }
  0x62   : > { %v1639_v7 = vor.u32 %v1638_v63, %v1634_v62  ;;  %6772 = vmatprep.subr.bf16.mxu0 %v7303_v17  ;;  %v1653_v27 = vor.u32 %v1652_v20, %v1649_v19  ;;  %v1674_v34 = vshll.u32 %v5700_v25, 16  ;;  %v1680_v35 = vshll.u32 %v5701_v29, 16 }
  0x63   : > { %v1621_v6 = vsel %vm7685_vm2, %v1616_v61, %v1620_v43  ;;  %v1673_v37 = vrot.slane %v1671_v31, 4  ;;  %v1684_v38 = vshrl.u32 %v5701_v29, 16  ;;  %v1690_v39 = vshll.u32 %v5702_v30, 16 }
  0x64   : > { %v5723_v12 = vcombine.low %v1611_v0, %v1621_v6  ;;  %v1640_v18 = vrot.slane %v1639_v7, 4  ;;  %v1654_v36 = vrot.slane %v1653_v27, 4  ;;  %v1676_v43 = vrot.slane %v1674_v34, 5 }
  0x65   : > { %6773 = vmatpush3.bf16.msra.mxu0 %v7303_v17  ;;  %v1682_v44 = vrot.slane %v1680_v35, 5  ;;  %v1686_v46 = vrot.slane %v1684_v38, 4  ;;  %v1692_v47 = vrot.slane %v1690_v39, 5  ;;  %v1704_v57 = vshll.u32 %v5704_v48, 16  ;;  %v7305_v17 = vld [vmem:[%s7610_s11 + $0x3c] sm:$0xff]  }
  0x66   : > { %v1645_v26 = vsel %vm7685_vm2, %v1640_v18, %v1644_v3  ;;  %v1659_v45 = vsel %vm7685_vm2, %v1654_v36, %v1658_v23  ;;  %v1677_v50 = vor.u32 %v1676_v43, %v1673_v37  ;;  %v1708_v59 = vshrl.u32 %v5704_v48, 16  ;;  %6774 = vmatprep.subr.bf16.mxu0 %v7307_v4 }
  0x67   : > { %6519 = vmatmul.mubr.bf16.gmra.mrb[28].mxu1 %v7293_v28  ;;  %v1668_v28 = vrot.slane %v1666_v21, 5  ;;  %v5724_v32 = vcombine.low %v1635_v22, %v1645_v26  ;;  %v1687_v55 = vor.u32 %v1686_v46, %v1682_v44  ;;  %v1706_v2 = vrot.slane %v1704_v57, 5 }
  0x68   : > { %6743 = vmatmul.mubr.bf16.gmra.mrb[12].mxu0 %v5722_v51  ;;  %6538 = vmatprep.mubr.bf16.mxu1 %v7296_v33  ;;  %v1663_v33 = vor.u32 %v1662_v24, %v1658_v23  ;;  %v5705_v51 = vld [vmem:[%s7610_s11 + $0x230] sm:$0x1]  ;;  %v1678_v61 = vrot.slane %v1677_v50, 4  ;;  %v1710_v3 = vrot.slane %v1708_v59, 4  ;;  %v1728_v18 = vshll.u32 %v5707_v9, 16  ;;  %v7308_v24 = vld [vmem:[%s7610_s11 + $0x48] sm:$0xff]  }
  0x69   : > { %6746 = vmatprep.mubr.bf16.mxu0 %v5723_v12  ;;  %v1714_v0 = vshll.u32 %v5705_v51, 16  ;;  %v5708_v12 = vld [vmem:[%s7610_s11 + $0x23c] sm:$0x1]  ;;  %v1732_v19 = vshrl.u32 %v5707_v9, 16  ;;  %6775 = vmatpush3.bf16.msra.mxu0 %v7307_v4  ;;  %v5712_v50 = vld [vmem:[%s7610_s11 + $0x24c] sm:$0xf] }
  0x6a   : > { %v1664_v41 = vrot.slane %v1663_v33, 4  ;;  %v1683_v5 = vsel %vm7685_vm2, %v1678_v61, %v1682_v44  ;;  %v1711_v11 = vor.u32 %v1710_v3, %v1706_v2  ;;  %v1738_v23 = vshll.u32 %v5708_v12, 16  ;;  %v5711_v33 = vld [vmem:[%s7610_s11 + $0x248] sm:$0x1]  ;;  %v5713_v51 = vld [vmem:[%s7610_s11 + $0x250] sm:$0xf] }
  0x6b   : > { %v1716_v7 = vrot.slane %v1714_v0, 5  ;;  %v1730_v26 = vrot.slane %v1728_v18, 5  ;;  %v1734_v27 = vrot.slane %v1732_v19, 4  ;;  %v1762_v43 = vshll.u32 %v5711_v33, 16  ;;  %v7317_v18 = vld [vmem:[%s8447_s1 + $0x1c0] sm:$0xff]  }
  0x6c   : > { %v1669_v49 = vsel %vm7685_vm2, %v1664_v41, %v1668_v28  ;;  %v1712_v20 = vrot.slane %v1711_v11, 4  ;;  %v5709_v28 = vld [vmem:[%s7610_s11 + $0x240] sm:$0xf]  ;;  %v1740_v31 = vrot.slane %v1738_v23, 5  ;;  %v1776_v61 = vshll.u32 %v5713_v51, 16  ;;  %v7318_v23 = vld [vmem:[%s7610_s11 + $0x78] sm:$0xff]  }
  0x6d   : > { %v5725_v54 = vcombine.low %v1659_v45, %v1669_v49  ;;  %v1743_v34 = vshrl.u32 %v5709_v28, 16  ;;  %v1735_v36 = vor.u32 %v1734_v27, %v1730_v26  ;;  %v1746_v37 = vshll.u32 %v5709_v28, 16  ;;  %v7320_v27 = vld [vmem:[%s7610_s11 + $0x84] sm:$0xff]   ;;  %v7325_v33 = vld [vmem:[%s7610_s11 + $0x3c] sm:$0xff]  }
  0x6e   : > { %v1717_v29 = vsel %vm7685_vm2, %v1712_v20, %v1716_v7  ;;  %v1764_v49 = vrot.slane %v1762_v43, 5  ;;  %v7312_v7 = vld [vmem:[%s7610_s11 + $0x60] sm:$0xff]   ;;  %v7313_v20 = vld [vmem:[%s7610_s11 + $0xc] sm:$0xff]  }
  0x6f   : > { %6539 = vmatmul.mubr.bf16.vlgmr.msra.gmra.mrb[0].mxu1 %v7297_v1  ;;  %v1688_v1 = vrot.slane %v1687_v55, 4  ;;  %v1745_v41 = vrot.slane %v1743_v34, 4  ;;  %v1736_v44 = vrot.slane %v1735_v36, 4  ;;  %v1748_v45 = vrot.slane %v1746_v37, 5  ;;  %v7323_v28 = vld [vmem:[%s8447_s1 + $0x1c8] sm:$0xff]   ;;  %v7326_v34 = vld [vmem:[%s7610_s11 + $0x9c] sm:$0xff]  }
  0x70   : > { %6571 = vmatpush3.bf16.msra.mxu1 %v7779_v40  ;;  %6542 = vmatprep.mubr.bf16.mxu1 %v7300_v8  ;;  %v5703_v40 = vld [vmem:[%s7610_s11 + $0x228] sm:$0xf]  ;;  %v5706_v8 = vld [vmem:[%s7610_s11 + $0x234] sm:$0xf]  ;;  %v1767_v55 = vshrl.u32 %v5712_v50, 16  ;;  %v7335_v37 = vld [vmem:[%s8447_s1 + $0x1d8] sm:$0xff]  }
  0x71   : > { %6747 = vmatmul.mubr.bf16.gmra.mrb[16].mxu0 %v5724_v32  ;;  %6572 = vmatprep.subr.bf16.mxu1 %v7302_v16  ;;  %v1695_v52 = vshrl.u32 %v5703_v40, 16  ;;  %v1698_v53 = vshll.u32 %v5703_v40, 16  ;;  %v1693_v10 = vsel %vm7685_vm2, %v1688_v1, %v1692_v47  ;;  %v1719_v13 = vshrl.u32 %v5706_v8, 16  ;;  %v5710_v32 = vld [vmem:[%s7610_s11 + $0x244] sm:$0xf]  ;;  %v7310_v47 = vld [vmem:[%s8447_s1 + $0x98] sm:$0xff]  }
  0x72   : > { %6750 = vmatprep.mubr.bf16.mxu0 %v5725_v54  ;;  %v1722_v14 = vshll.u32 %v5706_v8, 16  ;;  %v5726_v15 = vcombine.low %v1683_v5, %v1693_v10  ;;  %v1752_v38 = vshll.u32 %v5710_v32, 16  ;;  %v5714_v54 = vld [vmem:[%s7610_s11 + $0x254] sm:$0x1]  ;;  %v1769_v1 = vrot.slane %v1767_v55, 4  ;;  %v7330_v36 = vld [vmem:[%s7610_s11 + $0xa8] sm:$0xff]  }
  0x73   : > { %v1697_v62 = vrot.slane %v1695_v52, 4  ;;  %v1700_v63 = vrot.slane %v1698_v53, 5  ;;  %v1721_v21 = vrot.slane %v1719_v13, 4  ;;  %v1741_v52 = vsel %vm7685_vm2, %v1736_v44, %v1740_v31  ;;  %v7322_v31 = vld [vmem:[%s7610_s11 + $0x30] sm:$0xff]  }
  0x74   : > { %6573 = vmatpush3.bf16.msra.mxu1 %v7302_v16  ;;  %v1724_v22 = vrot.slane %v1722_v14, 5  ;;  %v1754_v46 = vrot.slane %v1752_v38, 5  ;;  %v1749_v53 = vor.u32 %v1748_v45, %v1745_v41  ;;  %v1786_v3 = vshll.u32 %v5714_v54, 16  ;;  %v550_v38 = vld [vmem:[%s7610_s11] sm:$0xf]  ;;  %v7331_v55 = vld [vmem:[%s7610_s11 + $0x54] sm:$0xff]  }
  0x75   : > { %6574 = vmatprep.subr.bf16.mxu1 %v7306_v60  ;;  %v1701_v6 = vor.u32 %v1700_v63, %v1697_v62  ;;  %v1780_v62 = vshrl.u32 %v5713_v51, 16  ;;  %v7311_v63 = vld [vmem:[%s8447_s1 + $0x1b8] sm:$0xff]   ;;  %v1778_v5 = vrot.slane %v1776_v61, 5  ;;  %v552_v41 = vld [vmem:[%s7610_s11 + $0x8] sm:$0x1]  ;;  %v605_v43 = vshll.u32 %v550_v38, 16 }
  0x76   : > { %v1725_v30 = vor.u32 %v1724_v22, %v1721_v21  ;;  %v1750_v0 = vrot.slane %v1749_v53, 4  ;;  %6776 = vmatprep.subr.bf16.mxu0 %v7311_v63  ;;  %v1788_v10 = vrot.slane %v1786_v3, 5  ;;  %v7314_v22 = vld [vmem:[%s7610_s11 + $0x6c] sm:$0xff]  }
  0x77   : > { %6543 = vmatmul.mubr.bf16.gmra.mrb[4].mxu1 %v7301_v42  ;;  %v1702_v16 = vrot.slane %v1701_v6, 4  ;;  %v1756_v42 = vshrl.u32 %v5710_v32, 16  ;;  %v1782_v6 = vrot.slane %v1780_v62, 4  ;;  %6777 = vmatpush3.bf16.msra.mxu0 %v7311_v63  ;;  %v7329_v32 = vld [vmem:[%s8447_s1 + $0x1d0] sm:$0xff]   ;;  %v7915_v62 = vld [vmem:[%s8447_s1 + $0xc0] sm:$0xff]  }
  0x78   : > { %6546 = vmatprep.mubr.bf16.mxu1 %v7304_v56  ;;  %6575 = vmatpush3.bf16.msra.mxu1 %v7306_v60  ;;  %v1726_v39 = vrot.slane %v1725_v30, 4  ;;  %v1770_v56 = vshll.u32 %v5712_v50, 16  ;;  %v7309_v60 = vld [vmem:[%s7610_s11 + $0x54] sm:$0xff]   ;;  %v1755_v8 = vsel %vm7685_vm2, %v1750_v0, %v1754_v46  ;;  %v554_v53 = vld [vmem:[%s7610_s11 + $0x10] sm:$0xf] }
  0x79   : > { %6751 = vmatmul.mubr.bf16.gmra.mrb[20].mxu0 %v5726_v15  ;;  %v1707_v25 = vsel %vm7685_vm2, %v1702_v16, %v1706_v2  ;;  %v1758_v48 = vrot.slane %v1756_v42, 4  ;;  %6576 = vmatprep.subr.bf16.mxu1 %v7310_v47  ;;  %v1783_v12 = vor.u32 %v1782_v6, %v1778_v5  ;;  %v7315_v15 = vld [vmem:[%s8447_s1 + $0xa0] sm:$0xff]   ;;  %v7324_v30 = vld [vmem:[%s7610_s11 + $0x90] sm:$0xff]   ;;  %v602_v42 = vshrl.u32 %v550_v38, 16 }
  0x7a   : > { %v5727_v35 = vcombine.low %v1707_v25, %v1717_v29  ;;  %v1731_v40 = vsel %vm7685_vm2, %v1726_v39, %v1730_v26  ;;  %v1772_v2 = vrot.slane %v1770_v56, 5  ;;  %6810 = vmatprep.subr.bf16.mxu0 %v7317_v18  ;;  %v7316_v25 = vld [vmem:[%s7610_s11 + $0x18] sm:$0xff]   ;;  %v7319_v26 = vld [vmem:[%s7610_s11 + $0x24] sm:$0xff]   ;;  %v7327_v29 = vld [vmem:[%s8447_s1 + $0xb0] sm:$0xff]   ;;  %v639_v61 = vshrl.u32 %v554_v53, 16 }
  0x7b   : > { %v5728_v57 = vcombine.low %v1731_v40, %v1741_v52  ;;  %v1759_v59 = vor.u32 %v1758_v48, %v1754_v46  ;;  %v1784_v16 = vrot.slane %v1783_v12, 4  ;;  %v551_v39 = vld [vmem:[%s7610_s11 + $0x4] sm:$0xf]  ;;  %v621_v46 = vshll.u32 %v552_v41, 16  ;;  %v553_v48 = vld [vmem:[%s7610_s11 + $0xc] sm:$0xf] }
  0x7c   : > { %6754 = vmatprep.mubr.bf16.mxu0 %v5727_v35  ;;  %6577 = vmatpush3.bf16.msra.mxu1 %v7310_v47  ;;  %v1773_v9 = vor.u32 %v1772_v2, %v1769_v1  ;;  %v7333_v35 = vld [vmem:[%s8447_s1 + $0xb8] sm:$0xff]   ;;  %v611_v44 = vshll.u32 %v551_v39, 16  ;;  %v615_v45 = vshrl.u32 %v551_v39, 16  ;;  %v604_v47 = vrot.slane %v602_v42, 4 }
  0x7d   : > { %v1760_v4 = vrot.slane %v1759_v59, 4  ;;  %6578 = vmatprep.subr.bf16.mxu1 %v7315_v15  ;;  %v1789_v19 = vsel %vm7685_vm2, %v1784_v16, %v1788_v10  ;;  %v607_v40 = vrot.slane %v605_v43, 5  ;;  %v623_v52 = vrot.slane %v621_v46, 5  ;;  %v7332_v6 = vld [vmem:[%s7610_s11 + $0xb4] sm:$0xff]   ;;  %v558_v16 = vld [vmem:[%s7610_s11 + $0x20] sm:$0x1] }
  0x7e   : > { %v1774_v14 = vrot.slane %v1773_v9, 4  ;;  %v613_v50 = vrot.slane %v611_v44, 5  ;;  %v617_v51 = vrot.slane %v615_v45, 4  ;;  %v626_v54 = vshrl.u32 %v553_v48, 16  ;;  %v7339_v9 = vld [vmem:[%s8447_s1 + $0x1e0] sm:$0xff]  }
  0x7f   : > { %6547 = vmatmul.mubr.bf16.gmra.mrb[8].mxu1 %v7305_v17  ;;  %v1765_v11 = vsel %vm7685_vm2, %v1760_v4, %v1764_v49  ;;  %v7328_v49 = vld [vmem:[%s7610_s11 + $0x48] sm:$0xff]   ;;  %v608_v56 = vor.u32 %v607_v40, %v604_v47  ;;  %v629_v59 = vshll.u32 %v553_v48, 16 }
  0x80   : > { %6550 = vmatprep.mubr.bf16.mxu1 %v7308_v24  ;;  %v5729_v13 = vcombine.low %v1755_v8, %v1765_v11  ;;  %v1779_v17 = vsel %vm7685_vm2, %v1774_v14, %v1778_v5  ;;  %6579 = vmatpush3.bf16.msra.mxu1 %v7315_v15  ;;  %v7321_v24 = vld [vmem:[%s8447_s1 + $0xa8] sm:$0xff]   ;;  %v618_v63 = vor.u32 %v617_v51, %v613_v50  ;;  %v628_v0 = vrot.slane %v626_v54, 4  ;;  %v557_v15 = vld [vmem:[%s7610_s11 + $0x1c] sm:$0xf] }
  0x81   : > { %6755 = vmatmul.mubr.bf16.gmra.mrb[24].mxu0 %v5728_v57  ;;  %v5730_v21 = vcombine.low %v1779_v17, %v1789_v19  ;;  %6580 = vmatprep.subr.bf16.mxu1 %v7321_v24  ;;  %v555_v57 = vld [vmem:[%s7610_s11 + $0x14] sm:$0x1]  ;;  %v609_v2 = vrot.slane %v608_v56, 4  ;;  %v631_v3 = vrot.slane %v629_v59, 5  ;;  %v641_v5 = vrot.slane %v639_v61, 4  ;;  %v7343_v51 = vld [vmem:[%s8447_s1 + $0x1e8] sm:$0xff]  }
  0x82   : > { %6758 = vmatprep.mubr.bf16.mxu0 %v5729_v13  ;;  %v645_v1 = vshll.u32 %v555_v57, 16  ;;  %v556_v13 = vld [vmem:[%s7610_s11 + $0x18] sm:$0xf]  ;;  %v562_v57 = vld [vmem:[%s7610_s11 + $0x30] sm:$0xf] }
  0x83   : > { %v614_v10 = vsel %vm7685_vm2, %v609_v2, %v613_v50  ;;  %v632_v11 = vor.u32 %v631_v3, %v628_v0  ;;  %v650_v17 = vshrl.u32 %v556_v13, 16  ;;  %v7341_v50 = vld [vmem:[%s8447_s1 + $0xc8] sm:$0xff]   ;;  %v563_v59 = vld [vmem:[%s7610_s11 + $0x34] sm:$0xf]  ;;  %v7338_v61 = vld [vmem:[%s7610_s11 + $0x78] sm:$0xff]   ;;  %v698_v0 = vshrl.u32 %v562_v57, 16 }
  0x84   : > { %6581 = vmatpush3.bf16.msra.mxu1 %v7321_v24  ;;  %v647_v8 = vrot.slane %v645_v1, 5  ;;  %v701_v1 = vshll.u32 %v562_v57, 16  ;;  %v707_v2 = vshll.u32 %v563_v59, 16 }
  0x85   : > { %6582 = vmatprep.subr.bf16.mxu1 %v7327_v29  ;;  %v652_v24 = vrot.slane %v650_v17, 4  ;;  %v567_v17 = vld [vmem:[%s7610_s11 + $0x44] sm:$0x1] }
  0x87   : > { %6551 = vmatmul.mubr.bf16.gmra.mrb[12].mxu1 %v7309_v60  ;;  %v635_v60 = vshll.u32 %v554_v53, 16 }
  0x88   : > { %6554 = vmatprep.mubr.bf16.mxu1 %v7312_v7  ;;  %6583 = vmatpush3.bf16.msra.mxu1 %v7327_v29  ;;  %v619_v7 = vrot.slane %v618_v63, 4 }
  0x89   : > { %6759 = vmatmul.mubr.bf16.gmra.mrb[28].mxu0 %v5730_v21  ;;  %6584 = vmatprep.subr.bf16.mxu1 %v7333_v35  ;;  %v637_v4 = vrot.slane %v635_v60, 5  ;;  %v564_v60 = vld [vmem:[%s7610_s11 + $0x38] sm:$0x1] }
  0x8a   : > { %6778 = vmatprep.mubr.bf16.mxu0 %v7313_v20  ;;  %v624_v14 = vsel %vm7685_vm2, %v619_v7, %v623_v52  ;;  %v633_v20 = vrot.slane %v632_v11, 4  ;;  %v711_v7 = vshrl.u32 %v563_v59, 16  ;;  %v709_v11 = vrot.slane %v707_v2, 5  ;;  %v571_v59 = vld [vmem:[%s7610_s11 + $0x54] sm:$0xf] }
  0x8b   : > { %v642_v12 = vor.u32 %v641_v5, %v637_v4  ;;  %v5555_v19 = vcombine.low %v614_v10, %v624_v14  ;;  %v703_v10 = vrot.slane %v701_v1, 5  ;;  %v573_v1 = vld [vmem:[%s7610_s11 + $0x5c] sm:$0x1]  ;;  %v770_v2 = vshrl.u32 %v571_v59, 16 }
  0x8c   : > { %6585 = vmatpush3.bf16.msra.mxu1 %v7333_v35  ;;  %v638_v29 = vsel %vm7685_vm2, %v633_v20, %v637_v4  ;;  %v7340_v4 = vld [vmem:[%s7610_s11 + $0x84] sm:$0xff]  }
  0x8d   : > { %6618 = vmatprep.subr.bf16.mxu1 %v7915_v62  ;;  %v643_v21 = vrot.slane %v642_v12, 4  ;;  %v717_v12 = vshll.u32 %v564_v60, 16  ;;  %v572_v60 = vld [vmem:[%s7610_s11 + $0x58] sm:$0xf] }
  0x8f   : > { %6555 = vmatmul.mubr.bf16.gmra.mrb[16].mxu1 %v7314_v22  ;;  %v659_v22 = vshll.u32 %v557_v15, 16 }
  0x90   : > { %6558 = vmatprep.mubr.bf16.mxu1 %v7318_v23  ;;  %v7334_v23 = vld [vmem:[%s7610_s11 + $0x60] sm:$0xff]  }
  0x91   : > { %6779 = vmatmul.mubr.bf16.vlgmr.msra.gmra.mrb[0].mxu0 %v7316_v25 }
  0x92   : > { %6811 = vmatpush3.bf16.msra.mxu0 %v7317_v18  ;;  %6782 = vmatprep.mubr.bf16.mxu0 %v7319_v26  ;;  %v653_v18 = vshll.u32 %v556_v13, 16  ;;  %v663_v26 = vshrl.u32 %v557_v15, 16  ;;  %v565_v13 = vld [vmem:[%s7610_s11 + $0x3c] sm:$0xf]  ;;  %v713_v15 = vrot.slane %v711_v7, 4 }
  0x93   : > { %6812 = vmatprep.subr.bf16.mxu0 %v7323_v28 }
  0x94   : > { %v655_v25 = vrot.slane %v653_v18, 5  ;;  %v665_v35 = vrot.slane %v663_v26, 4  ;;  %v722_v18 = vshrl.u32 %v565_v13, 16 }
  0x96   : > { %6813 = vmatpush3.bf16.msra.mxu0 %v7323_v28  ;;  %v7336_v28 = vld [vmem:[%s7610_s11 + $0x6c] sm:$0xff]  }
  0x97   : > { %6559 = vmatmul.mubr.bf16.gmra.mrb[20].mxu1 %v7320_v27  ;;  %6814 = vmatprep.subr.bf16.mxu0 %v7329_v32  ;;  %v669_v27 = vshll.u32 %v558_v16, 16  ;;  %v566_v16 = vld [vmem:[%s7610_s11 + $0x40] sm:$0xf] }
  0x98   : > { %6562 = vmatprep.mubr.bf16.mxu1 %v7324_v30  ;;  %v648_v30 = vsel %vm7685_vm2, %v643_v21, %v647_v8  ;;  %v7345_v8 = vld [vmem:[%s8447_s1 + $0xd0] sm:$0xff]   ;;  %v719_v21 = vrot.slane %v717_v12, 5  ;;  %v735_v26 = vshrl.u32 %v566_v16, 16 }
  0x99   : > { %6783 = vmatmul.mubr.bf16.gmra.mrb[4].mxu0 %v7322_v31  ;;  %v661_v31 = vrot.slane %v659_v22, 5  ;;  %v5556_v43 = vcombine.low %v638_v29, %v648_v30  ;;  %v725_v22 = vshll.u32 %v565_v13, 16  ;;  %v741_v29 = vshll.u32 %v567_v17, 16  ;;  %v7347_v30 = vld [vmem:[%s8447_s1 + $0x1f0] sm:$0xff]  }
  0x9a   : > { %6786 = vmatprep.mubr.bf16.mxu0 %v7325_v33  ;;  %6815 = vmatpush3.bf16.msra.mxu0 %v7329_v32  ;;  %v559_v32 = vld [vmem:[%s7610_s11 + $0x24] sm:$0xf]  ;;  %v560_v33 = vld [vmem:[%s7610_s11 + $0x28] sm:$0xf] }
  0x9b   : > { %6816 = vmatprep.subr.bf16.mxu0 %v7335_v37  ;;  %v674_v38 = vshrl.u32 %v559_v32, 16  ;;  %v677_v39 = vshll.u32 %v559_v32, 16  ;;  %v683_v41 = vshll.u32 %v560_v33, 16  ;;  %v687_v42 = vshrl.u32 %v560_v33, 16 }
  0x9c   : > { %v666_v45 = vor.u32 %v665_v35, %v661_v31  ;;  %v737_v33 = vrot.slane %v735_v26, 4 }
  0x9d   : > { %v676_v47 = vrot.slane %v674_v38, 4  ;;  %v679_v40 = vrot.slane %v677_v39, 5  ;;  %v685_v48 = vrot.slane %v683_v41, 5  ;;  %v568_v38 = vld [vmem:[%s7610_s11 + $0x48] sm:$0xf]  ;;  %v7349_v39 = vld [vmem:[%s8447_s1 + $0xd8] sm:$0xff]  }
  0x9e   : > { %6817 = vmatpush3.bf16.msra.mxu0 %v7335_v37  ;;  %v561_v37 = vld [vmem:[%s7610_s11 + $0x2c] sm:$0x1]  ;;  %v667_v53 = vrot.slane %v666_v45, 4  ;;  %v746_v45 = vshrl.u32 %v568_v38, 16 }
  0x9f   : > { %6563 = vmatmul.mubr.bf16.gmra.mrb[24].mxu1 %v7326_v34  ;;  %6818 = vmatprep.subr.bf16.mxu0 %v7339_v9  ;;  %v656_v34 = vor.u32 %v655_v25, %v652_v24  ;;  %v693_v46 = vshll.u32 %v561_v37, 16  ;;  %v724_v24 = vrot.slane %v722_v18, 4  ;;  %v731_v25 = vshll.u32 %v566_v16, 16  ;;  %v7348_v16 = vld [vmem:[%s7610_s11 + $0xb4] sm:$0xff]  }
  0xa0   : > { %6566 = vmatprep.mubr.bf16.mxu1 %v7330_v36  ;;  %v671_v36 = vrot.slane %v669_v27, 5  ;;  %v743_v37 = vrot.slane %v741_v29, 5 }
  0xa1   : > { %6787 = vmatmul.mubr.bf16.gmra.mrb[8].mxu0 %v7328_v49  ;;  %v657_v44 = vrot.slane %v656_v34, 4  ;;  %v689_v49 = vrot.slane %v687_v42, 4  ;;  %v695_v54 = vrot.slane %v693_v46, 5  ;;  %v733_v32 = vrot.slane %v731_v25, 5  ;;  %v7342_v34 = vld [vmem:[%s7610_s11 + $0x90] sm:$0xff]  }
  0xa2   : > { %6790 = vmatprep.mubr.bf16.mxu0 %v7331_v55  ;;  %6819 = vmatpush3.bf16.msra.mxu0 %v7339_v9  ;;  %v680_v55 = vor.u32 %v679_v40, %v676_v47  ;;  %v672_v63 = vsel %vm7685_vm2, %v667_v53, %v671_v36  ;;  %v700_v9 = vrot.slane %v698_v0, 4  ;;  %v749_v46 = vshll.u32 %v568_v38, 16  ;;  %v7344_v40 = vld [vmem:[%s7610_s11 + $0x9c] sm:$0xff]   ;;  %v577_v38 = vld [vmem:[%s7610_s11 + $0x6c] sm:$0xf] }
  0xa3   : > { %v662_v52 = vsel %vm7685_vm2, %v657_v44, %v661_v31  ;;  %v690_v56 = vor.u32 %v689_v49, %v685_v48  ;;  %6820 = vmatprep.subr.bf16.mxu0 %v7343_v51  ;;  %v738_v42 = vor.u32 %v737_v33, %v733_v32  ;;  %v570_v44 = vld [vmem:[%s7610_s11 + $0x50] sm:$0x1] }
  0xa4   : > { %v5557_v3 = vcombine.low %v662_v52, %v672_v63  ;;  %v681_v5 = vrot.slane %v680_v55, 4  ;;  %v704_v20 = vor.u32 %v703_v10, %v700_v9  ;;  %v748_v52 = vrot.slane %v746_v45, 4 }
  0xa5   : > { %v751_v53 = vrot.slane %v749_v46, 5  ;;  %v783_v9 = vshrl.u32 %v572_v60, 16  ;;  %v789_v10 = vshll.u32 %v573_v1, 16  ;;  %v818_v45 = vshrl.u32 %v577_v38, 16 }
  0xa6   : > { %6821 = vmatpush3.bf16.msra.mxu0 %v7343_v51  ;;  %v705_v27 = vrot.slane %v704_v20, 4  ;;  %v739_v51 = vrot.slane %v738_v42, 4 }
  0xa7   : > { %6567 = vmatmul.mubr.bf16.gmra.mrb[28].mxu1 %v7332_v6  ;;  %v691_v6 = vrot.slane %v690_v56, 4  ;;  %6822 = vmatprep.subr.bf16.mxu0 %v7347_v30  ;;  %v752_v63 = vor.u32 %v751_v53, %v748_v52  ;;  %v785_v17 = vrot.slane %v783_v9, 4  ;;  %v791_v18 = vrot.slane %v789_v10, 5 }
  0xa8   : > { %6586 = vmatprep.mubr.bf16.mxu1 %v5555_v19  ;;  %v710_v35 = vsel %vm7685_vm2, %v705_v27, %v709_v11  ;;  %v820_v52 = vrot.slane %v818_v45, 4 }
  0xa9   : > { %6791 = vmatmul.mubr.bf16.gmra.mrb[12].mxu0 %v7334_v23  ;;  %v696_v14 = vsel %vm7685_vm2, %v691_v6, %v695_v54  ;;  %v714_v23 = vor.u32 %v713_v15, %v709_v11  ;;  %v765_v54 = vshll.u32 %v570_v44, 16  ;;  %v779_v6 = vshll.u32 %v572_v60, 16  ;;  %v7346_v11 = vld [vmem:[%s7610_s11 + $0xa8] sm:$0xff]   ;;  %v579_v44 = vld [vmem:[%s7610_s11 + $0x74] sm:$0x1] }
  0xaa   : > { %6794 = vmatprep.mubr.bf16.mxu0 %v7336_v28  ;;  %v727_v28 = vrot.slane %v725_v22, 5  ;;  %6823 = vmatpush3.bf16.msra.mxu0 %v7347_v30  ;;  %v753_v7 = vrot.slane %v752_v63, 4  ;;  %v575_v22 = vld [vmem:[%s7610_s11 + $0x64] sm:$0xf] }
  0xab   : > { %v715_v31 = vrot.slane %v714_v23, 4  ;;  %v767_v0 = vrot.slane %v765_v54, 5  ;;  %v576_v23 = vld [vmem:[%s7610_s11 + $0x68] sm:$0x1]  ;;  %v807_v29 = vshrl.u32 %v575_v22, 16  ;;  %v8012_v54 = vld [vmem:[%s8447_s1 + $0x200] sm:$0xff]  }
  0xac   : > { %v728_v36 = vor.u32 %v727_v28, %v724_v24  ;;  %v803_v28 = vshll.u32 %v575_v22, 16  ;;  %v813_v33 = vshll.u32 %v576_v23, 16  ;;  %v584_v22 = vld [vmem:[%s7610_s11 + $0x88] sm:$0xf] }
  0xad   : > { %v720_v41 = vsel %vm7685_vm2, %v715_v31, %v719_v21 }
  0xae   : > { %v5559_v47 = vcombine.low %v710_v35, %v720_v41  ;;  %v815_v42 = vrot.slane %v813_v33, 5  ;;  %v879_v33 = vshrl.u32 %v584_v22, 16 }
  0xaf   : > { %6587 = vmatmul.mubr.bf16.vlgmr.msra.gmra.mrb[0].mxu1 %v5556_v43  ;;  %v569_v43 = vld [vmem:[%s7610_s11 + $0x4c] sm:$0xf] }
  0xb0   : > { %6619 = vmatpush3.bf16.msra.mxu1 %v7915_v62  ;;  %6590 = vmatprep.mubr.bf16.mxu1 %v5557_v3  ;;  %v686_v62 = vsel %vm7685_vm2, %v681_v5, %v685_v48  ;;  %v729_v48 = vrot.slane %v728_v36, 4  ;;  %v755_v49 = vshll.u32 %v569_v43, 16  ;;  %v773_v5 = vshll.u32 %v571_v59, 16 }
  0xb1   : > { %6620 = vmatprep.subr.bf16.mxu1 %v7341_v50  ;;  %v5558_v19 = vcombine.low %v686_v62, %v696_v14  ;;  %6795 = vmatmul.mubr.bf16.gmra.mrb[16].mxu0 %v7338_v61  ;;  %v744_v61 = vsel %vm7685_vm2, %v739_v51, %v743_v37  ;;  %v781_v62 = vrot.slane %v779_v6, 5  ;;  %v7351_v14 = vld [vmem:[%s8447_s1 + $0x1f8] sm:$0xff]   ;;  %v805_v36 = vrot.slane %v803_v28, 5 }
  0xb2   : > { %6798 = vmatprep.mubr.bf16.mxu0 %v7340_v4  ;;  %v734_v55 = vsel %vm7685_vm2, %v729_v48, %v733_v32  ;;  %v757_v56 = vrot.slane %v755_v49, 5  ;;  %v775_v13 = vrot.slane %v773_v5, 5  ;;  %6824 = vmatprep.subr.bf16.mxu0 %v7351_v14  ;;  %v809_v37 = vrot.slane %v807_v29, 4  ;;  %v7357_v5 = vld [vmem:[%s8447_s1 + $0xe8] sm:$0xff]  }
  0xb3   : > { %v5560_v3 = vcombine.low %v734_v55, %v744_v61  ;;  %v786_v27 = vor.u32 %v785_v17, %v781_v62  ;;  %6825 = vmatpush3.bf16.msra.mxu0 %v7351_v14  ;;  %v837_v59 = vshll.u32 %v579_v44, 16  ;;  %v7352_v61 = vld [vmem:[%s7610_s11 + $0xd8] sm:$0xff]   ;;  %v583_v17 = vld [vmem:[%s7610_s11 + $0x84] sm:$0xf] }
  0xb4   : > { %6621 = vmatpush3.bf16.msra.mxu1 %v7341_v50  ;;  %v759_v50 = vshrl.u32 %v569_v43, 16  ;;  %v758_v15 = vsel %vm7685_vm2, %v753_v7, %v757_v56  ;;  %v578_v43 = vld [vmem:[%s7610_s11 + $0x70] sm:$0xf]  ;;  %6858 = vmatprep.subr.bf16.mxu0 %v8012_v54  ;;  %v869_v28 = vshll.u32 %v583_v17, 16 }
  0xb5   : > { %6622 = vmatprep.subr.bf16.mxu1 %v7345_v8  ;;  %v787_v35 = vrot.slane %v786_v27, 4  ;;  %v827_v48 = vshll.u32 %v578_v43, 16  ;;  %v831_v53 = vshrl.u32 %v578_v43, 16  ;;  %v866_v27 = vshrl.u32 %v583_v17, 16 }
  0xb6   : > { %v761_v57 = vrot.slane %v759_v50, 4  ;;  %v7350_v50 = vld [vmem:[%s7610_s11 + $0xc0] sm:$0xff]  }
  0xb7   : > { %6591 = vmatmul.mubr.bf16.gmra.mrb[4].mxu1 %v5558_v19  ;;  %v574_v19 = vld [vmem:[%s7610_s11 + $0x60] sm:$0xf]  ;;  %v792_v46 = vsel %vm7685_vm2, %v787_v35, %v791_v18  ;;  %v833_v63 = vrot.slane %v831_v53, 4  ;;  %v868_v35 = vrot.slane %v866_v27, 4 }
  0xb8   : > { %6623 = vmatpush3.bf16.msra.mxu1 %v7345_v8  ;;  %6594 = vmatprep.mubr.bf16.mxu1 %v5559_v47  ;;  %v762_v4 = vor.u32 %v761_v57, %v757_v56  ;;  %v772_v8 = vrot.slane %v770_v2, 4  ;;  %v794_v24 = vshrl.u32 %v574_v19, 16  ;;  %v797_v25 = vshll.u32 %v574_v19, 16 }
  0xb9   : > { %6624 = vmatprep.subr.bf16.mxu1 %v7349_v39  ;;  %6799 = vmatmul.mubr.bf16.gmra.mrb[20].mxu0 %v7342_v34  ;;  %v7353_v34 = vld [vmem:[%s8447_s1 + $0xe0] sm:$0xff]   ;;  %v810_v47 = vor.u32 %v809_v37, %v805_v36  ;;  %v829_v57 = vrot.slane %v827_v48, 5  ;;  %v839_v2 = vrot.slane %v837_v59, 5 }
  0xba   : > { %6802 = vmatprep.mubr.bf16.mxu0 %v7344_v40  ;;  %v763_v12 = vrot.slane %v762_v4, 4  ;;  %v776_v21 = vor.u32 %v775_v13, %v772_v8  ;;  %v796_v31 = vrot.slane %v794_v24, 4  ;;  %v799_v32 = vrot.slane %v797_v25, 5  ;;  %v581_v4 = vld [vmem:[%s7610_s11 + $0x7c] sm:$0xf]  ;;  %v7354_v24 = vld [vmem:[%s7610_s11 + $0xe4] sm:$0xff]  }
  0xbb   : > { %v821_v40 = vshll.u32 %v577_v38, 16  ;;  %v811_v55 = vrot.slane %v810_v47, 4  ;;  %v834_v7 = vor.u32 %v833_v63, %v829_v57  ;;  %v582_v8 = vld [vmem:[%s7610_s11 + $0x80] sm:$0x1]  ;;  %v855_v13 = vshrl.u32 %v581_v4, 16  ;;  %v7361_v47 = vld [vmem:[%s8447_s1 + $0xf0] sm:$0xff]  }
  0xbc   : > { %6625 = vmatpush3.bf16.msra.mxu1 %v7349_v39  ;;  %v768_v20 = vsel %vm7685_vm2, %v763_v12, %v767_v0  ;;  %v777_v30 = vrot.slane %v776_v21, 4  ;;  %v800_v41 = vor.u32 %v799_v32, %v796_v31  ;;  %v851_v12 = vshll.u32 %v581_v4, 16  ;;  %v7356_v31 = vld [vmem:[%s7610_s11 + $0xf0] sm:$0xff]   ;;  %v589_v4 = vld [vmem:[%s7610_s11 + $0x9c] sm:$0xf] }
  0xbd   : > { %v5561_v26 = vcombine.low %v758_v15, %v768_v20  ;;  %6626 = vmatprep.subr.bf16.mxu1 %v7353_v34  ;;  %v823_v56 = vrot.slane %v821_v40, 5  ;;  %v816_v0 = vsel %vm7685_vm2, %v811_v55, %v815_v42  ;;  %v835_v14 = vrot.slane %v834_v7, 4  ;;  %v7359_v42 = vld [vmem:[%s8447_s1 + $0x208] sm:$0xff]  }
  0xbe   : > { %v782_v39 = vsel %vm7685_vm2, %v777_v30, %v781_v62  ;;  %v801_v51 = vrot.slane %v800_v41, 4  ;;  %v861_v62 = vshll.u32 %v582_v8, 16  ;;  %v853_v19 = vrot.slane %v851_v12, 5  ;;  %v7360_v8 = vld [vmem:[%s7610_s11 + $0x108] sm:$0xff]  }
  0xbf   : > { %6595 = vmatmul.mubr.bf16.gmra.mrb[8].mxu1 %v5560_v3  ;;  %v5562_v49 = vcombine.low %v782_v39, %v792_v46  ;;  %v824_v1 = vor.u32 %v823_v56, %v820_v52  ;;  %v580_v3 = vld [vmem:[%s7610_s11 + $0x78] sm:$0xf]  ;;  %v857_v20 = vrot.slane %v855_v13, 4  ;;  %v840_v23 = vsel %vm7685_vm2, %v835_v14, %v839_v2  ;;  %v586_v46 = vld [vmem:[%s7610_s11 + $0x90] sm:$0xf] }
  0xc0   : > { %6598 = vmatprep.mubr.bf16.mxu1 %v5561_v26  ;;  %6627 = vmatpush3.bf16.msra.mxu1 %v7353_v34  ;;  %v806_v60 = vsel %vm7685_vm2, %v801_v51, %v805_v36  ;;  %v842_v9 = vshrl.u32 %v580_v3, 16  ;;  %v845_v10 = vshll.u32 %v580_v3, 16  ;;  %v863_v21 = vrot.slane %v861_v62, 5  ;;  %v585_v26 = vld [vmem:[%s7610_s11 + $0x8c] sm:$0x1] }
  0xc1   : > { %6803 = vmatmul.mubr.bf16.gmra.mrb[24].mxu0 %v7346_v11  ;;  %v5563_v6 = vcombine.low %v806_v60, %v816_v0  ;;  %v825_v11 = vrot.slane %v824_v1, 4  ;;  %6628 = vmatprep.subr.bf16.mxu1 %v7357_v5  ;;  %v858_v30 = vor.u32 %v857_v20, %v853_v19  ;;  %v875_v32 = vshll.u32 %v584_v22, 16  ;;  %v7358_v1 = vld [vmem:[%s7610_s11 + $0xfc] sm:$0xff]  }
  0xc2   : > { %6806 = vmatprep.mubr.bf16.mxu0 %v7348_v16  ;;  %v844_v15 = vrot.slane %v842_v9, 4  ;;  %v847_v16 = vrot.slane %v845_v10, 5  ;;  %v871_v36 = vrot.slane %v869_v28, 5  ;;  %v885_v37 = vshll.u32 %v585_v26, 16  ;;  %v591_v9 = vld [vmem:[%s7610_s11 + $0xa4] sm:$0x1] }
  0xc3   : > { %v830_v18 = vsel %vm7685_vm2, %v825_v11, %v829_v57  ;;  %v859_v38 = vrot.slane %v858_v30, 4  ;;  %v877_v39 = vrot.slane %v875_v32, 5  ;;  %v881_v41 = vrot.slane %v879_v33, 4  ;;  %v593_v28 = vld [vmem:[%s7610_s11 + $0xac] sm:$0xf] }
  0xc4   : > { %6629 = vmatpush3.bf16.msra.mxu1 %v7357_v5  ;;  %v848_v25 = vor.u32 %v847_v16, %v844_v15  ;;  %v5564_v29 = vcombine.low %v830_v18, %v840_v23  ;;  %v872_v44 = vor.u32 %v871_v36, %v868_v35  ;;  %v887_v45 = vrot.slane %v885_v37, 5  ;;  %v590_v5 = vld [vmem:[%s7610_s11 + $0xa0] sm:$0xf]  ;;  %v7362_v37 = vld [vmem:[%s7610_s11 + $0x114] sm:$0xff]  }
  0xc5   : > { %v864_v40 = vsel %vm7685_vm2, %v859_v38, %v863_v21  ;;  %v882_v48 = vor.u32 %v881_v41, %v877_v39  ;;  %v890_v51 = vshrl.u32 %v586_v46, 16  ;;  %v893_v52 = vshll.u32 %v586_v46, 16  ;;  %6630 = vmatprep.subr.bf16.mxu1 %v7361_v47  ;;  %v7363_v21 = vld [vmem:[%s8447_s1 + $0x210] sm:$0xff]   ;;  %v7364_v46 = vld [vmem:[%s7610_s11 + $0x120] sm:$0xff]  }
  0xc6   : > { %v849_v34 = vrot.slane %v848_v25, 4  ;;  %v873_v55 = vrot.slane %v872_v44, 4  ;;  %v914_v10 = vshrl.u32 %v589_v4, 16  ;;  %v917_v13 = vshll.u32 %v589_v4, 16  ;;  %v592_v25 = vld [vmem:[%s7610_s11 + $0xa8] sm:$0xf] }
  0xc7   : > { %6599 = vmatmul.mubr.bf16.gmra.mrb[12].mxu1 %v5562_v49  ;;  %v587_v49 = vld [vmem:[%s7610_s11 + $0x94] sm:$0xf]  ;;  %v883_v59 = vrot.slane %v882_v48, 4  ;;  %v892_v60 = vrot.slane %v890_v51, 4  ;;  %v923_v62 = vshll.u32 %v590_v5, 16  ;;  %v927_v16 = vshrl.u32 %v590_v5, 16 }
  0xc8   : > { %6602 = vmatprep.mubr.bf16.mxu1 %v5563_v6  ;;  %v854_v43 = vsel %vm7685_vm2, %v849_v34, %v853_v19  ;;  %v899_v56 = vshll.u32 %v587_v49, 16  ;;  %v903_v57 = vshrl.u32 %v587_v49, 16  ;;  %v878_v0 = vsel %vm7685_vm2, %v873_v55, %v877_v39  ;;  %6631 = vmatpush3.bf16.msra.mxu1 %v7361_v47  ;;  %v595_v47 = vld [vmem:[%s7610_s11 + $0xb4] sm:$0xf]  ;;  %v597_v51 = vld [vmem:[%s7610_s11 + $0xbc] sm:$0x1] }
  0xc9   : > { %6807 = vmatmul.mubr.bf16.gmra.mrb[28].mxu0 %v7350_v50  ;;  %v588_v50 = vld [vmem:[%s7610_s11 + $0x98] sm:$0x1]  ;;  %v5565_v53 = vcombine.low %v854_v43, %v864_v40  ;;  %v916_v15 = vrot.slane %v914_v10, 4  ;;  %v933_v17 = vshll.u32 %v591_v9, 16  ;;  %v919_v19 = vrot.slane %v917_v13, 5  ;;  %v7366_v13 = vld [vmem:[%s7610_s11 + $0x12c] sm:$0xff]  }
  0xca   : > { %6826 = vmatprep.mubr.bf16.mxu0 %v7352_v61  ;;  %v895_v61 = vrot.slane %v893_v52, 5  ;;  %v909_v63 = vshll.u32 %v588_v50, 16  ;;  %v901_v2 = vrot.slane %v899_v56, 5  ;;  %v905_v3 = vrot.slane %v903_v57, 4  ;;  %v596_v50 = vld [vmem:[%s7610_s11 + $0xb8] sm:$0xf] }
  0xcb   : > { %v925_v20 = vrot.slane %v923_v62, 5  ;;  %v929_v23 = vrot.slane %v927_v16, 4  ;;  %v920_v27 = vor.u32 %v919_v19, %v916_v15  ;;  %v938_v30 = vshrl.u32 %v592_v25, 16  ;;  %v7372_v16 = vld [vmem:[%s8447_s1 + $0x220] sm:$0xff]  }
  0xcc   : > { %v896_v6 = vor.u32 %v895_v61, %v892_v60  ;;  %v911_v7 = vrot.slane %v909_v63, 5  ;;  %v906_v12 = vor.u32 %v905_v3, %v901_v2  ;;  %v947_v34 = vshll.u32 %v593_v28, 16 }
  0xcd   : > { %v930_v33 = vor.u32 %v929_v23, %v925_v20  ;;  %v951_v35 = vshrl.u32 %v593_v28, 16  ;;  %v921_v36 = vrot.slane %v920_v27, 4  ;;  %v940_v38 = vrot.slane %v938_v30, 4  ;;  %v7374_v23 = vld [vmem:[%s7610_s11 + $0x150] sm:$0xff]   ;;  %v7405_v27 = vld [vmem:[%s8447_s1 + $0x108] sm:$0xff]   ;;  %v7376_v28 = vld [vmem:[%s7610_s11 + $0x15c] sm:$0xff]  }
  0xce   : > { %v897_v14 = vrot.slane %v896_v6, 4  ;;  %v907_v18 = vrot.slane %v906_v12, 4  ;;  %v949_v44 = vrot.slane %v947_v34, 5  ;;  %v962_v52 = vshrl.u32 %v595_v47, 16  ;;  %v7387_v30 = vld [vmem:[%s8447_s1 + $0x238] sm:$0xff]  }
  0xcf   : > { %6603 = vmatmul.mubr.bf16.gmra.mrb[16].mxu1 %v5564_v29  ;;  %v594_v29 = vld [vmem:[%s7610_s11 + $0xb0] sm:$0x1]  ;;  %v931_v43 = vrot.slane %v930_v33, 4  ;;  %v926_v40 = vsel %vm7685_vm2, %v921_v36, %v925_v20  ;;  %v965_v56 = vshll.u32 %v595_v47, 16  ;;  %v971_v57 = vshll.u32 %v596_v50, 16  ;;  %v7377_v20 = vld [vmem:[%s8447_s1 + $0x228] sm:$0xff]  }
  0xd0   : > { %6606 = vmatprep.mubr.bf16.mxu1 %v5565_v53  ;;  %v902_v22 = vsel %vm7685_vm2, %v897_v14, %v901_v2  ;;  %v912_v26 = vsel %vm7685_vm2, %v907_v18, %v911_v7  ;;  %v957_v41 = vshll.u32 %v594_v29, 16  ;;  %v964_v61 = vrot.slane %v962_v52, 4  ;;  %v7369_v14 = vld [vmem:[%s7610_s11 + $0x138] sm:$0xff]   ;;  %v7378_v29 = vld [vmem:[%s7610_s11 + $0x1c8] sm:$0xff]   ;;  %v5828_v33 = vld [vmem:[%s7610_s11 + $0x10] sm:$0xf] }
  0xd1   : > { %6827 = vmatmul.mubr.bf16.vlgmr.msra.gmra.mrb[0].mxu0 %v7354_v24  ;;  %v935_v24 = vrot.slane %v933_v17, 5  ;;  %v5567_v32 = vcombine.low %v902_v22, %v912_v26  ;;  %v975_v63 = vshrl.u32 %v596_v50, 16  ;;  %v967_v3 = vrot.slane %v965_v56, 5  ;;  %v7368_v18 = vld [vmem:[%s7610_s11 + $0x198] sm:$0xff]   ;;  %v7371_v22 = vld [vmem:[%s7610_s11 + $0x144] sm:$0xff]  }
  0xd2   : > { %6859 = vmatpush3.bf16.msra.mxu0 %v8012_v54  ;;  %6830 = vmatprep.mubr.bf16.mxu0 %v7356_v31  ;;  %v888_v54 = vsel %vm7685_vm2, %v883_v59, %v887_v45  ;;  %v941_v31 = vshll.u32 %v592_v25, 16  ;;  %v953_v45 = vrot.slane %v951_v35, 4  ;;  %v959_v49 = vrot.slane %v957_v41, 5  ;;  %v7382_v25 = vld [vmem:[%s8447_s1 + $0x230] sm:$0xff]   ;;  %v7375_v26 = vld [vmem:[%s7610_s11 + $0x1bc] sm:$0xff]  }
  0xd3   : > { %6860 = vmatprep.subr.bf16.mxu0 %v7359_v42  ;;  %v5566_v11 = vcombine.low %v878_v0, %v888_v54  ;;  %v936_v53 = vsel %vm7685_vm2, %v931_v43, %v935_v24  ;;  %v7367_v0 = vld [vmem:[%s8447_s1 + $0x218] sm:$0xff]   ;;  %v973_v4 = vrot.slane %v971_v57, 5  ;;  %v981_v5 = vshll.u32 %v597_v51, 16  ;;  %v7373_v24 = vld [vmem:[%s7610_s11 + $0x1b0] sm:$0xff]   ;;  %v5832_v51 = vld [vmem:[%s7610_s11 + $0x20] sm:$0x1] }
  0xd4   : > { %v943_v39 = vrot.slane %v941_v31, 5  ;;  %v954_v55 = vor.u32 %v953_v45, %v949_v44  ;;  %v5568_v59 = vcombine.low %v926_v40, %v936_v53  ;;  %v977_v6 = vrot.slane %v975_v63, 4  ;;  %v7379_v31 = vld [vmem:[%s7610_s11 + $0x168] sm:$0xff]   ;;  %v5829_v34 = vld [vmem:[%s7610_s11 + $0x14] sm:$0x1]  ;;  %v7384_v57 = vld [vmem:[%s7610_s11 + $0x180] sm:$0xff]  }
  0xd5   : > { %v983_v9 = vrot.slane %v981_v5, 5  ;;  %v2231_v41 = vshll.u32 %v5829_v34, 16  ;;  %v5831_v40 = vld [vmem:[%s7610_s11 + $0x1c] sm:$0xf]  ;;  %v7380_v56 = vld [vmem:[%s7610_s11 + $0x1d4] sm:$0xff]   ;;  %v2255_v63 = vshll.u32 %v5832_v51, 16 }
  0xd6   : > { %6861 = vmatpush3.bf16.msra.mxu0 %v7359_v42  ;;  %v7365_v42 = vld [vmem:[%s8447_s1 + $0xf8] sm:$0xff]   ;;  %v944_v48 = vor.u32 %v943_v39, %v940_v38  ;;  %v955_v2 = vrot.slane %v954_v55, 4  ;;  %v2221_v38 = vshll.u32 %v5828_v33, 16  ;;  %v2225_v39 = vshrl.u32 %v5828_v33, 16  ;;  %v7386_v33 = vld [vmem:[%s7610_s11 + $0x18c] sm:$0xff]  }
  0xd7   : > { %6607 = vmatmul.mubr.bf16.gmra.mrb[20].mxu1 %v5566_v11  ;;  %6862 = vmatprep.subr.bf16.mxu0 %v7363_v21  ;;  %v978_v11 = vor.u32 %v977_v6, %v973_v4  ;;  %v2233_v47 = vrot.slane %v2231_v41, 5  ;;  %v2245_v53 = vshll.u32 %v5831_v40, 16  ;;  %v2249_v55 = vshrl.u32 %v5831_v40, 16  ;;  %v5834_v6 = vld [vmem:[%s7610_s11 + $0x28] sm:$0xf] }
  0xd8   : > { %6610 = vmatprep.mubr.bf16.mxu1 %v5567_v32  ;;  %6632 = vmatprep.subr.bf16.mxu1 %v7365_v42  ;;  %v945_v60 = vrot.slane %v944_v48, 4  ;;  %v960_v7 = vsel %vm7685_vm2, %v955_v2, %v959_v49  ;;  %v5827_v32 = vld [vmem:[%s7610_s11 + $0xc] sm:$0xf]  ;;  %v2223_v45 = vrot.slane %v2221_v38, 5  ;;  %v7381_v49 = vld [vmem:[%s7610_s11 + $0x174] sm:$0xff]  }
  0xd9   : > { %6831 = vmatmul.mubr.bf16.gmra.mrb[4].mxu0 %v7358_v1  ;;  %6633 = vmatpush3.bf16.msra.mxu1 %v7365_v42  ;;  %v7404_v1 = vld [vmem:[%s8447_s1 + $0x100] sm:$0xff]   ;;  %v979_v62 = vrot.slane %v978_v11, 4  ;;  %v2212_v35 = vshrl.u32 %v5827_v32, 16  ;;  %v2215_v36 = vshll.u32 %v5827_v32, 16  ;;  %v2247_v2 = vrot.slane %v2245_v53, 5  ;;  %v7385_v32 = vld [vmem:[%s7610_s11 + $0x1ec] sm:$0xff]  }
  0xda   : > { %6834 = vmatprep.mubr.bf16.mxu0 %v7360_v8  ;;  %6863 = vmatpush3.bf16.msra.mxu0 %v7363_v21  ;;  %v950_v54 = vsel %vm7685_vm2, %v945_v60, %v949_v44  ;;  %v968_v8 = vor.u32 %v967_v3, %v964_v61  ;;  %v7370_v21 = vld [vmem:[%s7610_s11 + $0x1a4] sm:$0xff]   ;;  %v5830_v44 = vld [vmem:[%s7610_s11 + $0x18] sm:$0xf]  ;;  %v2251_v3 = vrot.slane %v2249_v55, 4 }
  0xdb   : > { %6906 = vmatprep.subr.bf16.mxu1 %v7404_v1  ;;  %6864 = vmatprep.subr.bf16.mxu0 %v7367_v0  ;;  %v5569_v10 = vcombine.low %v950_v54, %v960_v7  ;;  %v984_v17 = vsel %vm7685_vm2, %v979_v62, %v983_v9  ;;  %v2214_v42 = vrot.slane %v2212_v35, 4  ;;  %v2217_v43 = vrot.slane %v2215_v36, 5  ;;  %v5835_v7 = vld [vmem:[%s7610_s11 + $0x2c] sm:$0x1]  ;;  %v7408_v62 = vld [vmem:[%s8447_s1 + $0x120] sm:$0xff]  }
  0xdc   : > { %v969_v12 = vrot.slane %v968_v8, 4  ;;  %v2236_v48 = vshrl.u32 %v5830_v44, 16  ;;  %v2239_v52 = vshll.u32 %v5830_v44, 16  ;;  %v2257_v54 = vrot.slane %v2255_v63, 5  ;;  %v7383_v8 = vld [vmem:[%s7610_s11 + $0x1e0] sm:$0xff]   ;;  %v7409_v38 = vld [vmem:[%s8447_s1 + $0x128] sm:$0xff]  }
  0xdd   : > { %v2218_v50 = vor.u32 %v2217_v43, %v2214_v42  ;;  %v2252_v11 = vor.u32 %v2251_v3, %v2247_v2  ;;  %v5842_v63 = vld [vmem:[%s7610_s11 + $0x48] sm:$0xf] }
  0xde   : > { %6865 = vmatpush3.bf16.msra.mxu0 %v7367_v0  ;;  %v974_v15 = vsel %vm7685_vm2, %v969_v12, %v973_v4  ;;  %v2238_v61 = vrot.slane %v2236_v48, 4  ;;  %v5833_v4 = vld [vmem:[%s7610_s11 + $0x24] sm:$0xf] }
  0xdf   : > { %6611 = vmatmul.mubr.bf16.gmra.mrb[24].mxu1 %v5568_v59  ;;  %v5570_v19 = vcombine.low %v974_v15, %v984_v17  ;;  %6866 = vmatprep.subr.bf16.mxu0 %v7372_v16  ;;  %v7407_v59 = vld [vmem:[%s8447_s1 + $0x118] sm:$0xff]   ;;  %v2219_v0 = vrot.slane %v2218_v50, 4  ;;  %v2260_v12 = vshrl.u32 %v5833_v4, 16  ;;  %v2269_v15 = vshll.u32 %v5834_v6, 16  ;;  %v5836_v17 = vld [vmem:[%s7610_s11 + $0x30] sm:$0xf] }
  0xe0   : > { %6614 = vmatprep.mubr.bf16.mxu1 %v5569_v10  ;;  %v7388_v50 = vld [vmem:[%s7610_s11 + $0x1f8] sm:$0xff]  }
  0xe1   : > { %6835 = vmatmul.mubr.bf16.gmra.mrb[8].mxu0 %v7362_v37  ;;  %v7406_v37 = vld [vmem:[%s8447_s1 + $0x110] sm:$0xff]   ;;  %v2224_v9 = vsel %vm7685_vm2, %v2219_v0, %v2223_v45 }
  0xe2   : > { %6838 = vmatprep.mubr.bf16.mxu0 %v7364_v46  ;;  %6867 = vmatpush3.bf16.msra.mxu0 %v7372_v16  ;;  %v2227_v46 = vrot.slane %v2225_v39, 4  ;;  %v2273_v16 = vshrl.u32 %v5834_v6, 16  ;;  %v5839_v39 = vld [vmem:[%s7610_s11 + $0x3c] sm:$0xf] }
  0xe3   : > { %6868 = vmatprep.subr.bf16.mxu0 %v7377_v20  ;;  %v2311_v55 = vshll.u32 %v5839_v39, 16 }
  0xe4   : > { %v2228_v60 = vor.u32 %v2227_v46, %v2223_v45  ;;  %v5840_v45 = vld [vmem:[%s7610_s11 + $0x40] sm:$0xf]  ;;  %v5841_v46 = vld [vmem:[%s7610_s11 + $0x44] sm:$0x1] }
  0xe5   : > { %v2313_v3 = vrot.slane %v2311_v55, 5  ;;  %v2327_v6 = vshll.u32 %v5841_v46, 16 }
  0xe6   : > { %6869 = vmatpush3.bf16.msra.mxu0 %v7377_v20  ;;  %v2229_v5 = vrot.slane %v2228_v60, 4  ;;  %v2253_v20 = vrot.slane %v2252_v11, 4  ;;  %v5844_v11 = vld [vmem:[%s7610_s11 + $0x50] sm:$0x1] }
  0xe7   : > { %6615 = vmatmul.mubr.bf16.gmra.mrb[28].mxu1 %v5570_v19  ;;  %6870 = vmatprep.subr.bf16.mxu0 %v7382_v25 }
  0xe8   : > { %6634 = vmatprep.mubr.bf16.mxu1 %v7368_v18 }
  0xe9   : > { %6839 = vmatmul.mubr.bf16.gmra.mrb[12].mxu0 %v7366_v13  ;;  %v2234_v13 = vsel %vm7685_vm2, %v2229_v5, %v2233_v47  ;;  %v2317_v5 = vshll.u32 %v5840_v45, 16 }
  0xea   : > { %6842 = vmatprep.mubr.bf16.mxu0 %v7369_v14  ;;  %6871 = vmatpush3.bf16.msra.mxu0 %v7382_v25  ;;  %v2263_v14 = vshll.u32 %v5833_v4, 16  ;;  %v5875_v18 = vcombine.low %v2224_v9, %v2234_v13  ;;  %v2275_v25 = vrot.slane %v2273_v16, 4  ;;  %v5843_v4 = vld [vmem:[%s7610_s11 + $0x4c] sm:$0xf]  ;;  %v7389_v13 = vld [vmem:[%s7610_s11 + $0x204] sm:$0xff]  }
  0xeb   : > { %6872 = vmatprep.subr.bf16.mxu0 %v7387_v30 }
  0xee   : > { %6873 = vmatpush3.bf16.msra.mxu0 %v7387_v30  ;;  %v2284_v30 = vshrl.u32 %v5836_v17, 16 }
  0xef   : > { %6635 = vmatmul.mubr.bf16.vlgmr.msra.gmra.mrb[0].mxu1 %v7370_v21  ;;  %v2262_v21 = vrot.slane %v2260_v12, 4  ;;  %v2335_v12 = vshll.u32 %v5842_v63, 16 }
  0xf0   : > { %6914 = vmatpush3.bf16.msra.mxu1 %v7404_v1  ;;  %6638 = vmatprep.mubr.bf16.mxu1 %v7373_v24  ;;  %v2241_v1 = vrot.slane %v2239_v52, 5  ;;  %v2271_v24 = vrot.slane %v2269_v15, 5  ;;  %v2286_v41 = vrot.slane %v2284_v30, 4  ;;  %v2329_v15 = vrot.slane %v2327_v6, 5  ;;  %v7392_v6 = vld [vmem:[%s7610_s11 + $0x228] sm:$0xff]  }
  0xf1   : > { %6843 = vmatmul.mubr.bf16.gmra.mrb[16].mxu0 %v7371_v22  ;;  %6907 = vmatprep.subr.bf16.mxu1 %v7405_v27  ;;  %v5837_v22 = vld [vmem:[%s7610_s11 + $0x34] sm:$0xf] }
  0xf2   : > { %6846 = vmatprep.mubr.bf16.mxu0 %v7374_v23  ;;  %v2242_v10 = vor.u32 %v2241_v1, %v2238_v61  ;;  %v2265_v23 = vrot.slane %v2263_v14, 5  ;;  %v2276_v36 = vor.u32 %v2275_v25, %v2271_v24  ;;  %v2293_v43 = vshll.u32 %v5837_v22, 16  ;;  %v7410_v61 = vld [vmem:[%s8447_s1 + $0x130] sm:$0xff]  }
  0xf3   : > { %v2297_v44 = vshrl.u32 %v5837_v22, 16  ;;  %v2337_v22 = vrot.slane %v2335_v12, 5 }
  0xf4   : > { %6915 = vmatpush3.bf16.msra.mxu1 %v7405_v27  ;;  %v2243_v19 = vrot.slane %v2242_v10, 4  ;;  %v5838_v27 = vld [vmem:[%s7610_s11 + $0x38] sm:$0x1]  ;;  %v2266_v35 = vor.u32 %v2265_v23, %v2262_v21  ;;  %v2277_v40 = vrot.slane %v2276_v36, 4  ;;  %v2295_v52 = vrot.slane %v2293_v43, 5 }
  0xf5   : > { %6908 = vmatprep.subr.bf16.mxu1 %v7406_v37  ;;  %v2303_v48 = vshll.u32 %v5838_v27, 16  ;;  %v2299_v53 = vrot.slane %v2297_v44, 4  ;;  %v2341_v23 = vshll.u32 %v5843_v4, 16  ;;  %v2351_v27 = vshll.u32 %v5844_v11, 16 }
  0xf6   : > { %v2267_v47 = vrot.slane %v2266_v35, 4  ;;  %v5848_v35 = vld [vmem:[%s7610_s11 + $0x60] sm:$0xf] }
  0xf7   : > { %6639 = vmatmul.mubr.bf16.gmra.mrb[4].mxu1 %v7375_v26  ;;  %v2279_v26 = vshll.u32 %v5835_v7, 16  ;;  %v2332_v7 = vshrl.u32 %v5842_v63, 16 }
  0xf8   : > { %6642 = vmatprep.mubr.bf16.mxu1 %v7378_v29  ;;  %6916 = vmatpush3.bf16.msra.mxu1 %v7406_v37  ;;  %v2258_v29 = vsel %vm7685_vm2, %v2253_v20, %v2257_v54  ;;  %v2321_v54 = vshrl.u32 %v5840_v45, 16 }
  0xf9   : > { %6847 = vmatmul.mubr.bf16.gmra.mrb[20].mxu0 %v7376_v28  ;;  %6909 = vmatprep.subr.bf16.mxu1 %v7407_v59  ;;  %v2248_v28 = vsel %vm7685_vm2, %v2243_v19, %v2247_v2  ;;  %v2281_v37 = vrot.slane %v2279_v26, 5  ;;  %v2300_v2 = vor.u32 %v2299_v53, %v2295_v52  ;;  %v2334_v16 = vrot.slane %v2332_v7, 4  ;;  %v7390_v19 = vld [vmem:[%s7610_s11 + $0x210] sm:$0xff]  }
  0xfa   : > { %6850 = vmatprep.mubr.bf16.mxu0 %v7379_v31  ;;  %v2287_v31 = vshll.u32 %v5836_v17, 16  ;;  %v8155_v34 = vcombine.low %v2248_v28, %v2258_v29  ;;  %v2323_v14 = vrot.slane %v2321_v54, 4  ;;  %v5845_v17 = vld [vmem:[%s7610_s11 + $0x54] sm:$0xf]  ;;  %v2345_v26 = vshrl.u32 %v5843_v4, 16 }
  0xfb   : > { %v2301_v9 = vrot.slane %v2300_v2, 4  ;;  %v5846_v28 = vld [vmem:[%s7610_s11 + $0x58] sm:$0xf]  ;;  %v2338_v30 = vor.u32 %v2337_v22, %v2334_v16  ;;  %v5852_v54 = vld [vmem:[%s7610_s11 + $0x70] sm:$0xf] }
  0xfc   : > { %6917 = vmatpush3.bf16.msra.mxu1 %v7407_v59  ;;  %v2289_v42 = vrot.slane %v2287_v31, 5  ;;  %v2305_v59 = vrot.slane %v2303_v48, 5  ;;  %v2343_v31 = vrot.slane %v2341_v23, 5  ;;  %v2365_v43 = vshll.u32 %v5846_v28, 16  ;;  %v5849_v48 = vld [vmem:[%s7610_s11 + $0x64] sm:$0xf] }
  0xfd   : > { %6910 = vmatprep.subr.bf16.mxu1 %v7408_v62  ;;  %v2369_v44 = vshrl.u32 %v5846_v28, 16  ;;  %v2393_v63 = vshrl.u32 %v5849_v48, 16  ;;  %v2417_v22 = vshrl.u32 %v5852_v54, 16  ;;  %v5855_v23 = vld [vmem:[%s7610_s11 + $0x7c] sm:$0xf] }
  0xfe   : > { %v2290_v51 = vor.u32 %v2289_v42, %v2286_v41  ;;  %v2306_v20 = vsel %vm7685_vm2, %v2301_v9, %v2305_v59  ;;  %v2339_v41 = vrot.slane %v2338_v30, 4  ;;  %v5856_v28 = vld [vmem:[%s7610_s11 + $0x80] sm:$0x1] }
  0xff   : > { %6643 = vmatmul.mubr.bf16.gmra.mrb[8].mxu1 %v7380_v56  ;;  %v2272_v56 = vsel %vm7685_vm2, %v2267_v47, %v2271_v24  ;;  %v2419_v30 = vrot.slane %v2417_v22, 4 }
 0x100   : > { %6646 = vmatprep.mubr.bf16.mxu1 %v7383_v8  ;;  %6918 = vmatpush3.bf16.msra.mxu1 %v7408_v62  ;;  %v2291_v1 = vrot.slane %v2290_v51, 4  ;;  %v2319_v62 = vrot.slane %v2317_v5, 5  ;;  %v2371_v51 = vrot.slane %v2369_v44, 4 }
 0x101   : > { %6851 = vmatmul.mubr.bf16.gmra.mrb[24].mxu0 %v7381_v49  ;;  %6911 = vmatprep.subr.bf16.mxu1 %v7409_v38  ;;  %v2308_v49 = vshrl.u32 %v5839_v39, 16  ;;  %v2359_v39 = vshll.u32 %v5845_v17, 16 }
 0x102   : > { %6854 = vmatprep.mubr.bf16.mxu0 %v7384_v57  ;;  %v2282_v57 = vsel %vm7685_vm2, %v2277_v40, %v2281_v37  ;;  %v2296_v8 = vsel %vm7685_vm2, %v2291_v1, %v2295_v52  ;;  %v2324_v25 = vor.u32 %v2323_v14, %v2319_v62  ;;  %v2347_v37 = vrot.slane %v2345_v26, 4  ;;  %v5850_v52 = vld [vmem:[%s7610_s11 + $0x68] sm:$0x1]  ;;  %v7391_v1 = vld [vmem:[%s7610_s11 + $0x21c] sm:$0xff]   ;;  %v5854_v14 = vld [vmem:[%s7610_s11 + $0x78] sm:$0xf] }
 0x103   : > { %v2310_v60 = vrot.slane %v2308_v49, 4  ;;  %v5877_v0 = vcombine.low %v2272_v56, %v2282_v57  ;;  %v5878_v24 = vcombine.low %v2296_v8, %v2306_v20  ;;  %v2361_v47 = vrot.slane %v2359_v39, 5  ;;  %v5858_v39 = vld [vmem:[%s7610_s11 + $0x88] sm:$0xf] }
 0x104   : > { %6919 = vmatpush3.bf16.msra.mxu1 %v7409_v38  ;;  %v2325_v36 = vrot.slane %v2324_v25, 4  ;;  %v2353_v38 = vrot.slane %v2351_v27, 5  ;;  %v2348_v46 = vor.u32 %v2347_v37, %v2343_v31  ;;  %v2380_v57 = vshrl.u32 %v5848_v35, 16 }
 0x105   : > { %6912 = vmatprep.subr.bf16.mxu1 %v7410_v61  ;;  %v2314_v10 = vor.u32 %v2313_v3, %v2310_v60  ;;  %v2383_v60 = vshll.u32 %v5848_v35, 16  ;;  %v2399_v5 = vshll.u32 %v5850_v52, 16  ;;  %v2437_v37 = vshll.u32 %v5855_v23, 16  ;;  %v5859_v52 = vld [vmem:[%s7610_s11 + $0x8c] sm:$0x1] }
 0x106   : > { %v2330_v45 = vsel %vm7685_vm2, %v2325_v36, %v2329_v15  ;;  %v2349_v53 = vrot.slane %v2348_v46, 4  ;;  %v2382_v4 = vrot.slane %v2380_v57, 4  ;;  %v7394_v46 = vld [vmem:[%s7610_s11 + $0x240] sm:$0xff]  }
 0x107   : > { %6647 = vmatmul.mubr.bf16.gmra.mrb[12].mxu1 %v7385_v32  ;;  %v2315_v21 = vrot.slane %v2314_v10, 4  ;;  %v5847_v32 = vld [vmem:[%s7610_s11 + $0x5c] sm:$0x1]  ;;  %v2385_v8 = vrot.slane %v2383_v60, 5  ;;  %v5853_v10 = vld [vmem:[%s7610_s11 + $0x74] sm:$0x1] }
 0x108   : > { %6650 = vmatprep.mubr.bf16.mxu1 %v7388_v50  ;;  %6920 = vmatpush3.bf16.msra.mxu1 %v7410_v61  ;;  %v2375_v40 = vshll.u32 %v5847_v32, 16  ;;  %v2367_v50 = vrot.slane %v2365_v43, 5  ;;  %v2389_v61 = vshll.u32 %v5849_v48, 16  ;;  %v2354_v2 = vsel %vm7685_vm2, %v2349_v53, %v2353_v38  ;;  %v5857_v38 = vld [vmem:[%s7610_s11 + $0x84] sm:$0xf] }
 0x109   : > { %6855 = vmatmul.mubr.bf16.gmra.mrb[28].mxu0 %v7386_v33  ;;  %v2320_v29 = vsel %vm7685_vm2, %v2315_v21, %v2319_v62  ;;  %v2356_v33 = vshrl.u32 %v5845_v17, 16  ;;  %v2386_v15 = vor.u32 %v2385_v8, %v2382_v4  ;;  %v2401_v16 = vrot.slane %v2399_v5, 5  ;;  %v5860_v60 = vld [vmem:[%s7610_s11 + $0x90] sm:$0xf] }
 0x10a   : > { %6874 = vmatprep.mubr.bf16.mxu0 %v5875_v18  ;;  %v7411_v18 = vld [vmem:[%s8447_s1 + $0x138] sm:$0xff]   ;;  %v5879_v49 = vcombine.low %v2320_v29, %v2330_v45  ;;  %v2377_v56 = vrot.slane %v2375_v40, 5  ;;  %v2372_v59 = vor.u32 %v2371_v51, %v2367_v50  ;;  %v2391_v9 = vrot.slane %v2389_v61, 5 }
 0x10b   : > { %6913 = vmatprep.subr.bf16.mxu1 %v7411_v18  ;;  %v2358_v42 = vrot.slane %v2356_v33, 4  ;;  %v2387_v25 = vrot.slane %v2386_v15, 4  ;;  %v2423_v27 = vshll.u32 %v5853_v10, 16  ;;  %v2431_v32 = vshll.u32 %v5854_v14, 16  ;;  %v5863_v15 = vld [vmem:[%s7610_s11 + $0x9c] sm:$0xf] }
 0x10c   : > { %6921 = vmatpush3.bf16.msra.mxu1 %v7411_v18  ;;  %v2373_v7 = vrot.slane %v2372_v59, 4  ;;  %v2413_v18 = vshll.u32 %v5852_v54, 16  ;;  %v8218_v48 = vrot.slane %v2437_v37, 5  ;;  %v2447_v51 = vshll.u32 %v5856_v28, 16 }
 0x10d   : > { %v2362_v55 = vor.u32 %v2361_v47, %v2358_v42  ;;  %v2392_v35 = vsel %vm7685_vm2, %v2387_v25, %v2391_v9  ;;  %v2425_v43 = vrot.slane %v2423_v27, 5  ;;  %v2433_v45 = vrot.slane %v2431_v32, 5  ;;  %v5865_v32 = vld [vmem:[%s7610_s11 + $0xa4] sm:$0x1] }
 0x10e   : > { %v2415_v26 = vrot.slane %v2413_v18, 5  ;;  %v2452_v53 = vshrl.u32 %v5857_v38, 16  ;;  %v2455_v57 = vshll.u32 %v5857_v38, 16  ;;  %v2461_v59 = vshll.u32 %v5858_v39, 16 }
 0x10f   : > { %6651 = vmatmul.mubr.bf16.gmra.mrb[16].mxu1 %v7389_v13  ;;  %v2363_v3 = vrot.slane %v2362_v55, 4  ;;  %v2395_v13 = vrot.slane %v2393_v63, 4  ;;  %v2449_v5 = vrot.slane %v2447_v51, 5  ;;  %v2471_v8 = vshll.u32 %v5859_v52, 16 }
 0x110   : > { %6654 = vmatprep.mubr.bf16.mxu1 %v7390_v19  ;;  %v2378_v19 = vsel %vm7685_vm2, %v2373_v7, %v2377_v56  ;;  %v2420_v42 = vor.u32 %v2419_v30, %v2415_v26  ;;  %v2457_v54 = vrot.slane %v2455_v57, 5  ;;  %v2465_v7 = vshrl.u32 %v5858_v39, 16 }
 0x111   : > { %6875 = vmatmul.mubr.bf16.vlgmr.msra.gmra.mrb[0].mxu0 %v8155_v34  ;;  %v2344_v34 = vsel %vm7685_vm2, %v2339_v41, %v2343_v31  ;;  %v2368_v12 = vsel %vm7685_vm2, %v2363_v3, %v2367_v50  ;;  %v2396_v20 = vor.u32 %v2395_v13, %v2391_v9  ;;  %v2428_v31 = vshrl.u32 %v5854_v14, 16  ;;  %v7393_v41 = vld [vmem:[%s7610_s11 + $0x234] sm:$0xff]  }
 0x112   : > { %6878 = vmatprep.mubr.bf16.mxu0 %v5877_v0  ;;  %v5851_v0 = vld [vmem:[%s7610_s11 + $0x6c] sm:$0xf]  ;;  %v5880_v11 = vcombine.low %v2344_v34, %v2354_v2  ;;  %v5881_v33 = vcombine.low %v2368_v12, %v2378_v19  ;;  %v2421_v34 = vrot.slane %v2420_v42, 4  ;;  %v5861_v2 = vld [vmem:[%s7610_s11 + $0x94] sm:$0xf]  ;;  %v2476_v10 = vshrl.u32 %v5860_v60, 16 }
 0x113   : > { %v2404_v62 = vshrl.u32 %v5851_v0, 16  ;;  %v2407_v17 = vshll.u32 %v5851_v0, 16  ;;  %v2397_v29 = vrot.slane %v2396_v20, 4  ;;  %v2430_v44 = vrot.slane %v2428_v31, 4  ;;  %v5862_v9 = vld [vmem:[%s7610_s11 + $0x98] sm:$0x1] }
 0x114   : > { %v2426_v63 = vsel %vm7685_vm2, %v2421_v34, %v2425_v43  ;;  %v2485_v14 = vshll.u32 %v5861_v2, 16  ;;  %v2467_v18 = vrot.slane %v2465_v7, 4  ;;  %v2478_v19 = vrot.slane %v2476_v10, 4  ;;  %v5870_v7 = vld [vmem:[%s7610_s11 + $0xb8] sm:$0xf] }
 0x115   : > { %v2406_v21 = vrot.slane %v2404_v62, 4  ;;  %v2402_v47 = vsel %vm7685_vm2, %v2397_v29, %v2401_v16  ;;  %v2434_v50 = vor.u32 %v2433_v45, %v2430_v44  ;;  %v2479_v62 = vshll.u32 %v5860_v60, 16  ;;  %v7396_v16 = vld [vmem:[%s7610_s11 + $0x2c4] sm:$0xff]  }
 0x116   : > { %v5882_v61 = vcombine.low %v2392_v35, %v2402_v47  ;;  %v2489_v20 = vshrl.u32 %v5861_v2, 16  ;;  %v2495_v29 = vshll.u32 %v5862_v9, 16  ;;  %v2503_v35 = vshll.u32 %v5863_v15, 16 }
 0x117   : > { %6655 = vmatmul.mubr.bf16.gmra.mrb[20].mxu1 %v7391_v1  ;;  %v2435_v0 = vrot.slane %v2434_v50, 4  ;;  %v2454_v1 = vrot.slane %v2452_v53, 4  ;;  %v2481_v25 = vrot.slane %v2479_v62, 5  ;;  %v5868_v53 = vld [vmem:[%s7610_s11 + $0xb0] sm:$0x1] }
 0x118   : > { %6658 = vmatprep.mubr.bf16.mxu1 %v7392_v6  ;;  %v2463_v6 = vrot.slane %v2461_v59, 5  ;;  %v2491_v28 = vrot.slane %v2489_v20, 4  ;;  %v2497_v39 = vrot.slane %v2495_v29, 5  ;;  %v2505_v44 = vrot.slane %v2503_v35, 5 }
 0x119   : > { %6879 = vmatmul.mubr.bf16.gmra.mrb[4].mxu0 %v5878_v24  ;;  %v2409_v24 = vrot.slane %v2407_v17, 5  ;;  %v2458_v13 = vor.u32 %v2457_v54, %v2454_v1  ;;  %v2440_v17 = vsel %vm7685_vm2, %v2435_v0, %v8218_v48  ;;  %v2482_v31 = vor.u32 %v2481_v25, %v2478_v19 }
 0x11a   : > { %6882 = vmatprep.mubr.bf16.mxu0 %v5879_v49  ;;  %v2441_v49 = vshrl.u32 %v5855_v23, 16  ;;  %v2473_v23 = vrot.slane %v2471_v8, 5  ;;  %v2468_v27 = vor.u32 %v2467_v18, %v2463_v6  ;;  %v2557_v19 = vshll.u32 %v5870_v7, 16 }
 0x11b   : > { %v2410_v36 = vor.u32 %v2409_v24, %v2406_v21  ;;  %v5864_v21 = vld [vmem:[%s7610_s11 + $0xa0] sm:$0xf]  ;;  %v2459_v22 = vrot.slane %v2458_v13, 4  ;;  %v2487_v24 = vrot.slane %v2485_v14, 5  ;;  %v2483_v42 = vrot.slane %v2482_v31, 4 }
 0x11c   : > { %v2443_v56 = vrot.slane %v2441_v49, 4  ;;  %v2469_v37 = vrot.slane %v2468_v27, 4  ;;  %v2513_v45 = vshrl.u32 %v5864_v21, 16  ;;  %v5867_v49 = vld [vmem:[%s7610_s11 + $0xac] sm:$0xf]  ;;  %v2561_v20 = vshrl.u32 %v5870_v7, 16 }
 0x11d   : > { %v2411_v40 = vrot.slane %v2410_v36, 4  ;;  %v2464_v30 = vsel %vm7685_vm2, %v2459_v22, %v2463_v6  ;;  %v5866_v36 = vld [vmem:[%s7610_s11 + $0xa8] sm:$0xf]  ;;  %v2492_v38 = vor.u32 %v2491_v28, %v2487_v24  ;;  %v2537_v54 = vshrl.u32 %v5867_v49, 16  ;;  %v5871_v14 = vld [vmem:[%s7610_s11 + $0xbc] sm:$0x1] }
 0x11e   : > { %v2444_v4 = vor.u32 %v2443_v56, %v8218_v48  ;;  %v2519_v48 = vshll.u32 %v5865_v32, 16  ;;  %v2515_v52 = vrot.slane %v2513_v45, 4  ;;  %v2488_v56 = vsel %vm7685_vm2, %v2483_v42, %v2487_v24  ;;  %v5873_v24 = vld [vmem:[%s7610_s11 + $0xc4] sm:$0xf] }
 0x11f   : > { %v2416_v55 = vsel %vm7685_vm2, %v2411_v40, %v2415_v26  ;;  %6659 = vmatmul.mubr.bf16.gmra.mrb[24].mxu1 %v7393_v41  ;;  %v2509_v41 = vshll.u32 %v5864_v21, 16  ;;  %v2493_v47 = vrot.slane %v2492_v38, 4  ;;  %v2524_v59 = vshrl.u32 %v5866_v36, 16 }
 0x120   : > { %6662 = vmatprep.mubr.bf16.mxu1 %v7394_v46  ;;  %v5883_v3 = vcombine.low %v2416_v55, %v2426_v63  ;;  %v2445_v12 = vrot.slane %v2444_v4, 4  ;;  %v2474_v46 = vsel %vm7685_vm2, %v2469_v37, %v2473_v23  ;;  %v7397_v55 = vld [vmem:[%s7610_s11 + $0x2d0] sm:$0xff]   ;;  %v2527_v60 = vshll.u32 %v5866_v36, 16  ;;  %v7398_v63 = vld [vmem:[%s7610_s11 + $0x2dc] sm:$0xff]  }
 0x121   : > { %6883 = vmatmul.mubr.bf16.gmra.mrb[8].mxu0 %v5880_v11  ;;  %v7395_v11 = vld [vmem:[%s7610_s11 + $0x24c] sm:$0xff]   ;;  %v2511_v40 = vrot.slane %v2509_v41, 5  ;;  %v5885_v50 = vcombine.low %v2464_v30, %v2474_v46  ;;  %v2498_v57 = vsel %vm7685_vm2, %v2493_v47, %v2497_v39  ;;  %v2521_v2 = vrot.slane %v2519_v48, 5  ;;  %v7400_v36 = vld [vmem:[%s7610_s11 + $0x2f4] sm:$0xff]   ;;  %v5874_v39 = vld [vmem:[%s7610_s11 + $0xc8] sm:$0x1] }
 0x122   : > { %6886 = vmatprep.mubr.bf16.mxu0 %v5881_v33  ;;  %v2450_v26 = vsel %vm7685_vm2, %v2445_v12, %v2449_v5  ;;  %v2500_v33 = vshrl.u32 %v5863_v15, 16  ;;  %v2526_v4 = vrot.slane %v2524_v59, 4  ;;  %v2529_v5 = vrot.slane %v2527_v60, 5  ;;  %v7399_v30 = vld [vmem:[%s7610_s11 + $0x2e8] sm:$0xff]  }
 0x123   : > { %v5884_v34 = vcombine.low %v2440_v17, %v2450_v26  ;;  %v2516_v1 = vor.u32 %v2515_v52, %v2511_v40  ;;  %v2543_v6 = vshll.u32 %v5868_v53, 16  ;;  %v5886_v8 = vcombine.low %v2488_v56, %v2498_v57  ;;  %v7401_v56 = vld [vmem:[%s7610_s11 + $0x300] sm:$0xff]  }
 0x124   : > { %v2502_v43 = vrot.slane %v2500_v33, 4  ;;  %v2530_v13 = vor.u32 %v2529_v5, %v2526_v4  ;;  %v2539_v62 = vrot.slane %v2537_v54, 4  ;;  %v2559_v26 = vrot.slane %v2557_v19, 5 }
 0x125   : > { %v2517_v9 = vrot.slane %v2516_v1, 4  ;;  %v2545_v23 = vrot.slane %v2543_v6, 5  ;;  %v2563_v27 = vrot.slane %v2561_v20, 4  ;;  %v2567_v28 = vshll.u32 %v5871_v14, 16 }
 0x126   : > { %v2506_v51 = vor.u32 %v2505_v44, %v2502_v43  ;;  %v2531_v21 = vrot.slane %v2530_v13, 4  ;;  %v2581_v42 = vshll.u32 %v5873_v24, 16  ;;  %v2585_v45 = vshrl.u32 %v5873_v24, 16 }
 0x127   : > { %6663 = vmatmul.mubr.bf16.gmra.mrb[28].mxu1 %v7395_v11  ;;  %v2522_v17 = vsel %vm7685_vm2, %v2517_v9, %v2521_v2  ;;  %v2564_v37 = vor.u32 %v2563_v27, %v2559_v26  ;;  %v2569_v38 = vrot.slane %v2567_v28, 5 }
 0x128   : > { %6698 = vmatprep.mubr.bf16.mxu1 %v7396_v16  ;;  %v2507_v0 = vrot.slane %v2506_v51, 4  ;;  %v5872_v16 = vld [vmem:[%s7610_s11 + $0xc0] sm:$0xf] }
 0x129   : > { %6887 = vmatmul.mubr.bf16.gmra.mrb[12].mxu0 %v5882_v61  ;;  %v5869_v61 = vld [vmem:[%s7610_s11 + $0xb4] sm:$0xf]  ;;  %v2572_v29 = vshrl.u32 %v5872_v16, 16  ;;  %v2575_v35 = vshll.u32 %v5872_v16, 16  ;;  %v2565_v47 = vrot.slane %v2564_v37, 4 }
 0x12a   : > { %6890 = vmatprep.mubr.bf16.mxu0 %v5883_v3  ;;  %v2533_v3 = vshll.u32 %v5867_v49, 16  ;;  %v2548_v11 = vshrl.u32 %v5869_v61, 16  ;;  %v2512_v12 = vsel %vm7685_vm2, %v2507_v0, %v2511_v40  ;;  %v2551_v15 = vshll.u32 %v5869_v61, 16 }
 0x12b   : > { %v5887_v31 = vcombine.low %v2512_v12, %v2522_v17  ;;  %v2574_v41 = vrot.slane %v2572_v29, 4  ;;  %v2577_v44 = vrot.slane %v2575_v35, 5  ;;  %v2583_v40 = vrot.slane %v2581_v42, 5 }
 0x12c   : > { %v2535_v10 = vrot.slane %v2533_v3, 5  ;;  %v2550_v18 = vrot.slane %v2548_v11, 4  ;;  %v2553_v25 = vrot.slane %v2551_v15, 5  ;;  %v2570_v52 = vsel %vm7685_vm2, %v2565_v47, %v2569_v38  ;;  %v7403_v3 = vld [vmem:[%s7610_s11 + $0x318] sm:$0xff]  }
 0x12d   : > { %v2578_v49 = vor.u32 %v2577_v44, %v2574_v41 }
 0x12e   : > { %v2540_v22 = vor.u32 %v2539_v62, %v2535_v10  ;;  %v2554_v33 = vor.u32 %v2553_v25, %v2550_v18  ;;  %v2536_v46 = vsel %vm7685_vm2, %v2531_v21, %v2535_v10  ;;  %v8292_v18 = vld [vmem:[%s8448_s2] ss:$0 sm:$0xff] }
 0x12f   : > { %6699 = vmatmul.mubr.bf16.vlgmr.msra.gmra.mrb[16].mxu1 %v7397_v55  ;;  %v2579_v59 = vrot.slane %v2578_v49, 4  ;;  %v8297_v21 = vld [vmem:[%s8449_s3] ss:$0 sm:$0xff] }
 0x130   : > { %6702 = vmatprep.mubr.bf16.mxu1 %v7398_v63  ;;  %v2541_v32 = vrot.slane %v2540_v22, 4  ;;  %v2555_v43 = vrot.slane %v2554_v33, 4  ;;  %v7402_v63 = vld [vmem:[%s7610_s11 + $0x30c] sm:$0xff]  }
 0x131   : > { %6891 = vmatmul.mubr.bf16.gmra.mrb[16].mxu0 %v5884_v34  ;;  %v2587_v34 = vrot.slane %v2585_v45, 4  ;;  %v2584_v0 = vsel %vm7685_vm2, %v2579_v59, %v2583_v40 }
 0x132   : > { %6894 = vmatprep.mubr.bf16.mxu0 %v5885_v50  ;;  %v2546_v48 = vsel %vm7685_vm2, %v2541_v32, %v2545_v23  ;;  %v2591_v50 = vshll.u32 %v5874_v39, 16  ;;  %v2560_v51 = vsel %vm7685_vm2, %v2555_v43, %v2559_v26 }
 0x133   : > { %v2588_v53 = vor.u32 %v2587_v34, %v2583_v40  ;;  %v5888_v55 = vcombine.low %v2536_v46, %v2546_v48  ;;  %v5889_v57 = vcombine.low %v2560_v51, %v2570_v52 }
 0x134   : > { %v2593_v61 = vrot.slane %v2591_v50, 5 }
 0x135   : > { %v2589_v60 = vrot.slane %v2588_v53, 4 }
 0x137   : > { %6703 = vmatmul.mubr.bf16.gmra.mrb[20].mxu1 %v7399_v30  ;;  %v2594_v1 = vsel %vm7685_vm2, %v2589_v60, %v2593_v61 }
 0x138   : > { %6706 = vmatprep.mubr.bf16.mxu1 %v7400_v36  ;;  %v5890_v2 = vcombine.low %v2584_v0, %v2594_v1 }
 0x139   : > { %6895 = vmatmul.mubr.bf16.gmra.mrb[20].mxu0 %v5886_v8 }
 0x13a   : > { %6898 = vmatprep.mubr.bf16.mxu0 %v5887_v31 }
 0x13f   : > { %6707 = vmatmul.mubr.bf16.gmra.mrb[24].mxu1 %v7401_v56 }
 0x140   : > { %6710 = vmatprep.mubr.bf16.mxu1 %v7402_v63 }
 0x141   : > { %6899 = vmatmul.mubr.bf16.gmra.mrb[24].mxu0 %v5888_v55 }
 0x142   : > { %6902 = vmatprep.mubr.bf16.mxu0 %v5889_v57 }
 0x147   : > { %6711 = vmatmul.mubr.bf16.gmra.mrb[28].mxu1 %v7403_v3 }
 0x149   : > { %6903 = vmatmul.mubr.bf16.gmra.mrb[28].mxu0 %v5890_v2 }
 0x1c2   : > { %v6636_v4 = vpop.f32.mrb[0].mxu1 }
 0x1c3   : > { %v3551_v5 = vpop.f32.mrb[1].mxu1 }
 0x1c4   : > { %v6637_v54 = vpop.f32.mrb[2].mxu1 }
 0x1c5   : > { %v3554_v6 = vpop.f32.mrb[3].mxu1 }
 0x1ca   : > { %v6640_v7 = vpop.f32.mrb[4].mxu1 }
 0x1cb   : > { %v3567_v8 = vpop.f32.mrb[5].mxu1 }
 0x1cc   : > { %v6641_v9 = vpop.f32.mrb[6].mxu1 }
 0x1cd   : > { %v3570_v10 = vpop.f32.mrb[7].mxu1 }
 0x1d2   : > { %v6644_v11 = vpop.f32.mrb[8].mxu1 }
 0x1d3   : > { %v3583_v12 = vpop.f32.mrb[9].mxu1 }
 0x1d4   : > { %v6645_v13 = vpop.f32.mrb[10].mxu1 }
 0x1d5   : > { %v8279_v62 = vpop.f32.mrb[11].mxu1 }
 0x1da   : > { %v8281_v58 = vpop.f32.mrb[12].mxu1 }
 0x1db   : > { %v8283_v14 = vpop.f32.mrb[13].mxu1 }
 0x1dc   : > { %v8285_v15 = vpop.f32.mrb[14].mxu1 }
 0x1dd   : > { %v8287_v16 = vpop.f32.mrb[15].mxu1 }
 0x1e4   : > { %v6876_v17 = vpop.f32.mrb[0].mxu0 }
 0x1e5   : > { %v6922_v19 = vadd.f32 %v6876_v17, %v6636_v4  ;;  %v4926_v20 = vpop.f32.mrb[1].mxu0 }
 0x1e6   : > { %v6923_v22 = vadd.f32 %v4926_v20, %v3551_v5  ;;  %v6877_v23 = vpop.f32.mrb[2].mxu0 }
 0x1e7   : > { %v5094_v25 = vmul.f32 %v6922_v19, %v8292_v18  ;;  %v6924_v24 = vadd.f32 %v6877_v23, %v6637_v54  ;;  %v4929_v26 = vpop.f32.mrb[3].mxu0 }
 0x1e8   : > { %v5092_v27 = vmul.f32 %v6923_v22, %v8292_v18  ;;  %v6925_v28 = vadd.f32 %v4929_v26, %v3554_v6 }
 0x1e9   : > { %v5133_v29 = vadd.f32 %v8297_v21, %v5094_v25  ;;  %v5095_v30 = vmul.f32 %v6924_v24, %v8292_v18 }
 0x1ea   : > { %v5131_v31 = vadd.f32 %v8297_v21, %v5092_v27  ;;  %v5093_v32 = vmul.f32 %v6925_v28, %v8292_v18 }
 0x1eb   : > { %v5134_v33 = vadd.f32 %v8297_v21, %v5095_v30  ;;  %v5165_v37 = vmax.f32 %v5133_v29, 0.0 }
 0x1ec   : > { %v5132_v35 = vadd.f32 %v8297_v21, %v5093_v32  ;;  %v6880_v36 = vpop.f32.mrb[4].mxu0  ;;  %v5163_v42 = vmax.f32 %v5131_v31, 0.0 }
 0x1ed   : > { %v5166_v38 = vmax.f32 %v5134_v33, 0.0  ;;  %v6926_v39 = vadd.f32 %v6880_v36, %v6640_v7  ;;  %v4942_v41 = vpop.f32.mrb[5].mxu0 }
 0x1ee   : > { %v5164_v43 = vmax.f32 %v5132_v35, 0.0  ;;  %v6927_v44 = vadd.f32 %v4942_v41, %v3567_v8  ;;  %v6881_v45 = vpop.f32.mrb[6].mxu0 }
 0x1ef   : > { %v6171_v46 = vpack.c.bf16 %v5166_v38, %v5165_v37  ;;  %v5098_v47 = vmul.f32 %v6926_v39, %v8292_v18  ;;  %v6928_v40 = vadd.f32 %v6881_v45, %v6641_v9  ;;  %v4945_v48 = vpop.f32.mrb[7].mxu0 }
 0x1f0   : > { %v6166_v49 = vpack.c.bf16 %v5164_v43, %v5163_v42  ;;  %v5096_v34 = vmul.f32 %v6927_v44, %v8292_v18  ;;  %v6929_v50 = vadd.f32 %v4945_v48, %v3570_v10 }
 0x1f1   : > { %6243 = vst [vmem:[%s8312_s6 + $0x8] sm:$0xff] %v6171_v46   ;;  %v5137_v51 = vadd.f32 %v8297_v21, %v5098_v47  ;;  %v5099_v52 = vmul.f32 %v6928_v40, %v8292_v18 }
 0x1f2   : > { %6167 = vst [vmem:[%s8312_s6] sm:$0xff] %v6166_v49   ;;  %v5135_v53 = vadd.f32 %v8297_v21, %v5096_v34  ;;  %v5097_v55 = vmul.f32 %v6929_v50, %v8292_v18 }
 0x1f3   : > { %v5138_v56 = vadd.f32 %v8297_v21, %v5099_v52  ;;  %v5169_v60 = vmax.f32 %v5137_v51, 0.0 }
 0x1f4   : > { %v5136_v57 = vadd.f32 %v8297_v21, %v5097_v55  ;;  %v6884_v59 = vpop.f32.mrb[8].mxu0  ;;  %v5167_v1 = vmax.f32 %v5135_v53, 0.0 }
 0x1f5   : > { %v5170_v61 = vmax.f32 %v5138_v56, 0.0  ;;  %v6930_v63 = vadd.f32 %v6884_v59, %v6644_v11  ;;  %v4958_v0 = vpop.f32.mrb[9].mxu0 }
 0x1f6   : > { %v5168_v2 = vmax.f32 %v5136_v57, 0.0  ;;  %v6931_v3 = vadd.f32 %v4958_v0, %v3583_v12  ;;  %v6885_v4 = vpop.f32.mrb[10].mxu0 }
 0x1f7   : > { %v6181_v5 = vpack.c.bf16 %v5170_v61, %v5169_v60  ;;  %v5102_v54 = vmul.f32 %v6930_v63, %v8292_v18  ;;  %v6932_v6 = vadd.f32 %v6885_v4, %v6645_v13  ;;  %v4961_v7 = vpop.f32.mrb[11].mxu0 }
 0x1f8   : > { %v6176_v8 = vpack.c.bf16 %v5168_v2, %v5167_v1  ;;  %v5100_v9 = vmul.f32 %v6931_v3, %v8292_v18  ;;  %v6933_v10 = vadd.f32 %v4961_v7, %v8279_v62 }
 0x1f9   : > { %6245 = vst [vmem:[%s8312_s6 + $0x18] sm:$0xff] %v6181_v5   ;;  %v5141_v17 = vadd.f32 %v8297_v21, %v5102_v54  ;;  %v5103_v11 = vmul.f32 %v6932_v6, %v8292_v18 }
 0x1fa   : > { %6244 = vst [vmem:[%s8312_s6 + $0x10] sm:$0xff] %v6176_v8   ;;  %v5139_v19 = vadd.f32 %v8297_v21, %v5100_v9  ;;  %v5101_v12 = vmul.f32 %v6933_v10, %v8292_v18 }
 0x1fb   : > { %v5142_v20 = vadd.f32 %v8297_v21, %v5103_v11  ;;  %v5173_v23 = vmax.f32 %v5141_v17, 0.0 }
 0x1fc   : > { %v5140_v13 = vadd.f32 %v8297_v21, %v5101_v12  ;;  %v6888_v22 = vpop.f32.mrb[12].mxu0  ;;  %v5171_v26 = vmax.f32 %v5139_v19, 0.0 }
 0x1fd   : > { %v5174_v25 = vmax.f32 %v5142_v20, 0.0  ;;  %v6934_v62 = vadd.f32 %v6888_v22, %v8281_v58  ;;  %v4974_v24 = vpop.f32.mrb[13].mxu0 }
 0x1fe   : > { %v5172_v27 = vmax.f32 %v5140_v13, 0.0  ;;  %v6935_v28 = vadd.f32 %v4974_v24, %v8283_v14  ;;  %v6889_v29 = vpop.f32.mrb[14].mxu0 }
 0x1ff   : > { %v6191_v30 = vpack.c.bf16 %v5174_v25, %v5173_v23  ;;  %v5106_v31 = vmul.f32 %v6934_v62, %v8292_v18  ;;  %v6936_v32 = vadd.f32 %v6889_v29, %v8285_v15  ;;  %v4977_v33 = vpop.f32.mrb[15].mxu0 }
 0x200   : > { %v6186_v35 = vpack.c.bf16 %v5172_v27, %v5171_v26  ;;  %v5104_v36 = vmul.f32 %v6935_v28, %v8292_v18  ;;  %v6937_v37 = vadd.f32 %v4977_v33, %v8287_v16 }
 0x201   : > { %6247 = vst [vmem:[%s8312_s6 + $0x28] sm:$0xff] %v6191_v30   ;;  %v5145_v58 = vadd.f32 %v8297_v21, %v5106_v31  ;;  %v5107_v38 = vmul.f32 %v6936_v32, %v8292_v18 }
 0x202   : > { %6246 = vst [vmem:[%s8312_s6 + $0x20] sm:$0xff] %v6186_v35   ;;  %v5143_v14 = vadd.f32 %v8297_v21, %v5104_v36  ;;  %v5105_v39 = vmul.f32 %v6937_v37, %v8292_v18  ;;  %v6700_v45 = vpop.f32.mrb[16].mxu1 }
 0x203   : > { %v5146_v41 = vadd.f32 %v8297_v21, %v5107_v38  ;;  %v5177_v43 = vmax.f32 %v5145_v58, 0.0  ;;  %v3890_v48 = vpop.f32.mrb[17].mxu1 }
 0x204   : > { %v5144_v15 = vadd.f32 %v8297_v21, %v5105_v39  ;;  %v6892_v42 = vpop.f32.mrb[16].mxu0  ;;  %v5175_v46 = vmax.f32 %v5143_v14, 0.0  ;;  %v6701_v51 = vpop.f32.mrb[18].mxu1 }
 0x205   : > { %v5178_v44 = vmax.f32 %v5146_v41, 0.0  ;;  %v4990_v16 = vpop.f32.mrb[17].mxu0  ;;  %v6938_v40 = vadd.f32 %v6892_v42, %v6700_v45  ;;  %v3893_v57 = vpop.f32.mrb[19].mxu1 }
 0x206   : > { %v5176_v47 = vmax.f32 %v5144_v15, 0.0  ;;  %v6893_v49 = vpop.f32.mrb[18].mxu0  ;;  %v6939_v50 = vadd.f32 %v4990_v16, %v3890_v48 }
 0x207   : > { %v6201_v34 = vpack.c.bf16 %v5178_v44, %v5177_v43  ;;  %v4993_v52 = vpop.f32.mrb[19].mxu0  ;;  %v5110_v55 = vmul.f32 %v6938_v40, %v8292_v18  ;;  %v6940_v56 = vadd.f32 %v6893_v49, %v6701_v51 }
 0x208   : > { %v6196_v53 = vpack.c.bf16 %v5176_v47, %v5175_v46  ;;  %v5108_v59 = vmul.f32 %v6939_v50, %v8292_v18  ;;  %v6941_v60 = vadd.f32 %v4993_v52, %v3893_v57 }
 0x209   : > { %6249 = vst [vmem:[%s8312_s6 + $0x38] sm:$0xff] %v6201_v34   ;;  %v5149_v61 = vadd.f32 %v8297_v21, %v5110_v55  ;;  %v5111_v63 = vmul.f32 %v6940_v56, %v8292_v18 }
 0x20a   : > { %6248 = vst [vmem:[%s8312_s6 + $0x30] sm:$0xff] %v6196_v53   ;;  %v5147_v0 = vadd.f32 %v8297_v21, %v5108_v59  ;;  %v5109_v1 = vmul.f32 %v6941_v60, %v8292_v18  ;;  %v6704_v5 = vpop.f32.mrb[20].mxu1 }
 0x20b   : > { %v5150_v2 = vadd.f32 %v8297_v21, %v5111_v63  ;;  %v5181_v6 = vmax.f32 %v5149_v61, 0.0  ;;  %v3906_v9 = vpop.f32.mrb[21].mxu1 }
 0x20c   : > { %v6896_v3 = vpop.f32.mrb[20].mxu0  ;;  %v5148_v4 = vadd.f32 %v8297_v21, %v5109_v1  ;;  %v5179_v17 = vmax.f32 %v5147_v0, 0.0  ;;  %v6705_v12 = vpop.f32.mrb[22].mxu1 }
 0x20d   : > { %v5006_v54 = vpop.f32.mrb[21].mxu0  ;;  %v5182_v7 = vmax.f32 %v5150_v2, 0.0  ;;  %v6942_v8 = vadd.f32 %v6896_v3, %v6704_v5  ;;  %v3909_v25 = vpop.f32.mrb[23].mxu1 }
 0x20e   : > { %v6897_v10 = vpop.f32.mrb[22].mxu0  ;;  %v5180_v11 = vmax.f32 %v5148_v4, 0.0  ;;  %v6943_v19 = vadd.f32 %v5006_v54, %v3906_v9 }
 0x20f   : > { %v5009_v20 = vpop.f32.mrb[23].mxu0  ;;  %v6211_v13 = vpack.c.bf16 %v5182_v7, %v5181_v6  ;;  %v5114_v22 = vmul.f32 %v6942_v8, %v8292_v18  ;;  %v6944_v23 = vadd.f32 %v6897_v10, %v6705_v12 }
 0x210   : > { %v6206_v62 = vpack.c.bf16 %v5180_v11, %v5179_v17  ;;  %v5112_v24 = vmul.f32 %v6943_v19, %v8292_v18  ;;  %v6945_v26 = vadd.f32 %v5009_v20, %v3909_v25 }
 0x211   : > { %6251 = vst [vmem:[%s8312_s6 + $0x48] sm:$0xff] %v6211_v13   ;;  %v5153_v27 = vadd.f32 %v8297_v21, %v5114_v22  ;;  %v5115_v28 = vmul.f32 %v6944_v23, %v8292_v18 }
 0x212   : > { %6250 = vst [vmem:[%s8312_s6 + $0x40] sm:$0xff] %v6206_v62   ;;  %v5151_v29 = vadd.f32 %v8297_v21, %v5112_v24  ;;  %v5113_v30 = vmul.f32 %v6945_v26, %v8292_v18  ;;  %v6708_v35 = vpop.f32.mrb[24].mxu1 }
 0x213   : > { %v5154_v31 = vadd.f32 %v8297_v21, %v5115_v28  ;;  %v5185_v37 = vmax.f32 %v5153_v27, 0.0  ;;  %v3922_v14 = vpop.f32.mrb[25].mxu1 }
 0x214   : > { %v6900_v32 = vpop.f32.mrb[24].mxu0  ;;  %v5152_v33 = vadd.f32 %v8297_v21, %v5113_v30  ;;  %v5183_v41 = vmax.f32 %v5151_v29, 0.0  ;;  %v6709_v43 = vpop.f32.mrb[26].mxu1 }
 0x215   : > { %v5022_v36 = vpop.f32.mrb[25].mxu0  ;;  %v5186_v58 = vmax.f32 %v5154_v31, 0.0  ;;  %v6946_v38 = vadd.f32 %v6900_v32, %v6708_v35  ;;  %v3925_v47 = vpop.f32.mrb[27].mxu1 }
 0x216   : > { %v6901_v39 = vpop.f32.mrb[26].mxu0  ;;  %v5184_v15 = vmax.f32 %v5152_v33, 0.0  ;;  %v6947_v42 = vadd.f32 %v5022_v36, %v3922_v14 }
 0x217   : > { %v5025_v44 = vpop.f32.mrb[27].mxu0  ;;  %v6221_v45 = vpack.c.bf16 %v5186_v58, %v5185_v37  ;;  %v5118_v16 = vmul.f32 %v6946_v38, %v8292_v18  ;;  %v6948_v46 = vadd.f32 %v6901_v39, %v6709_v43 }
 0x218   : > { %v6216_v40 = vpack.c.bf16 %v5184_v15, %v5183_v41  ;;  %v5116_v48 = vmul.f32 %v6947_v42, %v8292_v18  ;;  %v6949_v49 = vadd.f32 %v5025_v44, %v3925_v47 }
 0x219   : > { %6253 = vst [vmem:[%s8312_s6 + $0x58] sm:$0xff] %v6221_v45   ;;  %v5157_v34 = vadd.f32 %v8297_v21, %v5118_v16  ;;  %v5119_v50 = vmul.f32 %v6948_v46, %v8292_v18 }
 0x21a   : > { %6252 = vst [vmem:[%s8312_s6 + $0x50] sm:$0xff] %v6216_v40   ;;  %v5155_v51 = vadd.f32 %v8297_v21, %v5116_v48  ;;  %v5117_v52 = vmul.f32 %v6949_v49, %v8292_v18  ;;  %v6712_v57 = vpop.f32.mrb[28].mxu1 }
 0x21b   : > { %v5158_v53 = vadd.f32 %v8297_v21, %v5119_v50  ;;  %v5189_v60 = vmax.f32 %v5157_v34, 0.0  ;;  %v3938_v0 = vpop.f32.mrb[29].mxu1 }
 0x21c   : > { %v6904_v55 = vpop.f32.mrb[28].mxu0  ;;  %v5156_v56 = vadd.f32 %v8297_v21, %v5117_v52  ;;  %v5187_v2 = vmax.f32 %v5155_v51, 0.0  ;;  %v6713_v5 = vpop.f32.mrb[30].mxu1 }
 0x21d   : > { %v5038_v59 = vpop.f32.mrb[29].mxu0  ;;  %v5190_v61 = vmax.f32 %v5158_v53, 0.0  ;;  %v6950_v63 = vadd.f32 %v6904_v55, %v6712_v57  ;;  %v3941_v9 = vpop.f32.mrb[31].mxu1 }
 0x21e   : > { %v6905_v1 = vpop.f32.mrb[30].mxu0  ;;  %v5188_v3 = vmax.f32 %v5156_v56, 0.0  ;;  %v6951_v4 = vadd.f32 %v5038_v59, %v3938_v0 }
 0x21f   : > { %v5041_v54 = vpop.f32.mrb[31].mxu0  ;;  %v6231_v6 = vpack.c.bf16 %v5190_v61, %v5189_v60  ;;  %v5122_v7 = vmul.f32 %v6950_v63, %v8292_v18  ;;  %v6952_v8 = vadd.f32 %v6905_v1, %v6713_v5 }
 0x220   : > { %v6226_v10 = vpack.c.bf16 %v5188_v3, %v5187_v2  ;;  %v5120_v17 = vmul.f32 %v6951_v4, %v8292_v18  ;;  %v6953_v11 = vadd.f32 %v5041_v54, %v3941_v9 }
 0x221   : > { %6255 = vst [vmem:[%s8312_s6 + $0x68] sm:$0xff] %v6231_v6   ;;  %v5161_v19 = vadd.f32 %v8297_v21, %v5122_v7  ;;  %v5123_v12 = vmul.f32 %v6952_v8, %v8292_v18 }
 0x222   : > { %6254 = vst [vmem:[%s8312_s6 + $0x60] sm:$0xff] %v6226_v10   ;;  %v5159_v20 = vadd.f32 %v8297_v21, %v5120_v17  ;;  %v5121_v13 = vmul.f32 %v6953_v11, %v8292_v18 }
 0x223   : > { %v5162_v22 = vadd.f32 %v8297_v21, %v5123_v12  ;;  %v5193_v25 = vmax.f32 %v5161_v19, 0.0 }
 0x224   : > { %v5160_v23 = vadd.f32 %v8297_v21, %v5121_v13  ;;  %v5191_v24 = vmax.f32 %v5159_v20, 0.0 }
 0x225   : > { %v5194_v62 = vmax.f32 %v5162_v22, 0.0 }
 0x226   : > { %v5192_v26 = vmax.f32 %v5160_v23, 0.0 }
 0x227   : > { %v6241_v27 = vpack.c.bf16 %v5194_v62, %v5193_v25 }
 0x228   : > { %v6236_v18 = vpack.c.bf16 %v5192_v26, %v5191_v24 }
 0x229   : > { %6257 = vst [vmem:[%s8312_s6 + $0x78] sm:$0xff] %v6241_v27  }
 0x22a   : > { %6256 = vst [vmem:[%s8312_s6 + $0x70] sm:$0xff] %v6236_v18  }
 0x22b   : > { %7425 = shalt.err (!%p7422_p5)
}
 0x22c   : > { %s7426_s11 = scalar_lea.hbm %s8392_s12, 2048  ;;  %s7430_s29 = scalar_lea.hbm %s8450_s4, 4096 }
 0x22d   : > { %p7427_p6 = scmp.ne.s32.totalorder %s8392_s12, %s7426_s11  ;;  %p7431_p10 = scmp.lt.u32.totalorder %s8392_s12, %s8450_s4 }
 0x22e   : > { %p7432_p11 = scmp.lt.u32.totalorder %s7430_s29, %s7426_s11  ;;  %p7434_p13 = scmp.lt.u32.totalorder %s7426_s11, %s8392_s12 }
 0x22f   : > { %p7428_p7 = pnand %p7427_p6, %p7560_p4 }
 0x230   : > { %p7433_p12 = por %p7432_p11, %p7431_p10 }
 0x231   : > { %p7429_p9 = pneg %p7428_p7 }
 0x232   : > { %p7435_p0 = por %p7434_p13, %p7433_p12 }
 0x234   : > { %p7436_p1 = pnand %p7435_p0, %p7429_p9 }
 0x236   : > { %7439 = shalt.err (!%p7436_p1)
}
 0x237   : > { %s7493_s6 = smov 64   ;;  %s7494_s7 = smov 4  }
 0x238   : > { %7179 = dma.vmem_to_hbm [thread:$0]  (%p7560_p4), %s8394_s8, 2048, %s8392_s12, %s8400_s18, %s7493_s6, %s7493_s6, %s7494_s7  }
 0x239 PF: > { %p7185_p2 = scmp.ge.s32.totalorder %s7490_s20, 2  ;;  %s5385_s9 = sand.u32 1, %s7470_s15  }
 0x23a   : > { %s5386_s10 = scalar_lea.sflag [#allocation4], %s5385_s9 }
 0x23b   : > { %p7182_p3 = pnand %p7185_p2, %p7567_p8 }
 0x23d   : > { %7465 = dma.done.wait (!%p7182_p3), %s5386_s10, 2048  }
 0x23e   : > { %7467 = vsyncadd (!%p7182_p3), %s5386_s10, 4294965248  ;;  %s17_s20 = sadd.s32 1, %s7490_s20   ;;  %s8455_s15 = smov %s7474_s16 }
 0x23f   : > { %p14_p5 = scmp.ge.s32.totalorder %s17_s20, 4   ;;  %s8456_s16 = smov %s7478_s17 }
 0x240   : > { %s8457_s17 = smov %s7573_s28  ;;  %s8458_s18 = smov %s7486_s19 }
 0x241   : > { %s8459_s19 = smov %s8461_s23  ;;  %16 = sbr.rel (!%p14_p5) target bundleno = 4 (0x4), region = 113 }
 0x248   :  { %5391 = vsyncpa [#allocation4], 1 }
 0x249   :  { %5393 = vsyncpa [#allocation4 + $0x1], 1 }

</bundles_post_ra>
